<compile_context>
chip_gen: v5e
topology: v5e:2x2
jax: 0.10.0
libtpu: 0.0.40
codegen_flags: <defaults>
</compile_context>

<pallas_src>
import functools

import numpy as np
import jax
import jax.numpy as jnp
from jax import lax
from jax.experimental import pallas as pl
from jax.experimental.pallas import tpu as pltpu


def _round_up(x, m):
    return (x + m - 1) // m * m


def _tree_sum(parts):
    """Balanced pairwise sum (shorter dependency chain than a serial fold)."""
    parts = list(parts)
    while len(parts) > 1:
        nxt = [parts[i] + parts[i + 1] for i in range(0, len(parts) - 1, 2)]
        if len(parts) % 2:
            nxt.append(parts[-1])
        parts = nxt
    return parts[0]


# activations of the reference module, in order
_ACT_FNS = (jnp.tanh, lambda v: jnp.maximum(v, 0.0), jax.nn.sigmoid)


# --------------------------- static layout planning --------------------------
def _build_plan(in_width, conv_dims, kernel_sizes, strides):
    """Derive the banded-buffer geometry (P, V, off, r0, v0) for every layer.

    Per layer l (0-indexed):
      P  : per-sample band length of the layer's input buffer   (P_{l+1} = V_l)
      V  : P // s, number of "virtual" output rows per sample band
      off: row offset of the real input inside its band (>= pad)
      virtual output v reads input rows r0 + k + v*s; real output j sits at
      virtual position v0 + j, so the valid band of the output is [v0, v0+lout).
    """
    L = len(kernel_sizes)
    pads = [k // 2 for k in kernel_sizes]

    lins, louts = [], []
    lin = in_width
    for k, s, p in zip(kernel_sizes, strides, pads):
        lins.append(lin)
        lout = (lin + 2 * p - k) // s + 1
        louts.append(lout)
        lin = lout

    # pick the first layer's left offset so every downstream offset covers its pad
    off1 = None
    for cand in range(pads[0], 4 * max(kernel_sizes) + 32):
        offs_try = [cand]
        ok = True
        for l in range(L - 1):
            nxt = (offs_try[l] - pads[l]) // strides[l]
            offs_try.append(nxt)
            if nxt < pads[l + 1]:
                ok = False
                break
        if ok:
            off1 = cand
            break
    assert off1 is not None, "could not find a feasible left offset"

    offs, r0s, v0s = [off1], [], []
    for l in range(L):
        r0s.append((offs[l] - pads[l]) % strides[l])
        v0s.append((offs[l] - pads[l]) // strides[l])
        offs.append(v0s[l])

    prod_all = 1
    for s in strides:
        prod_all *= s

    # P1 must hold the real input and every layer's valid output range
    need, prod_before = off1 + lins[0], 1
    for l in range(L):
        need = max(need, prod_before * strides[l] * (v0s[l] + louts[l]))
        prod_before *= strides[l]
    P1 = _round_up(need, 8 * prod_all)   # keeps every P_l, V_l a multiple of 8

    layers = []
    P, tail = P1, 0
    for l in range(L):
        V = P // strides[l]
        tail = max(tail, r0s[l] + kernel_sizes[l] - strides[l])
        layers.append(dict(
            cin=conv_dims[l], cout=conv_dims[l + 1],
            k=kernel_sizes[l], s=strides[l], pad=pads[l],
            lin=lins[l], lout=louts[l],
            P=P, V=V, off=offs[l], r0=r0s[l], v0=v0s[l]))
        P = V
    tail = _round_up(max(tail, 1), 8)
    return dict(layers=layers, tail=tail, P1=P1, off1=off1)


# --------------------------- fused forward kernel ---------------------------
def _fused_forward_kernel(*refs, plan, n, linear_dim):
    layers = plan["layers"]
    L = len(layers)
    tail = plan["tail"]

    x_ref = refs[0]                                  # (N*P1 + tail, C0) banded input
    conv_refs = refs[1:1 + 2 * L]                    # w0,b0,w1,b1,...
    wl_ref = refs[1 + 2 * L]                         # (W_out, C_last, Dout)
    bl_ref = refs[2 + 2 * L]                         # (1, Dout)
    o_ref = refs[3 + 2 * L]                          # (N, Dout)
    scratch = refs[4 + 2 * L:]                       # banded buffers, layers 1..L-1

    # zero only the global tail rows once; the band bodies are fully overwritten
    for sref in scratch:
        body_rows = sref.shape[0] - tail
        sref[pl.ds(body_rows, tail), :] = jnp.zeros((tail, sref.shape[1]), sref.dtype)

    src = x_ref
    a = None
    for li, cfg in enumerate(layers):
        w_ref = conv_refs[2 * li]                    # (K, Cin, Cout)
        b_ref = conv_refs[2 * li + 1]                # (1, Cout)
        rows = n * cfg["V"]                          # multiple of 8 by construction

        # per-tap MXU dots on pure 2-D slices of the banded buffer (no reshapes)
        parts = []
        for k in range(cfg["k"]):
            start = cfg["r0"] + k
            if cfg["s"] == 1:
                xs = src[pl.ds(start, rows), :]
            else:
                xs = src[pl.ds(start, rows, stride=cfg["s"]), :]
            parts.append(jnp.dot(xs, w_ref[k], preferred_element_type=jnp.float32))
        z = _tree_sum(parts) + jnp.broadcast_to(
            b_ref[...], (rows, cfg["cout"])).astype(jnp.float32)
        a = _ACT_FNS[li](z)

        if li + 1 < L:
            # zero the junk (non-valid) rows: they become the next layer's zero
            # halo, so one aligned full store builds the next banded buffer.
            ridx = lax.broadcasted_iota(jnp.int32, (rows, cfg["cout"]), 0)
            valid = None
            for i in range(n):                       # n is small & static
                lo = i * cfg["V"] + cfg["v0"]
                vi = (ridx >= lo) & (ridx < lo + cfg["lout"])
                valid = vi if valid is None else (valid | vi)
            a = jnp.where(valid, a, 0.0)
            scratch[li][pl.ds(0, rows), :] = a
            src = scratch[li]

    # final linear; the PyTorch (N, C, W) flatten order is folded into wl_ref.
    last = layers[-1]
    a3 = a.reshape(n, last["V"], last["cout"])       # leading-dim split only
    bias = jnp.broadcast_to(bl_ref[...], (n, linear_dim)).astype(jnp.float32)
    parts = [jnp.dot(a3[:, last["v0"] + w, :], wl_ref[w],
                     preferred_element_type=jnp.float32)
             for w in range(last["lout"])]
    o_ref[...] = (_tree_sum(parts) + bias).astype(o_ref.dtype)


# ----------------------------------- wrapper ---------------------------------
def reference_model_forward(params, A_ncw):
    """A_ncw: (N, Cin, W) exactly like the PyTorch forward input."""
    convs = params["convs"]
    wl, bl = params["linear"]
    n, c0, w0 = A_ncw.shape

    conv_dims = [c0] + [w.shape[0] for (w, _, _, _) in convs]
    ksizes = [w.shape[2] for (w, _, _, _) in convs]
    strides = [s for (_, _, s, _) in convs]
    plan = _build_plan(w0, conv_dims, ksizes, strides)
    layers, tail = plan["layers"], plan["tail"]

    dout, din = wl.shape
    c_last, l_last = layers[-1]["cout"], layers[-1]["lout"]
    assert din == c_last * l_last

    # layer-1 banded input, built once with cheap XLA ops on the tiny input
    P1, off1 = plan["P1"], plan["off1"]
    x_nlc = jnp.transpose(A_ncw, (0, 2, 1)).astype(jnp.float32)       # (N, W, C0)
    x_band = jnp.pad(x_nlc, ((0, 0), (off1, P1 - off1 - w0), (0, 0)))  # (N, P1, C0)
    x_flat = jnp.pad(x_band.reshape(n * P1, c0), ((0, tail), (0, 0)))

    # parameter-side layout transforms (done once, outside the kernel)
    inputs = [x_flat]
    for (w, b, _, _) in convs:
        inputs.append(jnp.transpose(w, (2, 1, 0)))        # (K, Cin, Cout)
        inputs.append(b.reshape(1, -1))                   # (1, Cout)
    # linear weight reordered so that Wr[w, c, d] = Wlin[d, c*W_out + w]
    wl_r = jnp.transpose(wl.reshape(dout, c_last, l_last), (2, 1, 0))
    inputs.append(wl_r)                                   # (W_out, C_last, Dout)
    inputs.append(bl.reshape(1, dout))                    # (1, Dout)

    # advisory cost estimate (gridless custom call, so XLA cannot infer it)
    flops = 2 * n * din * dout
    transcendentals = 0
    for li, cfg in enumerate(layers):
        flops += 2 * n * cfg["V"] * cfg["k"] * cfg["cin"] * cfg["cout"]
        if li in (0, len(layers) - 1):                    # tanh / sigmoid layers
            transcendentals += n * cfg["V"] * cfg["cout"]
    bytes_accessed = sum(int(np.prod(x.shape)) * 4 for x in inputs) + n * dout * 4

    vmem = pl.BlockSpec(memory_space=pltpu.MemorySpace.VMEM)
    kern = functools.partial(_fused_forward_kernel, plan=plan, n=n, linear_dim=dout)

    return pl.pallas_call(
        kern,
        out_shape=jax.ShapeDtypeStruct((n, dout), jnp.float32),
        in_specs=[vmem] * len(inputs),
        out_specs=vmem,
        scratch_shapes=[pltpu.VMEM((n * cfg["P"] + tail, cfg["cin"]), jnp.float32)
                        for cfg in layers[1:]],
        cost_estimate=pl.CostEstimate(flops=int(flops),
                                      transcendentals=int(transcendentals),
                                      bytes_accessed=int(bytes_accessed)),
    )(*inputs)
    # TODO(synk): add a batch grid axis with dimension_semantics=("parallel",)
    # if N ever scales (v7x has 2 TensorCores); pointless at N=2.


# -------------------------------- parameters ---------------------------------
def init_params(key, in_width=128, conv_dims=(24, 56, 28, 14),
                kernel_sizes=(5, 6, 2), strides=(1, 2, 2), linear_dim=10):
    keys = jax.random.split(key, 2 * (len(conv_dims) - 1) + 2)
    ki = 0
    convs = []
    w_out = in_width
    for i in range(1, len(conv_dims)):
        cin, cout = conv_dims[i - 1], conv_dims[i]
        k, s = kernel_sizes[i - 1], strides[i - 1]
        pad = k // 2
        bound = 1.0 / np.sqrt(cin * k)
        w = jax.random.uniform(keys[ki], (cout, cin, k), jnp.float32, -bound, bound)
        ki += 1
        bvec = jax.random.uniform(keys[ki], (cout,), jnp.float32, -bound, bound)
        ki += 1
        convs.append((w, bvec, s, pad))
        w_out = (w_out + 2 * pad - k) // s + 1
    din = w_out * conv_dims[-1]
    bound = 1.0 / np.sqrt(din)
    wl = jax.random.uniform(keys[ki], (linear_dim, din), jnp.float32, -bound, bound)
    ki += 1
    bl = jax.random.uniform(keys[ki], (linear_dim,), jnp.float32, -bound, bound)
    return {"convs": convs, "linear": (wl, bl)}


# ------------------------------ pure-JAX reference ---------------------------
def ref_forward(params, A_ncw):
    acts = [jnp.tanh, lambda v: jnp.maximum(v, 0.0), jax.nn.sigmoid]
    x = A_ncw
    for (w, b, st, pad), act in zip(params["convs"], acts):
        y = lax.conv_general_dilated(
            x, w, window_strides=(st,), padding=[(pad, pad)],
            dimension_numbers=("NCH", "OIH", "NCH"))
        x = act(y + b[None, :, None])
    n = x.shape[0]
    x = x.reshape(n, -1)
    wl, bl = params["linear"]
    return x @ wl.T + bl


if __name__ == "__main__":
    key = jax.random.PRNGKey(0)
    pkey, xkey = jax.random.split(key)
    params = init_params(pkey)
    # small batch, module-default channels/width: (N=2, Cin=24, W=128)
    A = jax.random.normal(xkey, (2, 24, 128), jnp.float32)

    out = reference_model_forward(params, A)
    out = jax.block_until_ready(out)
    assert out.shape == (2, 10)

    ref = ref_forward(params, A)
    np.testing.assert_allclose(np.asarray(out), np.asarray(ref),
                               rtol=1e-4, atol=1e-4)
    print("KERNEL_OK")
</pallas_src>

<mosaic_0001>
module attributes {stable_mosaic.version = 11 : i64} {
  func.func @_fused_forward_kernel(%arg0: memref<328x24xf32, #tpu.memory_space<vmem>>, %arg1: memref<5x24x56xf32, #tpu.memory_space<vmem>>, %arg2: memref<1x56xf32, #tpu.memory_space<vmem>>, %arg3: memref<6x56x28xf32, #tpu.memory_space<vmem>>, %arg4: memref<1x28xf32, #tpu.memory_space<vmem>>, %arg5: memref<2x28x14xf32, #tpu.memory_space<vmem>>, %arg6: memref<1x14xf32, #tpu.memory_space<vmem>>, %arg7: memref<33x14x10xf32, #tpu.memory_space<vmem>>, %arg8: memref<1x10xf32, #tpu.memory_space<vmem>>, %arg9: memref<2x10xf32, #tpu.memory_space<vmem>>, %arg10: memref<328x56xf32, #tpu.memory_space<vmem>>, %arg11: memref<168x28xf32, #tpu.memory_space<vmem>>) attributes {dimension_semantics = [], scalar_prefetch = 0 : i64, scratch_operands = 2 : i64, tpu.core_type = #tpu.core_type<tc>} {
    %cst = arith.constant 0.000000e+00 : f32
    %0 = vector.broadcast %cst : f32 to vector<8x56xf32>
    %c320 = arith.constant 320 : index
    %c0 = arith.constant 0 : index
    %1 = vector.load %arg10[%c320, %c0] : memref<328x56xf32, #tpu.memory_space<vmem>>, vector<8x56xf32>
    tpu.vector_store %arg10[%c320, %c0], %0 {strides = array<i32>} : memref<328x56xf32, #tpu.memory_space<vmem>>, vector<8x56xf32>,
    %cst_0 = arith.constant 0.000000e+00 : f32
    %2 = vector.broadcast %cst_0 : f32 to vector<8x28xf32>
    %c160 = arith.constant 160 : index
    %c0_1 = arith.constant 0 : index
    %3 = vector.load %arg11[%c160, %c0_1] : memref<168x28xf32, #tpu.memory_space<vmem>>, vector<8x28xf32>
    tpu.vector_store %arg11[%c160, %c0_1], %2 {strides = array<i32>} : memref<168x28xf32, #tpu.memory_space<vmem>>, vector<8x28xf32>,
    %c0_2 = arith.constant 0 : index
    %c0_3 = arith.constant 0 : index
    %4 = vector.load %arg0[%c0_2, %c0_3] : memref<328x24xf32, #tpu.memory_space<vmem>>, vector<320x24xf32>
    %c0_4 = arith.constant 0 : index
    %c0_5 = arith.constant 0 : index
    %c0_6 = arith.constant 0 : index
    %5 = vector.load %arg1[%c0_4, %c0_5, %c0_6] : memref<5x24x56xf32, #tpu.memory_space<vmem>>, vector<1x24x56xf32>
    %6 = vector.shape_cast %5 : vector<1x24x56xf32> to vector<24x56xf32>
    %cst_7 = arith.constant dense<0.000000e+00> : vector<320x56xf32>
    %7 = tpu.matmul %4, %6, %cst_7 {dimension_numbers = #tpu.dot_dimension_numbers<[1], [0], [0], [1], [0, 0, 1, 1], [], []>} : vector<320x24xf32>, vector<24x56xf32>, vector<320x56xf32> -> vector<320x56xf32>
    %c1 = arith.constant 1 : index
    %c0_8 = arith.constant 0 : index
    %8 = vector.load %arg0[%c1, %c0_8] : memref<328x24xf32, #tpu.memory_space<vmem>>, vector<320x24xf32>
    %c1_9 = arith.constant 1 : index
    %c0_10 = arith.constant 0 : index
    %c0_11 = arith.constant 0 : index
    %9 = vector.load %arg1[%c1_9, %c0_10, %c0_11] : memref<5x24x56xf32, #tpu.memory_space<vmem>>, vector<1x24x56xf32>
    %10 = vector.shape_cast %9 : vector<1x24x56xf32> to vector<24x56xf32>
    %cst_12 = arith.constant dense<0.000000e+00> : vector<320x56xf32>
    %11 = tpu.matmul %8, %10, %cst_12 {dimension_numbers = #tpu.dot_dimension_numbers<[1], [0], [0], [1], [0, 0, 1, 1], [], []>} : vector<320x24xf32>, vector<24x56xf32>, vector<320x56xf32> -> vector<320x56xf32>
    %c2 = arith.constant 2 : index
    %c0_13 = arith.constant 0 : index
    %12 = vector.load %arg0[%c2, %c0_13] : memref<328x24xf32, #tpu.memory_space<vmem>>, vector<320x24xf32>
    %c2_14 = arith.constant 2 : index
    %c0_15 = arith.constant 0 : index
    %c0_16 = arith.constant 0 : index
    %13 = vector.load %arg1[%c2_14, %c0_15, %c0_16] : memref<5x24x56xf32, #tpu.memory_space<vmem>>, vector<1x24x56xf32>
    %14 = vector.shape_cast %13 : vector<1x24x56xf32> to vector<24x56xf32>
    %cst_17 = arith.constant dense<0.000000e+00> : vector<320x56xf32>
    %15 = tpu.matmul %12, %14, %cst_17 {dimension_numbers = #tpu.dot_dimension_numbers<[1], [0], [0], [1], [0, 0, 1, 1], [], []>} : vector<320x24xf32>, vector<24x56xf32>, vector<320x56xf32> -> vector<320x56xf32>
    %c3 = arith.constant 3 : index
    %c0_18 = arith.constant 0 : index
    %16 = vector.load %arg0[%c3, %c0_18] : memref<328x24xf32, #tpu.memory_space<vmem>>, vector<320x24xf32>
    %c3_19 = arith.constant 3 : index
    %c0_20 = arith.constant 0 : index
    %c0_21 = arith.constant 0 : index
    %17 = vector.load %arg1[%c3_19, %c0_20, %c0_21] : memref<5x24x56xf32, #tpu.memory_space<vmem>>, vector<1x24x56xf32>
    %18 = vector.shape_cast %17 : vector<1x24x56xf32> to vector<24x56xf32>
    %cst_22 = arith.constant dense<0.000000e+00> : vector<320x56xf32>
    %19 = tpu.matmul %16, %18, %cst_22 {dimension_numbers = #tpu.dot_dimension_numbers<[1], [0], [0], [1], [0, 0, 1, 1], [], []>} : vector<320x24xf32>, vector<24x56xf32>, vector<320x56xf32> -> vector<320x56xf32>
    %c4 = arith.constant 4 : index
    %c0_23 = arith.constant 0 : index
    %20 = vector.load %arg0[%c4, %c0_23] : memref<328x24xf32, #tpu.memory_space<vmem>>, vector<320x24xf32>
    %c4_24 = arith.constant 4 : index
    %c0_25 = arith.constant 0 : index
    %c0_26 = arith.constant 0 : index
    %21 = vector.load %arg1[%c4_24, %c0_25, %c0_26] : memref<5x24x56xf32, #tpu.memory_space<vmem>>, vector<1x24x56xf32>
    %22 = vector.shape_cast %21 : vector<1x24x56xf32> to vector<24x56xf32>
    %cst_27 = arith.constant dense<0.000000e+00> : vector<320x56xf32>
    %23 = tpu.matmul %20, %22, %cst_27 {dimension_numbers = #tpu.dot_dimension_numbers<[1], [0], [0], [1], [0, 0, 1, 1], [], []>} : vector<320x24xf32>, vector<24x56xf32>, vector<320x56xf32> -> vector<320x56xf32>
    %24 = arith.addf %7, %11 : vector<320x56xf32>
    %25 = arith.addf %15, %19 : vector<320x56xf32>
    %26 = arith.addf %24, %25 : vector<320x56xf32>
    %27 = arith.addf %26, %23 : vector<320x56xf32>
    %c0_28 = arith.constant 0 : index
    %c0_29 = arith.constant 0 : index
    %28 = vector.load %arg2[%c0_28, %c0_29] : memref<1x56xf32, #tpu.memory_space<vmem>>, vector<1x56xf32>
    %29 = vector.shape_cast %28 : vector<1x56xf32> to vector<1x56xf32>
    %30 = vector.broadcast %29 : vector<1x56xf32> to vector<320x56xf32>
    %31 = arith.addf %27, %30 : vector<320x56xf32>
    %32 = math.tanh %31 : vector<320x56xf32>
    %33 = tpu.iota {dimensions = array<i32: 0>} : vector<320x56xi32>
    %c5_i32 = arith.constant 5 : i32
    %34 = vector.broadcast %c5_i32 : i32 to vector<320x56xi32>
    %35 = arith.cmpi sge, %33, %34 : vector<320x56xi32>
    %c133_i32 = arith.constant 133 : i32
    %36 = vector.broadcast %c133_i32 : i32 to vector<320x56xi32>
    %37 = arith.cmpi slt, %33, %36 : vector<320x56xi32>
    %38 = arith.andi %35, %37 : vector<320x56xi1>
    %c165_i32 = arith.constant 165 : i32
    %39 = vector.broadcast %c165_i32 : i32 to vector<320x56xi32>
    %40 = arith.cmpi sge, %33, %39 : vector<320x56xi32>
    %c293_i32 = arith.constant 293 : i32
    %41 = vector.broadcast %c293_i32 : i32 to vector<320x56xi32>
    %42 = arith.cmpi slt, %33, %41 : vector<320x56xi32>
    %43 = arith.andi %40, %42 : vector<320x56xi1>
    %44 = arith.ori %38, %43 : vector<320x56xi1>
    %cst_30 = arith.constant 0.000000e+00 : f32
    %45 = vector.broadcast %cst_30 : f32 to vector<320x56xf32>
    %46 = arith.select %44, %32, %45 : vector<320x56xi1>, vector<320x56xf32>
    %c0_31 = arith.constant 0 : index
    %c0_32 = arith.constant 0 : index
    %47 = vector.load %arg10[%c0_31, %c0_32] : memref<328x56xf32, #tpu.memory_space<vmem>>, vector<320x56xf32>
    tpu.vector_store %arg10[%c0_31, %c0_32], %46 {strides = array<i32>} : memref<328x56xf32, #tpu.memory_space<vmem>>, vector<320x56xf32>,
    %c0_33 = arith.constant 0 : index
    %c0_34 = arith.constant 0 : index
    %48 = tpu.strided_load %arg10[%c0_33, %c0_34] {strides = array<i32: 2, 1>} : memref<328x56xf32, #tpu.memory_space<vmem>>, vector<160x56xf32>
    %c0_35 = arith.constant 0 : index
    %c0_36 = arith.constant 0 : index
    %c0_37 = arith.constant 0 : index
    %49 = vector.load %arg3[%c0_35, %c0_36, %c0_37] : memref<6x56x28xf32, #tpu.memory_space<vmem>>, vector<1x56x28xf32>
    %50 = vector.shape_cast %49 : vector<1x56x28xf32> to vector<56x28xf32>
    %cst_38 = arith.constant dense<0.000000e+00> : vector<160x28xf32>
    %51 = tpu.matmul %48, %50, %cst_38 {dimension_numbers = #tpu.dot_dimension_numbers<[1], [0], [0], [1], [0, 0, 1, 1], [], []>} : vector<160x56xf32>, vector<56x28xf32>, vector<160x28xf32> -> vector<160x28xf32>
    %c1_39 = arith.constant 1 : index
    %c0_40 = arith.constant 0 : index
    %52 = tpu.strided_load %arg10[%c1_39, %c0_40] {strides = array<i32: 2, 1>} : memref<328x56xf32, #tpu.memory_space<vmem>>, vector<160x56xf32>
    %c1_41 = arith.constant 1 : index
    %c0_42 = arith.constant 0 : index
    %c0_43 = arith.constant 0 : index
    %53 = vector.load %arg3[%c1_41, %c0_42, %c0_43] : memref<6x56x28xf32, #tpu.memory_space<vmem>>, vector<1x56x28xf32>
    %54 = vector.shape_cast %53 : vector<1x56x28xf32> to vector<56x28xf32>
    %cst_44 = arith.constant dense<0.000000e+00> : vector<160x28xf32>
    %55 = tpu.matmul %52, %54, %cst_44 {dimension_numbers = #tpu.dot_dimension_numbers<[1], [0], [0], [1], [0, 0, 1, 1], [], []>} : vector<160x56xf32>, vector<56x28xf32>, vector<160x28xf32> -> vector<160x28xf32>
    %c2_45 = arith.constant 2 : index
    %c0_46 = arith.constant 0 : index
    %56 = tpu.strided_load %arg10[%c2_45, %c0_46] {strides = array<i32: 2, 1>} : memref<328x56xf32, #tpu.memory_space<vmem>>, vector<160x56xf32>
    %c2_47 = arith.constant 2 : index
    %c0_48 = arith.constant 0 : index
    %c0_49 = arith.constant 0 : index
    %57 = vector.load %arg3[%c2_47, %c0_48, %c0_49] : memref<6x56x28xf32, #tpu.memory_space<vmem>>, vector<1x56x28xf32>
    %58 = vector.shape_cast %57 : vector<1x56x28xf32> to vector<56x28xf32>
    %cst_50 = arith.constant dense<0.000000e+00> : vector<160x28xf32>
    %59 = tpu.matmul %56, %58, %cst_50 {dimension_numbers = #tpu.dot_dimension_numbers<[1], [0], [0], [1], [0, 0, 1, 1], [], []>} : vector<160x56xf32>, vector<56x28xf32>, vector<160x28xf32> -> vector<160x28xf32>
    %c3_51 = arith.constant 3 : index
    %c0_52 = arith.constant 0 : index
    %60 = tpu.strided_load %arg10[%c3_51, %c0_52] {strides = array<i32: 2, 1>} : memref<328x56xf32, #tpu.memory_space<vmem>>, vector<160x56xf32>
    %c3_53 = arith.constant 3 : index
    %c0_54 = arith.constant 0 : index
    %c0_55 = arith.constant 0 : index
    %61 = vector.load %arg3[%c3_53, %c0_54, %c0_55] : memref<6x56x28xf32, #tpu.memory_space<vmem>>, vector<1x56x28xf32>
    %62 = vector.shape_cast %61 : vector<1x56x28xf32> to vector<56x28xf32>
    %cst_56 = arith.constant dense<0.000000e+00> : vector<160x28xf32>
    %63 = tpu.matmul %60, %62, %cst_56 {dimension_numbers = #tpu.dot_dimension_numbers<[1], [0], [0], [1], [0, 0, 1, 1], [], []>} : vector<160x56xf32>, vector<56x28xf32>, vector<160x28xf32> -> vector<160x28xf32>
    %c4_57 = arith.constant 4 : index
    %c0_58 = arith.constant 0 : index
    %64 = tpu.strided_load %arg10[%c4_57, %c0_58] {strides = array<i32: 2, 1>} : memref<328x56xf32, #tpu.memory_space<vmem>>, vector<160x56xf32>
    %c4_59 = arith.constant 4 : index
    %c0_60 = arith.constant 0 : index
    %c0_61 = arith.constant 0 : index
    %65 = vector.load %arg3[%c4_59, %c0_60, %c0_61] : memref<6x56x28xf32, #tpu.memory_space<vmem>>, vector<1x56x28xf32>
    %66 = vector.shape_cast %65 : vector<1x56x28xf32> to vector<56x28xf32>
    %cst_62 = arith.constant dense<0.000000e+00> : vector<160x28xf32>
    %67 = tpu.matmul %64, %66, %cst_62 {dimension_numbers = #tpu.dot_dimension_numbers<[1], [0], [0], [1], [0, 0, 1, 1], [], []>} : vector<160x56xf32>, vector<56x28xf32>, vector<160x28xf32> -> vector<160x28xf32>
    %c5 = arith.constant 5 : index
    %c0_63 = arith.constant 0 : index
    %68 = tpu.strided_load %arg10[%c5, %c0_63] {strides = array<i32: 2, 1>} : memref<328x56xf32, #tpu.memory_space<vmem>>, vector<160x56xf32>
    %c5_64 = arith.constant 5 : index
    %c0_65 = arith.constant 0 : index
    %c0_66 = arith.constant 0 : index
    %69 = vector.load %arg3[%c5_64, %c0_65, %c0_66] : memref<6x56x28xf32, #tpu.memory_space<vmem>>, vector<1x56x28xf32>
    %70 = vector.shape_cast %69 : vector<1x56x28xf32> to vector<56x28xf32>
    %cst_67 = arith.constant dense<0.000000e+00> : vector<160x28xf32>
    %71 = tpu.matmul %68, %70, %cst_67 {dimension_numbers = #tpu.dot_dimension_numbers<[1], [0], [0], [1], [0, 0, 1, 1], [], []>} : vector<160x56xf32>, vector<56x28xf32>, vector<160x28xf32> -> vector<160x28xf32>
    %72 = arith.addf %51, %55 : vector<160x28xf32>
    %73 = arith.addf %59, %63 : vector<160x28xf32>
    %74 = arith.addf %67, %71 : vector<160x28xf32>
    %75 = arith.addf %72, %73 : vector<160x28xf32>
    %76 = arith.addf %75, %74 : vector<160x28xf32>
    %c0_68 = arith.constant 0 : index
    %c0_69 = arith.constant 0 : index
    %77 = vector.load %arg4[%c0_68, %c0_69] : memref<1x28xf32, #tpu.memory_space<vmem>>, vector<1x28xf32>
    %78 = vector.shape_cast %77 : vector<1x28xf32> to vector<1x28xf32>
    %79 = vector.broadcast %78 : vector<1x28xf32> to vector<160x28xf32>
    %80 = arith.addf %76, %79 : vector<160x28xf32>
    %cst_70 = arith.constant 0.000000e+00 : f32
    %81 = vector.broadcast %cst_70 : f32 to vector<160x28xf32>
    %82 = arith.maximumf %80, %81 : vector<160x28xf32>
    %83 = tpu.iota {dimensions = array<i32: 0>} : vector<160x28xi32>
    %c1_i32 = arith.constant 1 : i32
    %84 = vector.broadcast %c1_i32 : i32 to vector<160x28xi32>
    %85 = arith.cmpi sge, %83, %84 : vector<160x28xi32>
    %c66_i32 = arith.constant 66 : i32
    %86 = vector.broadcast %c66_i32 : i32 to vector<160x28xi32>
    %87 = arith.cmpi slt, %83, %86 : vector<160x28xi32>
    %88 = arith.andi %85, %87 : vector<160x28xi1>
    %c81_i32 = arith.constant 81 : i32
    %89 = vector.broadcast %c81_i32 : i32 to vector<160x28xi32>
    %90 = arith.cmpi sge, %83, %89 : vector<160x28xi32>
    %c146_i32 = arith.constant 146 : i32
    %91 = vector.broadcast %c146_i32 : i32 to vector<160x28xi32>
    %92 = arith.cmpi slt, %83, %91 : vector<160x28xi32>
    %93 = arith.andi %90, %92 : vector<160x28xi1>
    %94 = arith.ori %88, %93 : vector<160x28xi1>
    %cst_71 = arith.constant 0.000000e+00 : f32
    %95 = vector.broadcast %cst_71 : f32 to vector<160x28xf32>
    %96 = arith.select %94, %82, %95 : vector<160x28xi1>, vector<160x28xf32>
    %c0_72 = arith.constant 0 : index
    %c0_73 = arith.constant 0 : index
    %97 = vector.load %arg11[%c0_72, %c0_73] : memref<168x28xf32, #tpu.memory_space<vmem>>, vector<160x28xf32>
    tpu.vector_store %arg11[%c0_72, %c0_73], %96 {strides = array<i32>} : memref<168x28xf32, #tpu.memory_space<vmem>>, vector<160x28xf32>,
    %c0_74 = arith.constant 0 : index
    %c0_75 = arith.constant 0 : index
    %98 = tpu.strided_load %arg11[%c0_74, %c0_75] {strides = array<i32: 2, 1>} : memref<168x28xf32, #tpu.memory_space<vmem>>, vector<80x28xf32>
    %c0_76 = arith.constant 0 : index
    %c0_77 = arith.constant 0 : index
    %c0_78 = arith.constant 0 : index
    %99 = vector.load %arg5[%c0_76, %c0_77, %c0_78] : memref<2x28x14xf32, #tpu.memory_space<vmem>>, vector<1x28x14xf32>
    %100 = vector.shape_cast %99 : vector<1x28x14xf32> to vector<28x14xf32>
    %cst_79 = arith.constant dense<0.000000e+00> : vector<80x14xf32>
    %101 = tpu.matmul %98, %100, %cst_79 {dimension_numbers = #tpu.dot_dimension_numbers<[1], [0], [0], [1], [0, 0, 1, 1], [], []>} : vector<80x28xf32>, vector<28x14xf32>, vector<80x14xf32> -> vector<80x14xf32>
    %c1_80 = arith.constant 1 : index
    %c0_81 = arith.constant 0 : index
    %102 = tpu.strided_load %arg11[%c1_80, %c0_81] {strides = array<i32: 2, 1>} : memref<168x28xf32, #tpu.memory_space<vmem>>, vector<80x28xf32>
    %c1_82 = arith.constant 1 : index
    %c0_83 = arith.constant 0 : index
    %c0_84 = arith.constant 0 : index
    %103 = vector.load %arg5[%c1_82, %c0_83, %c0_84] : memref<2x28x14xf32, #tpu.memory_space<vmem>>, vector<1x28x14xf32>
    %104 = vector.shape_cast %103 : vector<1x28x14xf32> to vector<28x14xf32>
    %cst_85 = arith.constant dense<0.000000e+00> : vector<80x14xf32>
    %105 = tpu.matmul %102, %104, %cst_85 {dimension_numbers = #tpu.dot_dimension_numbers<[1], [0], [0], [1], [0, 0, 1, 1], [], []>} : vector<80x28xf32>, vector<28x14xf32>, vector<80x14xf32> -> vector<80x14xf32>
    %106 = arith.addf %101, %105 : vector<80x14xf32>
    %c0_86 = arith.constant 0 : index
    %c0_87 = arith.constant 0 : index
    %107 = vector.load %arg6[%c0_86, %c0_87] : memref<1x14xf32, #tpu.memory_space<vmem>>, vector<1x14xf32>
    %108 = vector.shape_cast %107 : vector<1x14xf32> to vector<1x14xf32>
    %109 = vector.broadcast %108 : vector<1x14xf32> to vector<80x14xf32>
    %110 = arith.addf %106, %109 : vector<80x14xf32>
    %111 = arith.negf %110 : vector<80x14xf32>
    %112 = math.exp %111 : vector<80x14xf32>
    %cst_88 = arith.constant 1.000000e+00 : f32
    %113 = vector.broadcast %cst_88 : f32 to vector<80x14xf32>
    %114 = arith.addf %113, %112 : vector<80x14xf32>
    %115 = arith.divf %113, %114 : vector<80x14xf32>
    %116 = vector.shape_cast %115 : vector<80x14xf32> to vector<2x40x14xf32>
    %c0_89 = arith.constant 0 : index
    %c0_90 = arith.constant 0 : index
    %117 = vector.load %arg8[%c0_89, %c0_90] : memref<1x10xf32, #tpu.memory_space<vmem>>, vector<1x10xf32>
    %118 = vector.shape_cast %117 : vector<1x10xf32> to vector<1x10xf32>
    %119 = vector.broadcast %118 : vector<1x10xf32> to vector<2x10xf32>
    %120 = vector.extract_strided_slice %116 {offsets = [0, 0, 0], sizes = [2, 1, 14], strides = [1, 1, 1]} : vector<2x40x14xf32> to vector<2x1x14xf32>
    %121 = vector.shape_cast %120 : vector<2x1x14xf32> to vector<2x14xf32>
    %c0_91 = arith.constant 0 : index
    %c0_92 = arith.constant 0 : index
    %c0_93 = arith.constant 0 : index
    %122 = vector.load %arg7[%c0_91, %c0_92, %c0_93] : memref<33x14x10xf32, #tpu.memory_space<vmem>>, vector<1x14x10xf32>
    %123 = vector.shape_cast %122 : vector<1x14x10xf32> to vector<14x10xf32>
    %cst_94 = arith.constant dense<0.000000e+00> : vector<2x10xf32>
    %124 = tpu.matmul %121, %123, %cst_94 {dimension_numbers = #tpu.dot_dimension_numbers<[1], [0], [0], [1], [0, 0, 1, 1], [], []>} : vector<2x14xf32>, vector<14x10xf32>, vector<2x10xf32> -> vector<2x10xf32>
    %125 = vector.extract_strided_slice %116 {offsets = [0, 1, 0], sizes = [2, 1, 14], strides = [1, 1, 1]} : vector<2x40x14xf32> to vector<2x1x14xf32>
    %126 = vector.shape_cast %125 : vector<2x1x14xf32> to vector<2x14xf32>
    %c1_95 = arith.constant 1 : index
    %c0_96 = arith.constant 0 : index
    %c0_97 = arith.constant 0 : index
    %127 = vector.load %arg7[%c1_95, %c0_96, %c0_97] : memref<33x14x10xf32, #tpu.memory_space<vmem>>, vector<1x14x10xf32>
    %128 = vector.shape_cast %127 : vector<1x14x10xf32> to vector<14x10xf32>
    %cst_98 = arith.constant dense<0.000000e+00> : vector<2x10xf32>
    %129 = tpu.matmul %126, %128, %cst_98 {dimension_numbers = #tpu.dot_dimension_numbers<[1], [0], [0], [1], [0, 0, 1, 1], [], []>} : vector<2x14xf32>, vector<14x10xf32>, vector<2x10xf32> -> vector<2x10xf32>
    %130 = vector.extract_strided_slice %116 {offsets = [0, 2, 0], sizes = [2, 1, 14], strides = [1, 1, 1]} : vector<2x40x14xf32> to vector<2x1x14xf32>
    %131 = vector.shape_cast %130 : vector<2x1x14xf32> to vector<2x14xf32>
    %c2_99 = arith.constant 2 : index
    %c0_100 = arith.constant 0 : index
    %c0_101 = arith.constant 0 : index
    %132 = vector.load %arg7[%c2_99, %c0_100, %c0_101] : memref<33x14x10xf32, #tpu.memory_space<vmem>>, vector<1x14x10xf32>
    %133 = vector.shape_cast %132 : vector<1x14x10xf32> to vector<14x10xf32>
    %cst_102 = arith.constant dense<0.000000e+00> : vector<2x10xf32>
    %134 = tpu.matmul %131, %133, %cst_102 {dimension_numbers = #tpu.dot_dimension_numbers<[1], [0], [0], [1], [0, 0, 1, 1], [], []>} : vector<2x14xf32>, vector<14x10xf32>, vector<2x10xf32> -> vector<2x10xf32>
    %135 = vector.extract_strided_slice %116 {offsets = [0, 3, 0], sizes = [2, 1, 14], strides = [1, 1, 1]} : vector<2x40x14xf32> to vector<2x1x14xf32>
    %136 = vector.shape_cast %135 : vector<2x1x14xf32> to vector<2x14xf32>
    %c3_103 = arith.constant 3 : index
    %c0_104 = arith.constant 0 : index
    %c0_105 = arith.constant 0 : index
    %137 = vector.load %arg7[%c3_103, %c0_104, %c0_105] : memref<33x14x10xf32, #tpu.memory_space<vmem>>, vector<1x14x10xf32>
    %138 = vector.shape_cast %137 : vector<1x14x10xf32> to vector<14x10xf32>
    %cst_106 = arith.constant dense<0.000000e+00> : vector<2x10xf32>
    %139 = tpu.matmul %136, %138, %cst_106 {dimension_numbers = #tpu.dot_dimension_numbers<[1], [0], [0], [1], [0, 0, 1, 1], [], []>} : vector<2x14xf32>, vector<14x10xf32>, vector<2x10xf32> -> vector<2x10xf32>
    %140 = vector.extract_strided_slice %116 {offsets = [0, 4, 0], sizes = [2, 1, 14], strides = [1, 1, 1]} : vector<2x40x14xf32> to vector<2x1x14xf32>
    %141 = vector.shape_cast %140 : vector<2x1x14xf32> to vector<2x14xf32>
    %c4_107 = arith.constant 4 : index
    %c0_108 = arith.constant 0 : index
    %c0_109 = arith.constant 0 : index
    %142 = vector.load %arg7[%c4_107, %c0_108, %c0_109] : memref<33x14x10xf32, #tpu.memory_space<vmem>>, vector<1x14x10xf32>
    %143 = vector.shape_cast %142 : vector<1x14x10xf32> to vector<14x10xf32>
    %cst_110 = arith.constant dense<0.000000e+00> : vector<2x10xf32>
    %144 = tpu.matmul %141, %143, %cst_110 {dimension_numbers = #tpu.dot_dimension_numbers<[1], [0], [0], [1], [0, 0, 1, 1], [], []>} : vector<2x14xf32>, vector<14x10xf32>, vector<2x10xf32> -> vector<2x10xf32>
    %145 = vector.extract_strided_slice %116 {offsets = [0, 5, 0], sizes = [2, 1, 14], strides = [1, 1, 1]} : vector<2x40x14xf32> to vector<2x1x14xf32>
    %146 = vector.shape_cast %145 : vector<2x1x14xf32> to vector<2x14xf32>
    %c5_111 = arith.constant 5 : index
    %c0_112 = arith.constant 0 : index
    %c0_113 = arith.constant 0 : index
    %147 = vector.load %arg7[%c5_111, %c0_112, %c0_113] : memref<33x14x10xf32, #tpu.memory_space<vmem>>, vector<1x14x10xf32>
    %148 = vector.shape_cast %147 : vector<1x14x10xf32> to vector<14x10xf32>
    %cst_114 = arith.constant dense<0.000000e+00> : vector<2x10xf32>
    %149 = tpu.matmul %146, %148, %cst_114 {dimension_numbers = #tpu.dot_dimension_numbers<[1], [0], [0], [1], [0, 0, 1, 1], [], []>} : vector<2x14xf32>, vector<14x10xf32>, vector<2x10xf32> -> vector<2x10xf32>
    %150 = vector.extract_strided_slice %116 {offsets = [0, 6, 0], sizes = [2, 1, 14], strides = [1, 1, 1]} : vector<2x40x14xf32> to vector<2x1x14xf32>
    %151 = vector.shape_cast %150 : vector<2x1x14xf32> to vector<2x14xf32>
    %c6 = arith.constant 6 : index
    %c0_115 = arith.constant 0 : index
    %c0_116 = arith.constant 0 : index
    %152 = vector.load %arg7[%c6, %c0_115, %c0_116] : memref<33x14x10xf32, #tpu.memory_space<vmem>>, vector<1x14x10xf32>
    %153 = vector.shape_cast %152 : vector<1x14x10xf32> to vector<14x10xf32>
    %cst_117 = arith.constant dense<0.000000e+00> : vector<2x10xf32>
    %154 = tpu.matmul %151, %153, %cst_117 {dimension_numbers = #tpu.dot_dimension_numbers<[1], [0], [0], [1], [0, 0, 1, 1], [], []>} : vector<2x14xf32>, vector<14x10xf32>, vector<2x10xf32> -> vector<2x10xf32>
    %155 = vector.extract_strided_slice %116 {offsets = [0, 7, 0], sizes = [2, 1, 14], strides = [1, 1, 1]} : vector<2x40x14xf32> to vector<2x1x14xf32>
    %156 = vector.shape_cast %155 : vector<2x1x14xf32> to vector<2x14xf32>
    %c7 = arith.constant 7 : index
    %c0_118 = arith.constant 0 : index
    %c0_119 = arith.constant 0 : index
    %157 = vector.load %arg7[%c7, %c0_118, %c0_119] : memref<33x14x10xf32, #tpu.memory_space<vmem>>, vector<1x14x10xf32>
    %158 = vector.shape_cast %157 : vector<1x14x10xf32> to vector<14x10xf32>
    %cst_120 = arith.constant dense<0.000000e+00> : vector<2x10xf32>
    %159 = tpu.matmul %156, %158, %cst_120 {dimension_numbers = #tpu.dot_dimension_numbers<[1], [0], [0], [1], [0, 0, 1, 1], [], []>} : vector<2x14xf32>, vector<14x10xf32>, vector<2x10xf32> -> vector<2x10xf32>
    %160 = vector.extract_strided_slice %116 {offsets = [0, 8, 0], sizes = [2, 1, 14], strides = [1, 1, 1]} : vector<2x40x14xf32> to vector<2x1x14xf32>
    %161 = vector.shape_cast %160 : vector<2x1x14xf32> to vector<2x14xf32>
    %c8 = arith.constant 8 : index
    %c0_121 = arith.constant 0 : index
    %c0_122 = arith.constant 0 : index
    %162 = vector.load %arg7[%c8, %c0_121, %c0_122] : memref<33x14x10xf32, #tpu.memory_space<vmem>>, vector<1x14x10xf32>
    %163 = vector.shape_cast %162 : vector<1x14x10xf32> to vector<14x10xf32>
    %cst_123 = arith.constant dense<0.000000e+00> : vector<2x10xf32>
    %164 = tpu.matmul %161, %163, %cst_123 {dimension_numbers = #tpu.dot_dimension_numbers<[1], [0], [0], [1], [0, 0, 1, 1], [], []>} : vector<2x14xf32>, vector<14x10xf32>, vector<2x10xf32> -> vector<2x10xf32>
    %165 = vector.extract_strided_slice %116 {offsets = [0, 9, 0], sizes = [2, 1, 14], strides = [1, 1, 1]} : vector<2x40x14xf32> to vector<2x1x14xf32>
    %166 = vector.shape_cast %165 : vector<2x1x14xf32> to vector<2x14xf32>
    %c9 = arith.constant 9 : index
    %c0_124 = arith.constant 0 : index
    %c0_125 = arith.constant 0 : index
    %167 = vector.load %arg7[%c9, %c0_124, %c0_125] : memref<33x14x10xf32, #tpu.memory_space<vmem>>, vector<1x14x10xf32>
    %168 = vector.shape_cast %167 : vector<1x14x10xf32> to vector<14x10xf32>
    %cst_126 = arith.constant dense<0.000000e+00> : vector<2x10xf32>
    %169 = tpu.matmul %166, %168, %cst_126 {dimension_numbers = #tpu.dot_dimension_numbers<[1], [0], [0], [1], [0, 0, 1, 1], [], []>} : vector<2x14xf32>, vector<14x10xf32>, vector<2x10xf32> -> vector<2x10xf32>
    %170 = vector.extract_strided_slice %116 {offsets = [0, 10, 0], sizes = [2, 1, 14], strides = [1, 1, 1]} : vector<2x40x14xf32> to vector<2x1x14xf32>
    %171 = vector.shape_cast %170 : vector<2x1x14xf32> to vector<2x14xf32>
    %c10 = arith.constant 10 : index
    %c0_127 = arith.constant 0 : index
    %c0_128 = arith.constant 0 : index
    %172 = vector.load %arg7[%c10, %c0_127, %c0_128] : memref<33x14x10xf32, #tpu.memory_space<vmem>>, vector<1x14x10xf32>
    %173 = vector.shape_cast %172 : vector<1x14x10xf32> to vector<14x10xf32>
    %cst_129 = arith.constant dense<0.000000e+00> : vector<2x10xf32>
    %174 = tpu.matmul %171, %173, %cst_129 {dimension_numbers = #tpu.dot_dimension_numbers<[1], [0], [0], [1], [0, 0, 1, 1], [], []>} : vector<2x14xf32>, vector<14x10xf32>, vector<2x10xf32> -> vector<2x10xf32>
    %175 = vector.extract_strided_slice %116 {offsets = [0, 11, 0], sizes = [2, 1, 14], strides = [1, 1, 1]} : vector<2x40x14xf32> to vector<2x1x14xf32>
    %176 = vector.shape_cast %175 : vector<2x1x14xf32> to vector<2x14xf32>
    %c11 = arith.constant 11 : index
    %c0_130 = arith.constant 0 : index
    %c0_131 = arith.constant 0 : index
    %177 = vector.load %arg7[%c11, %c0_130, %c0_131] : memref<33x14x10xf32, #tpu.memory_space<vmem>>, vector<1x14x10xf32>
    %178 = vector.shape_cast %177 : vector<1x14x10xf32> to vector<14x10xf32>
    %cst_132 = arith.constant dense<0.000000e+00> : vector<2x10xf32>
    %179 = tpu.matmul %176, %178, %cst_132 {dimension_numbers = #tpu.dot_dimension_numbers<[1], [0], [0], [1], [0, 0, 1, 1], [], []>} : vector<2x14xf32>, vector<14x10xf32>, vector<2x10xf32> -> vector<2x10xf32>
    %180 = vector.extract_strided_slice %116 {offsets = [0, 12, 0], sizes = [2, 1, 14], strides = [1, 1, 1]} : vector<2x40x14xf32> to vector<2x1x14xf32>
    %181 = vector.shape_cast %180 : vector<2x1x14xf32> to vector<2x14xf32>
    %c12 = arith.constant 12 : index
    %c0_133 = arith.constant 0 : index
    %c0_134 = arith.constant 0 : index
    %182 = vector.load %arg7[%c12, %c0_133, %c0_134] : memref<33x14x10xf32, #tpu.memory_space<vmem>>, vector<1x14x10xf32>
    %183 = vector.shape_cast %182 : vector<1x14x10xf32> to vector<14x10xf32>
    %cst_135 = arith.constant dense<0.000000e+00> : vector<2x10xf32>
    %184 = tpu.matmul %181, %183, %cst_135 {dimension_numbers = #tpu.dot_dimension_numbers<[1], [0], [0], [1], [0, 0, 1, 1], [], []>} : vector<2x14xf32>, vector<14x10xf32>, vector<2x10xf32> -> vector<2x10xf32>
    %185 = vector.extract_strided_slice %116 {offsets = [0, 13, 0], sizes = [2, 1, 14], strides = [1, 1, 1]} : vector<2x40x14xf32> to vector<2x1x14xf32>
    %186 = vector.shape_cast %185 : vector<2x1x14xf32> to vector<2x14xf32>
    %c13 = arith.constant 13 : index
    %c0_136 = arith.constant 0 : index
    %c0_137 = arith.constant 0 : index
    %187 = vector.load %arg7[%c13, %c0_136, %c0_137] : memref<33x14x10xf32, #tpu.memory_space<vmem>>, vector<1x14x10xf32>
    %188 = vector.shape_cast %187 : vector<1x14x10xf32> to vector<14x10xf32>
    %cst_138 = arith.constant dense<0.000000e+00> : vector<2x10xf32>
    %189 = tpu.matmul %186, %188, %cst_138 {dimension_numbers = #tpu.dot_dimension_numbers<[1], [0], [0], [1], [0, 0, 1, 1], [], []>} : vector<2x14xf32>, vector<14x10xf32>, vector<2x10xf32> -> vector<2x10xf32>
    %190 = vector.extract_strided_slice %116 {offsets = [0, 14, 0], sizes = [2, 1, 14], strides = [1, 1, 1]} : vector<2x40x14xf32> to vector<2x1x14xf32>
    %191 = vector.shape_cast %190 : vector<2x1x14xf32> to vector<2x14xf32>
    %c14 = arith.constant 14 : index
    %c0_139 = arith.constant 0 : index
    %c0_140 = arith.constant 0 : index
    %192 = vector.load %arg7[%c14, %c0_139, %c0_140] : memref<33x14x10xf32, #tpu.memory_space<vmem>>, vector<1x14x10xf32>
    %193 = vector.shape_cast %192 : vector<1x14x10xf32> to vector<14x10xf32>
    %cst_141 = arith.constant dense<0.000000e+00> : vector<2x10xf32>
    %194 = tpu.matmul %191, %193, %cst_141 {dimension_numbers = #tpu.dot_dimension_numbers<[1], [0], [0], [1], [0, 0, 1, 1], [], []>} : vector<2x14xf32>, vector<14x10xf32>, vector<2x10xf32> -> vector<2x10xf32>
    %195 = vector.extract_strided_slice %116 {offsets = [0, 15, 0], sizes = [2, 1, 14], strides = [1, 1, 1]} : vector<2x40x14xf32> to vector<2x1x14xf32>
    %196 = vector.shape_cast %195 : vector<2x1x14xf32> to vector<2x14xf32>
    %c15 = arith.constant 15 : index
    %c0_142 = arith.constant 0 : index
    %c0_143 = arith.constant 0 : index
    %197 = vector.load %arg7[%c15, %c0_142, %c0_143] : memref<33x14x10xf32, #tpu.memory_space<vmem>>, vector<1x14x10xf32>
    %198 = vector.shape_cast %197 : vector<1x14x10xf32> to vector<14x10xf32>
    %cst_144 = arith.constant dense<0.000000e+00> : vector<2x10xf32>
    %199 = tpu.matmul %196, %198, %cst_144 {dimension_numbers = #tpu.dot_dimension_numbers<[1], [0], [0], [1], [0, 0, 1, 1], [], []>} : vector<2x14xf32>, vector<14x10xf32>, vector<2x10xf32> -> vector<2x10xf32>
    %200 = vector.extract_strided_slice %116 {offsets = [0, 16, 0], sizes = [2, 1, 14], strides = [1, 1, 1]} : vector<2x40x14xf32> to vector<2x1x14xf32>
    %201 = vector.shape_cast %200 : vector<2x1x14xf32> to vector<2x14xf32>
    %c16 = arith.constant 16 : index
    %c0_145 = arith.constant 0 : index
    %c0_146 = arith.constant 0 : index
    %202 = vector.load %arg7[%c16, %c0_145, %c0_146] : memref<33x14x10xf32, #tpu.memory_space<vmem>>, vector<1x14x10xf32>
    %203 = vector.shape_cast %202 : vector<1x14x10xf32> to vector<14x10xf32>
    %cst_147 = arith.constant dense<0.000000e+00> : vector<2x10xf32>
    %204 = tpu.matmul %201, %203, %cst_147 {dimension_numbers = #tpu.dot_dimension_numbers<[1], [0], [0], [1], [0, 0, 1, 1], [], []>} : vector<2x14xf32>, vector<14x10xf32>, vector<2x10xf32> -> vector<2x10xf32>
    %205 = vector.extract_strided_slice %116 {offsets = [0, 17, 0], sizes = [2, 1, 14], strides = [1, 1, 1]} : vector<2x40x14xf32> to vector<2x1x14xf32>
    %206 = vector.shape_cast %205 : vector<2x1x14xf32> to vector<2x14xf32>
    %c17 = arith.constant 17 : index
    %c0_148 = arith.constant 0 : index
    %c0_149 = arith.constant 0 : index
    %207 = vector.load %arg7[%c17, %c0_148, %c0_149] : memref<33x14x10xf32, #tpu.memory_space<vmem>>, vector<1x14x10xf32>
    %208 = vector.shape_cast %207 : vector<1x14x10xf32> to vector<14x10xf32>
    %cst_150 = arith.constant dense<0.000000e+00> : vector<2x10xf32>
    %209 = tpu.matmul %206, %208, %cst_150 {dimension_numbers = #tpu.dot_dimension_numbers<[1], [0], [0], [1], [0, 0, 1, 1], [], []>} : vector<2x14xf32>, vector<14x10xf32>, vector<2x10xf32> -> vector<2x10xf32>
    %210 = vector.extract_strided_slice %116 {offsets = [0, 18, 0], sizes = [2, 1, 14], strides = [1, 1, 1]} : vector<2x40x14xf32> to vector<2x1x14xf32>
    %211 = vector.shape_cast %210 : vector<2x1x14xf32> to vector<2x14xf32>
    %c18 = arith.constant 18 : index
    %c0_151 = arith.constant 0 : index
    %c0_152 = arith.constant 0 : index
    %212 = vector.load %arg7[%c18, %c0_151, %c0_152] : memref<33x14x10xf32, #tpu.memory_space<vmem>>, vector<1x14x10xf32>
    %213 = vector.shape_cast %212 : vector<1x14x10xf32> to vector<14x10xf32>
    %cst_153 = arith.constant dense<0.000000e+00> : vector<2x10xf32>
    %214 = tpu.matmul %211, %213, %cst_153 {dimension_numbers = #tpu.dot_dimension_numbers<[1], [0], [0], [1], [0, 0, 1, 1], [], []>} : vector<2x14xf32>, vector<14x10xf32>, vector<2x10xf32> -> vector<2x10xf32>
    %215 = vector.extract_strided_slice %116 {offsets = [0, 19, 0], sizes = [2, 1, 14], strides = [1, 1, 1]} : vector<2x40x14xf32> to vector<2x1x14xf32>
    %216 = vector.shape_cast %215 : vector<2x1x14xf32> to vector<2x14xf32>
    %c19 = arith.constant 19 : index
    %c0_154 = arith.constant 0 : index
    %c0_155 = arith.constant 0 : index
    %217 = vector.load %arg7[%c19, %c0_154, %c0_155] : memref<33x14x10xf32, #tpu.memory_space<vmem>>, vector<1x14x10xf32>
    %218 = vector.shape_cast %217 : vector<1x14x10xf32> to vector<14x10xf32>
    %cst_156 = arith.constant dense<0.000000e+00> : vector<2x10xf32>
    %219 = tpu.matmul %216, %218, %cst_156 {dimension_numbers = #tpu.dot_dimension_numbers<[1], [0], [0], [1], [0, 0, 1, 1], [], []>} : vector<2x14xf32>, vector<14x10xf32>, vector<2x10xf32> -> vector<2x10xf32>
    %220 = vector.extract_strided_slice %116 {offsets = [0, 20, 0], sizes = [2, 1, 14], strides = [1, 1, 1]} : vector<2x40x14xf32> to vector<2x1x14xf32>
    %221 = vector.shape_cast %220 : vector<2x1x14xf32> to vector<2x14xf32>
    %c20 = arith.constant 20 : index
    %c0_157 = arith.constant 0 : index
    %c0_158 = arith.constant 0 : index
    %222 = vector.load %arg7[%c20, %c0_157, %c0_158] : memref<33x14x10xf32, #tpu.memory_space<vmem>>, vector<1x14x10xf32>
    %223 = vector.shape_cast %222 : vector<1x14x10xf32> to vector<14x10xf32>
    %cst_159 = arith.constant dense<0.000000e+00> : vector<2x10xf32>
    %224 = tpu.matmul %221, %223, %cst_159 {dimension_numbers = #tpu.dot_dimension_numbers<[1], [0], [0], [1], [0, 0, 1, 1], [], []>} : vector<2x14xf32>, vector<14x10xf32>, vector<2x10xf32> -> vector<2x10xf32>
    %225 = vector.extract_strided_slice %116 {offsets = [0, 21, 0], sizes = [2, 1, 14], strides = [1, 1, 1]} : vector<2x40x14xf32> to vector<2x1x14xf32>
    %226 = vector.shape_cast %225 : vector<2x1x14xf32> to vector<2x14xf32>
    %c21 = arith.constant 21 : index
    %c0_160 = arith.constant 0 : index
    %c0_161 = arith.constant 0 : index
    %227 = vector.load %arg7[%c21, %c0_160, %c0_161] : memref<33x14x10xf32, #tpu.memory_space<vmem>>, vector<1x14x10xf32>
    %228 = vector.shape_cast %227 : vector<1x14x10xf32> to vector<14x10xf32>
    %cst_162 = arith.constant dense<0.000000e+00> : vector<2x10xf32>
    %229 = tpu.matmul %226, %228, %cst_162 {dimension_numbers = #tpu.dot_dimension_numbers<[1], [0], [0], [1], [0, 0, 1, 1], [], []>} : vector<2x14xf32>, vector<14x10xf32>, vector<2x10xf32> -> vector<2x10xf32>
    %230 = vector.extract_strided_slice %116 {offsets = [0, 22, 0], sizes = [2, 1, 14], strides = [1, 1, 1]} : vector<2x40x14xf32> to vector<2x1x14xf32>
    %231 = vector.shape_cast %230 : vector<2x1x14xf32> to vector<2x14xf32>
    %c22 = arith.constant 22 : index
    %c0_163 = arith.constant 0 : index
    %c0_164 = arith.constant 0 : index
    %232 = vector.load %arg7[%c22, %c0_163, %c0_164] : memref<33x14x10xf32, #tpu.memory_space<vmem>>, vector<1x14x10xf32>
    %233 = vector.shape_cast %232 : vector<1x14x10xf32> to vector<14x10xf32>
    %cst_165 = arith.constant dense<0.000000e+00> : vector<2x10xf32>
    %234 = tpu.matmul %231, %233, %cst_165 {dimension_numbers = #tpu.dot_dimension_numbers<[1], [0], [0], [1], [0, 0, 1, 1], [], []>} : vector<2x14xf32>, vector<14x10xf32>, vector<2x10xf32> -> vector<2x10xf32>
    %235 = vector.extract_strided_slice %116 {offsets = [0, 23, 0], sizes = [2, 1, 14], strides = [1, 1, 1]} : vector<2x40x14xf32> to vector<2x1x14xf32>
    %236 = vector.shape_cast %235 : vector<2x1x14xf32> to vector<2x14xf32>
    %c23 = arith.constant 23 : index
    %c0_166 = arith.constant 0 : index
    %c0_167 = arith.constant 0 : index
    %237 = vector.load %arg7[%c23, %c0_166, %c0_167] : memref<33x14x10xf32, #tpu.memory_space<vmem>>, vector<1x14x10xf32>
    %238 = vector.shape_cast %237 : vector<1x14x10xf32> to vector<14x10xf32>
    %cst_168 = arith.constant dense<0.000000e+00> : vector<2x10xf32>
    %239 = tpu.matmul %236, %238, %cst_168 {dimension_numbers = #tpu.dot_dimension_numbers<[1], [0], [0], [1], [0, 0, 1, 1], [], []>} : vector<2x14xf32>, vector<14x10xf32>, vector<2x10xf32> -> vector<2x10xf32>
    %240 = vector.extract_strided_slice %116 {offsets = [0, 24, 0], sizes = [2, 1, 14], strides = [1, 1, 1]} : vector<2x40x14xf32> to vector<2x1x14xf32>
    %241 = vector.shape_cast %240 : vector<2x1x14xf32> to vector<2x14xf32>
    %c24 = arith.constant 24 : index
    %c0_169 = arith.constant 0 : index
    %c0_170 = arith.constant 0 : index
    %242 = vector.load %arg7[%c24, %c0_169, %c0_170] : memref<33x14x10xf32, #tpu.memory_space<vmem>>, vector<1x14x10xf32>
    %243 = vector.shape_cast %242 : vector<1x14x10xf32> to vector<14x10xf32>
    %cst_171 = arith.constant dense<0.000000e+00> : vector<2x10xf32>
    %244 = tpu.matmul %241, %243, %cst_171 {dimension_numbers = #tpu.dot_dimension_numbers<[1], [0], [0], [1], [0, 0, 1, 1], [], []>} : vector<2x14xf32>, vector<14x10xf32>, vector<2x10xf32> -> vector<2x10xf32>
    %245 = vector.extract_strided_slice %116 {offsets = [0, 25, 0], sizes = [2, 1, 14], strides = [1, 1, 1]} : vector<2x40x14xf32> to vector<2x1x14xf32>
    %246 = vector.shape_cast %245 : vector<2x1x14xf32> to vector<2x14xf32>
    %c25 = arith.constant 25 : index
    %c0_172 = arith.constant 0 : index
    %c0_173 = arith.constant 0 : index
    %247 = vector.load %arg7[%c25, %c0_172, %c0_173] : memref<33x14x10xf32, #tpu.memory_space<vmem>>, vector<1x14x10xf32>
    %248 = vector.shape_cast %247 : vector<1x14x10xf32> to vector<14x10xf32>
    %cst_174 = arith.constant dense<0.000000e+00> : vector<2x10xf32>
    %249 = tpu.matmul %246, %248, %cst_174 {dimension_numbers = #tpu.dot_dimension_numbers<[1], [0], [0], [1], [0, 0, 1, 1], [], []>} : vector<2x14xf32>, vector<14x10xf32>, vector<2x10xf32> -> vector<2x10xf32>
    %250 = vector.extract_strided_slice %116 {offsets = [0, 26, 0], sizes = [2, 1, 14], strides = [1, 1, 1]} : vector<2x40x14xf32> to vector<2x1x14xf32>
    %251 = vector.shape_cast %250 : vector<2x1x14xf32> to vector<2x14xf32>
    %c26 = arith.constant 26 : index
    %c0_175 = arith.constant 0 : index
    %c0_176 = arith.constant 0 : index
    %252 = vector.load %arg7[%c26, %c0_175, %c0_176] : memref<33x14x10xf32, #tpu.memory_space<vmem>>, vector<1x14x10xf32>
    %253 = vector.shape_cast %252 : vector<1x14x10xf32> to vector<14x10xf32>
    %cst_177 = arith.constant dense<0.000000e+00> : vector<2x10xf32>
    %254 = tpu.matmul %251, %253, %cst_177 {dimension_numbers = #tpu.dot_dimension_numbers<[1], [0], [0], [1], [0, 0, 1, 1], [], []>} : vector<2x14xf32>, vector<14x10xf32>, vector<2x10xf32> -> vector<2x10xf32>
    %255 = vector.extract_strided_slice %116 {offsets = [0, 27, 0], sizes = [2, 1, 14], strides = [1, 1, 1]} : vector<2x40x14xf32> to vector<2x1x14xf32>
    %256 = vector.shape_cast %255 : vector<2x1x14xf32> to vector<2x14xf32>
    %c27 = arith.constant 27 : index
    %c0_178 = arith.constant 0 : index
    %c0_179 = arith.constant 0 : index
    %257 = vector.load %arg7[%c27, %c0_178, %c0_179] : memref<33x14x10xf32, #tpu.memory_space<vmem>>, vector<1x14x10xf32>
    %258 = vector.shape_cast %257 : vector<1x14x10xf32> to vector<14x10xf32>
    %cst_180 = arith.constant dense<0.000000e+00> : vector<2x10xf32>
    %259 = tpu.matmul %256, %258, %cst_180 {dimension_numbers = #tpu.dot_dimension_numbers<[1], [0], [0], [1], [0, 0, 1, 1], [], []>} : vector<2x14xf32>, vector<14x10xf32>, vector<2x10xf32> -> vector<2x10xf32>
    %260 = vector.extract_strided_slice %116 {offsets = [0, 28, 0], sizes = [2, 1, 14], strides = [1, 1, 1]} : vector<2x40x14xf32> to vector<2x1x14xf32>
    %261 = vector.shape_cast %260 : vector<2x1x14xf32> to vector<2x14xf32>
    %c28 = arith.constant 28 : index
    %c0_181 = arith.constant 0 : index
    %c0_182 = arith.constant 0 : index
    %262 = vector.load %arg7[%c28, %c0_181, %c0_182] : memref<33x14x10xf32, #tpu.memory_space<vmem>>, vector<1x14x10xf32>
    %263 = vector.shape_cast %262 : vector<1x14x10xf32> to vector<14x10xf32>
    %cst_183 = arith.constant dense<0.000000e+00> : vector<2x10xf32>
    %264 = tpu.matmul %261, %263, %cst_183 {dimension_numbers = #tpu.dot_dimension_numbers<[1], [0], [0], [1], [0, 0, 1, 1], [], []>} : vector<2x14xf32>, vector<14x10xf32>, vector<2x10xf32> -> vector<2x10xf32>
    %265 = vector.extract_strided_slice %116 {offsets = [0, 29, 0], sizes = [2, 1, 14], strides = [1, 1, 1]} : vector<2x40x14xf32> to vector<2x1x14xf32>
    %266 = vector.shape_cast %265 : vector<2x1x14xf32> to vector<2x14xf32>
    %c29 = arith.constant 29 : index
    %c0_184 = arith.constant 0 : index
    %c0_185 = arith.constant 0 : index
    %267 = vector.load %arg7[%c29, %c0_184, %c0_185] : memref<33x14x10xf32, #tpu.memory_space<vmem>>, vector<1x14x10xf32>
    %268 = vector.shape_cast %267 : vector<1x14x10xf32> to vector<14x10xf32>
    %cst_186 = arith.constant dense<0.000000e+00> : vector<2x10xf32>
    %269 = tpu.matmul %266, %268, %cst_186 {dimension_numbers = #tpu.dot_dimension_numbers<[1], [0], [0], [1], [0, 0, 1, 1], [], []>} : vector<2x14xf32>, vector<14x10xf32>, vector<2x10xf32> -> vector<2x10xf32>
    %270 = vector.extract_strided_slice %116 {offsets = [0, 30, 0], sizes = [2, 1, 14], strides = [1, 1, 1]} : vector<2x40x14xf32> to vector<2x1x14xf32>
    %271 = vector.shape_cast %270 : vector<2x1x14xf32> to vector<2x14xf32>
    %c30 = arith.constant 30 : index
    %c0_187 = arith.constant 0 : index
    %c0_188 = arith.constant 0 : index
    %272 = vector.load %arg7[%c30, %c0_187, %c0_188] : memref<33x14x10xf32, #tpu.memory_space<vmem>>, vector<1x14x10xf32>
    %273 = vector.shape_cast %272 : vector<1x14x10xf32> to vector<14x10xf32>
    %cst_189 = arith.constant dense<0.000000e+00> : vector<2x10xf32>
    %274 = tpu.matmul %271, %273, %cst_189 {dimension_numbers = #tpu.dot_dimension_numbers<[1], [0], [0], [1], [0, 0, 1, 1], [], []>} : vector<2x14xf32>, vector<14x10xf32>, vector<2x10xf32> -> vector<2x10xf32>
    %275 = vector.extract_strided_slice %116 {offsets = [0, 31, 0], sizes = [2, 1, 14], strides = [1, 1, 1]} : vector<2x40x14xf32> to vector<2x1x14xf32>
    %276 = vector.shape_cast %275 : vector<2x1x14xf32> to vector<2x14xf32>
    %c31 = arith.constant 31 : index
    %c0_190 = arith.constant 0 : index
    %c0_191 = arith.constant 0 : index
    %277 = vector.load %arg7[%c31, %c0_190, %c0_191] : memref<33x14x10xf32, #tpu.memory_space<vmem>>, vector<1x14x10xf32>
    %278 = vector.shape_cast %277 : vector<1x14x10xf32> to vector<14x10xf32>
    %cst_192 = arith.constant dense<0.000000e+00> : vector<2x10xf32>
    %279 = tpu.matmul %276, %278, %cst_192 {dimension_numbers = #tpu.dot_dimension_numbers<[1], [0], [0], [1], [0, 0, 1, 1], [], []>} : vector<2x14xf32>, vector<14x10xf32>, vector<2x10xf32> -> vector<2x10xf32>
    %280 = vector.extract_strided_slice %116 {offsets = [0, 32, 0], sizes = [2, 1, 14], strides = [1, 1, 1]} : vector<2x40x14xf32> to vector<2x1x14xf32>
    %281 = vector.shape_cast %280 : vector<2x1x14xf32> to vector<2x14xf32>
    %c32 = arith.constant 32 : index
    %c0_193 = arith.constant 0 : index
    %c0_194 = arith.constant 0 : index
    %282 = vector.load %arg7[%c32, %c0_193, %c0_194] : memref<33x14x10xf32, #tpu.memory_space<vmem>>, vector<1x14x10xf32>
    %283 = vector.shape_cast %282 : vector<1x14x10xf32> to vector<14x10xf32>
    %cst_195 = arith.constant dense<0.000000e+00> : vector<2x10xf32>
    %284 = tpu.matmul %281, %283, %cst_195 {dimension_numbers = #tpu.dot_dimension_numbers<[1], [0], [0], [1], [0, 0, 1, 1], [], []>} : vector<2x14xf32>, vector<14x10xf32>, vector<2x10xf32> -> vector<2x10xf32>
    %285 = arith.addf %124, %129 : vector<2x10xf32>
    %286 = arith.addf %134, %139 : vector<2x10xf32>
    %287 = arith.addf %144, %149 : vector<2x10xf32>
    %288 = arith.addf %154, %159 : vector<2x10xf32>
    %289 = arith.addf %164, %169 : vector<2x10xf32>
    %290 = arith.addf %174, %179 : vector<2x10xf32>
    %291 = arith.addf %184, %189 : vector<2x10xf32>
    %292 = arith.addf %194, %199 : vector<2x10xf32>
    %293 = arith.addf %204, %209 : vector<2x10xf32>
    %294 = arith.addf %214, %219 : vector<2x10xf32>
    %295 = arith.addf %224, %229 : vector<2x10xf32>
    %296 = arith.addf %234, %239 : vector<2x10xf32>
    %297 = arith.addf %244, %249 : vector<2x10xf32>
    %298 = arith.addf %254, %259 : vector<2x10xf32>
    %299 = arith.addf %264, %269 : vector<2x10xf32>
    %300 = arith.addf %274, %279 : vector<2x10xf32>
    %301 = arith.addf %285, %286 : vector<2x10xf32>
    %302 = arith.addf %287, %288 : vector<2x10xf32>
    %303 = arith.addf %289, %290 : vector<2x10xf32>
    %304 = arith.addf %291, %292 : vector<2x10xf32>
    %305 = arith.addf %293, %294 : vector<2x10xf32>
    %306 = arith.addf %295, %296 : vector<2x10xf32>
    %307 = arith.addf %297, %298 : vector<2x10xf32>
    %308 = arith.addf %299, %300 : vector<2x10xf32>
    %309 = arith.addf %301, %302 : vector<2x10xf32>
    %310 = arith.addf %303, %304 : vector<2x10xf32>
    %311 = arith.addf %305, %306 : vector<2x10xf32>
    %312 = arith.addf %307, %308 : vector<2x10xf32>
    %313 = arith.addf %309, %310 : vector<2x10xf32>
    %314 = arith.addf %311, %312 : vector<2x10xf32>
    %315 = arith.addf %313, %314 : vector<2x10xf32>
    %316 = arith.addf %315, %284 : vector<2x10xf32>
    %317 = arith.addf %316, %119 : vector<2x10xf32>
    %c0_196 = arith.constant 0 : index
    %c0_197 = arith.constant 0 : index
    %318 = vector.load %arg9[%c0_196, %c0_197] : memref<2x10xf32, #tpu.memory_space<vmem>>, vector<2x10xf32>
    tpu.vector_store %arg9[%c0_196, %c0_197], %317 {strides = array<i32>} : memref<2x10xf32, #tpu.memory_space<vmem>>, vector<2x10xf32>,
    return
  }
}

</mosaic_0001>

<bundles_post_ra>
// kernel: tpu_custom_call.1
= control target key start
LH: loop header
LB: loop body
LE: loop exit
PB: predicated region body
PF: predicated region fallthrough
CT: control target
= control target key end

     0   :  { %vm124_vm0 = vcmask 195584   ;;  %s8040_s0 = inlined_call_operand.vmem [shape: f32[328,24], index: 0, kind: input, shape index: {}]   ;;  %s8041_s1 = inlined_call_operand.vmem [shape: f32[5,24,56], index: 1, kind: input, shape index: {}]   ;;  %s8042_s2 = inlined_call_operand.vmem [shape: f32[1,56], index: 2, kind: input, shape index: {}]   ;;  %s8043_s3 = inlined_call_operand.vmem [shape: f32[6,56,28], index: 3, kind: input, shape index: {}]   ;;  %s8044_s4 = inlined_call_operand.vmem [shape: f32[1,28], index: 4, kind: input, shape index: {}]   ;;  %s8045_s5 = inlined_call_operand.vmem [shape: f32[2,28,14], index: 5, kind: input, shape index: {}]   ;;  %s8046_s6 = inlined_call_operand.vmem [shape: f32[1,14], index: 6, kind: input, shape index: {}]   ;;  %s8047_s7 = inlined_call_operand.vmem [shape: f32[33,14,10], index: 7, kind: input, shape index: {}]   ;;  %s8048_s8 = inlined_call_operand.vmem [shape: f32[1,10], index: 8, kind: input, shape index: {}]   ;;  %s8049_s9 = inlined_call_operand.hbm [shape: f32[2,10], index: 9, kind: output, shape index: {}]  }
   0x1   :  { %v4959_v0 = vld [vmem:[%s8041_s1 + $0x28] sm:$0xff]  ;;  %v79_v1 = vld [vmem:[%s8041_s1 + $0x10] sm:$0xff]  ;;  %v4958_v2 = vld [vmem:[%s8041_s1 + $0x20] sm:$0xff] }
   0x2   :  { %258 = vmatpush.msra.mxu0 %v4959_v0  ;;  %1161 = vmatpush.msra.mxu3 %v79_v1  ;;  %v78_v3 = vld [vmem:[%s8041_s1 + $0x8] sm:$0xff]  ;;  %v4957_v4 = vld [vmem:[%s8041_s1 + $0x18] sm:$0xff]  ;;  %v77_v5 = vld [vmem:[%s8041_s1] sm:$0xff] }
   0x3   :  { %v80_v6 = vld [vmem:[%s8040_s0 + $0x1] sm:$0xff] }
   0x4   :  { %259 = vmatpush.msra.mxu0 %v4958_v2  ;;  %1162 = vmatpush.msra.mxu3 %v78_v3  ;;  %v37_v7 = vld [vmem:[%s8040_s0] sm:$0xff] }
   0x5   :  { %v5002_v8 = vld [vmem:[%s8041_s1 + $0x40] sm:$0xff] }
   0x6   :  { %260 = vmatpush.msra.mxu0 %v4957_v4  ;;  %1163 = vmatpush.msra.mxu3 %v77_v5 }
   0x7   :  { %4960 = vmatmul.msk.f32.vlgmr.msra.gmra.mxu0 %vm124_vm0, %v80_v6  ;;  %5089 = vmatmul.msk.f32.vlgmr.msra.gmra.mxu3 %vm124_vm0, %v37_v7 }
   0x8   :  { %1418 = vmatpush.msrb.mxu0 %v5002_v8 }
   0x9   :  { %14 = vsyncpa [#allocation5], 0  ;;  %v81_v9 = vld [vmem:[%s8040_s0 + $0x9] sm:$0xff]  ;;  %v82_v11 = vld [vmem:[%s8040_s0 + $0x11] sm:$0xff]  ;;  %vm33_vm2 = vcmask 457728   ;;  %vm35_vm3 = vcmask 228352  }
   0xa   :  { %v38_v10 = vld [vmem:[%s8040_s0 + $0x8] sm:$0xff]  ;;  %v39_v12 = vld [vmem:[%s8040_s0 + $0x10] sm:$0xff]  ;;  %v83_v13 = vld [vmem:[%s8040_s0 + $0x19] sm:$0xff]  ;;  %vm3557_vm6 = vcmask 1043456   ;;  %vm3909_vm10 = vcmask 1045504   ;;  %s5632_s16 = smov [#allocation4]  }
   0xb   :  { %v40_v14 = vld [vmem:[%s8040_s0 + $0x18] sm:$0xff]  ;;  %v84_v15 = vld [vmem:[%s8040_s0 + $0x21] sm:$0xff]  ;;  %v85_v17 = vld [vmem:[%s8040_s0 + $0x29] sm:$0xff]  ;;  %s4946_s17 = sshll.u32 %s5632_s16, 4  ;;  %s4947_s17 = int_to_ptr.vmem [resolvable:$true] %s4946_s17 }
   0xc   :  { %v41_v16 = vld [vmem:[%s8040_s0 + $0x20] sm:$0xff]  ;;  %v42_v18 = vld [vmem:[%s8040_s0 + $0x28] sm:$0xff]  ;;  %v86_v19 = vld [vmem:[%s8040_s0 + $0x31] sm:$0xff] }
   0xd   :  { %v43_v20 = vld [vmem:[%s8040_s0 + $0x30] sm:$0xff]  ;;  %v87_v21 = vld [vmem:[%s8040_s0 + $0x39] sm:$0xff]  ;;  %v88_v23 = vld [vmem:[%s8040_s0 + $0x41] sm:$0xff] }
   0xe   :  { %v44_v22 = vld [vmem:[%s8040_s0 + $0x38] sm:$0xff]  ;;  %v45_v24 = vld [vmem:[%s8040_s0 + $0x40] sm:$0xff]  ;;  %v89_v25 = vld [vmem:[%s8040_s0 + $0x49] sm:$0xff] }
   0xf   :  { %4961 = vmatmul.msk.f32.gmra.mxu0 %vm124_vm0, %v81_v9  ;;  %5090 = vmatmul.msk.f32.gmra.mxu3 %vm124_vm0, %v38_v10  ;;  %v46_v26 = vld [vmem:[%s8040_s0 + $0x48] sm:$0xff]  ;;  %v5001_v27 = vld [vmem:[%s8041_s1 + $0x38] sm:$0xff]  ;;  %v47_v29 = vld [vmem:[%s8040_s0 + $0x50] sm:$0xff] }
  0x10   :  { %1419 = vmatpush.msrb.mxu0 %v5001_v27  ;;  %v90_v28 = vld [vmem:[%s8040_s0 + $0x51] sm:$0xff]  ;;  %v91_v30 = vld [vmem:[%s8040_s0 + $0x59] sm:$0xff]  ;;  %v92_v32 = vld [vmem:[%s8040_s0 + $0x61] sm:$0xff] }
  0x11   :  { %v48_v31 = vld [vmem:[%s8040_s0 + $0x58] sm:$0xff]  ;;  %v49_v33 = vld [vmem:[%s8040_s0 + $0x60] sm:$0xff]  ;;  %v93_v34 = vld [vmem:[%s8040_s0 + $0x69] sm:$0xff] }
  0x12   :  { %v50_v35 = vld [vmem:[%s8040_s0 + $0x68] sm:$0xff]  ;;  %v94_v36 = vld [vmem:[%s8040_s0 + $0x71] sm:$0xff]  ;;  %v95_v38 = vld [vmem:[%s8040_s0 + $0x79] sm:$0xff] }
  0x13   :  { %v51_v37 = vld [vmem:[%s8040_s0 + $0x70] sm:$0xff]  ;;  %v52_v39 = vld [vmem:[%s8040_s0 + $0x78] sm:$0xff]  ;;  %v5003_v42 = vld [vmem:[%s8041_s1 + $0x48] sm:$0xff] }
  0x14   :  { %v5005_v40 = vld [vmem:[%s8041_s1 + $0x58] sm:$0xff]  ;;  %v5004_v41 = vld [vmem:[%s8041_s1 + $0x50] sm:$0xff]  ;;  %v426_v43 = vld [vmem:[%s8040_s0 + $0x3] sm:$0xff] }
  0x15   :  { %603 = vmatpush.msra.mxu1 %v5005_v40  ;;  %v96_v45 = vld [vmem:[%s8040_s0 + $0x81] sm:$0xff]  ;;  %v5048_v47 = vld [vmem:[%s8041_s1 + $0x70] sm:$0xff]  ;;  %v99_v5 = vld [vmem:[%s8040_s0 + $0x99] sm:$0xff] }
  0x16   :  { %v53_v46 = vld [vmem:[%s8040_s0 + $0x80] sm:$0xff]  ;;  %v5047_v48 = vld [vmem:[%s8041_s1 + $0x68] sm:$0xff]  ;;  %904 = vmatpush.msra.mxu2 %v5048_v47  ;;  %v428_v59 = vld [vmem:[%s8040_s0 + $0x13] sm:$0xff] }
  0x17   :  { %4962 = vmatmul.msk.f32.gmra.mxu0 %vm124_vm0, %v82_v11  ;;  %5091 = vmatmul.msk.f32.gmra.mxu3 %vm124_vm0, %v39_v12  ;;  %v5046_v50 = vld [vmem:[%s8041_s1 + $0x60] sm:$0xff]  ;;  %v427_v52 = vld [vmem:[%s8040_s0 + $0xb] sm:$0xff]  ;;  %v729_v3 = vld [vmem:[%s8040_s0 + $0x14] sm:$0xff] }
  0x18   :  { %604 = vmatpush.msra.mxu1 %v5004_v41  ;;  %905 = vmatpush.msra.mxu2 %v5047_v48  ;;  %v727_v53 = vld [vmem:[%s8040_s0 + $0x4] sm:$0xff]  ;;  %v728_v60 = vld [vmem:[%s8040_s0 + $0xc] sm:$0xff]  ;;  %v429_v2 = vld [vmem:[%s8040_s0 + $0x1b] sm:$0xff] }
  0x19   :  { %v97_v55 = vld [vmem:[%s8040_s0 + $0x89] sm:$0xff]  ;;  %v98_v62 = vld [vmem:[%s8040_s0 + $0x91] sm:$0xff]  ;;  %v730_v10 = vld [vmem:[%s8040_s0 + $0x1c] sm:$0xff] }
  0x1a   :  { %605 = vmatpush.msra.mxu1 %v5003_v42  ;;  %v54_v56 = vld [vmem:[%s8040_s0 + $0x88] sm:$0xff]  ;;  %906 = vmatpush.msra.mxu2 %v5046_v50  ;;  %v55_v63 = vld [vmem:[%s8040_s0 + $0x90] sm:$0xff]  ;;  %v56_v6 = vld [vmem:[%s8040_s0 + $0x98] sm:$0xff] }
  0x1b   :  { %5006 = vmatmul.msk.f32.vlgmr.msra.gmra.mxu1 %vm124_vm0, %v426_v43  ;;  %5049 = vmatmul.msk.f32.vlgmr.msra.gmra.mxu2 %vm124_vm0, %v727_v53  ;;  %v430_v9 = vld [vmem:[%s8040_s0 + $0x23] sm:$0xff]  ;;  %v59_v27 = vld [vmem:[%s8040_s0 + $0xb0] sm:$0xff] }
  0x1c   :  { %v100_v12 = vld [vmem:[%s8040_s0 + $0xa1] sm:$0xff]  ;;  %v105_v48 = vld [vmem:[%s8040_s0 + $0xc9] sm:$0xff]  ;;  %v436_v53 = vld [vmem:[%s8040_s0 + $0x53] sm:$0xff] }
  0x1d   :  { %v104_v41 = vld [vmem:[%s8040_s0 + $0xc1] sm:$0xff] }
  0x1e   :  { %v61_v42 = vld [vmem:[%s8040_s0 + $0xc0] sm:$0xff] }
  0x1f   :  { %4963 = vmatmul.msk.f32.gmra.mxu0 %vm124_vm0, %v83_v13  ;;  %5092 = vmatmul.msk.f32.gmra.mxu3 %vm124_vm0, %v40_v14  ;;  %v57_v13 = vld [vmem:[%s8040_s0 + $0xa0] sm:$0xff] }
  0x23   :  { %5007 = vmatmul.msk.f32.gmra.mxu1 %vm124_vm0, %v427_v52  ;;  %5050 = vmatmul.msk.f32.gmra.mxu2 %vm124_vm0, %v728_v60 }
  0x27   :  { %4964 = vmatmul.msk.f32.gmra.mxu0 %vm124_vm0, %v84_v15  ;;  %5093 = vmatmul.msk.f32.gmra.mxu3 %vm124_vm0, %v41_v16  ;;  %v431_v16 = vld [vmem:[%s8040_s0 + $0x2b] sm:$0xff] }
  0x2b   :  { %5008 = vmatmul.msk.f32.gmra.mxu1 %vm124_vm0, %v428_v59  ;;  %5051 = vmatmul.msk.f32.gmra.mxu2 %vm124_vm0, %v729_v3 }
  0x2f   :  { %4965 = vmatmul.msk.f32.gmra.mxu0 %vm124_vm0, %v85_v17  ;;  %5094 = vmatmul.msk.f32.gmra.mxu3 %vm124_vm0, %v42_v18  ;;  %v731_v17 = vld [vmem:[%s8040_s0 + $0x24] sm:$0xff] }
  0x33   :  { %5009 = vmatmul.msk.f32.gmra.mxu1 %vm124_vm0, %v429_v2  ;;  %5052 = vmatmul.msk.f32.gmra.mxu2 %vm124_vm0, %v730_v10  ;;  %v64_v2 = vld [vmem:[%s8040_s0 + $0xd8] sm:$0xff]  ;;  %v65_v10 = vld [vmem:[%s8040_s0 + $0xe0] sm:$0xff] }
  0x37   :  { %4966 = vmatmul.msk.f32.gmra.mxu0 %vm124_vm0, %v86_v19  ;;  %5095 = vmatmul.msk.f32.gmra.mxu3 %vm124_vm0, %v43_v20  ;;  %v101_v19 = vld [vmem:[%s8040_s0 + $0xa9] sm:$0xff] }
  0x38   :  { %v58_v20 = vld [vmem:[%s8040_s0 + $0xa8] sm:$0xff] }
  0x3b   :  { %5010 = vmatmul.msk.f32.gmra.mxu1 %vm124_vm0, %v430_v9  ;;  %5053 = vmatmul.msk.f32.gmra.mxu2 %vm124_vm0, %v731_v17  ;;  %v108_v9 = vld [vmem:[%s8040_s0 + $0xe1] sm:$0xff]  ;;  %v109_v17 = vld [vmem:[%s8040_s0 + $0xe9] sm:$0xff] }
  0x3f   :  { %4967 = vmatmul.msk.f32.gmra.mxu0 %vm124_vm0, %v87_v21  ;;  %5096 = vmatmul.msk.f32.gmra.mxu3 %vm124_vm0, %v44_v22 }
  0x43   :  { %5011 = vmatmul.msk.f32.gmra.mxu1 %vm124_vm0, %v431_v16 }
  0x47   :  { %4968 = vmatmul.msk.f32.gmra.mxu0 %vm124_vm0, %v88_v23  ;;  %5097 = vmatmul.msk.f32.gmra.mxu3 %vm124_vm0, %v45_v24  ;;  %v432_v23 = vld [vmem:[%s8040_s0 + $0x33] sm:$0xff] }
  0x48   :  { %v732_v24 = vld [vmem:[%s8040_s0 + $0x2c] sm:$0xff] }
  0x49   :  { %5054 = vmatmul.msk.f32.gmra.mxu2 %vm124_vm0, %v732_v24  ;;  %v110_v24 = vld [vmem:[%s8040_s0 + $0xf1] sm:$0xff] }
  0x4b   :  { %5012 = vmatmul.msk.f32.gmra.mxu1 %vm124_vm0, %v432_v23 }
  0x4f   :  { %4969 = vmatmul.msk.f32.gmra.mxu0 %vm124_vm0, %v89_v25  ;;  %5098 = vmatmul.msk.f32.gmra.mxu3 %vm124_vm0, %v46_v26  ;;  %v102_v26 = vld [vmem:[%s8040_s0 + $0xb1] sm:$0xff] }
  0x57   :  { %4970 = vmatmul.msk.f32.gmra.mxu0 %vm124_vm0, %v90_v28  ;;  %5099 = vmatmul.msk.f32.gmra.mxu3 %vm124_vm0, %v47_v29 }
  0x5f   :  { %4971 = vmatmul.msk.f32.gmra.mxu0 %vm124_vm0, %v91_v30  ;;  %5100 = vmatmul.msk.f32.gmra.mxu3 %vm124_vm0, %v48_v31  ;;  %v433_v30 = vld [vmem:[%s8040_s0 + $0x3b] sm:$0xff] }
  0x60   :  { %v733_v31 = vld [vmem:[%s8040_s0 + $0x34] sm:$0xff]  ;;  %5013 = vmatmul.msk.f32.gmra.mxu1 %vm124_vm0, %v433_v30 }
  0x61   :  { %5055 = vmatmul.msk.f32.gmra.mxu2 %vm124_vm0, %v733_v31  ;;  %v111_v31 = vld [vmem:[%s8040_s0 + $0xf9] sm:$0xff] }
  0x67   :  { %4972 = vmatmul.msk.f32.gmra.mxu0 %vm124_vm0, %v92_v32  ;;  %5101 = vmatmul.msk.f32.gmra.mxu3 %vm124_vm0, %v49_v33  ;;  %v103_v33 = vld [vmem:[%s8040_s0 + $0xb9] sm:$0xff] }
  0x6f   :  { %4973 = vmatmul.msk.f32.gmra.mxu0 %vm124_vm0, %v93_v34  ;;  %5102 = vmatmul.msk.f32.gmra.mxu3 %vm124_vm0, %v50_v35  ;;  %v60_v34 = vld [vmem:[%s8040_s0 + $0xb8] sm:$0xff]  ;;  %v5000_v35 = vld [vmem:[%s8041_s1 + $0x30] sm:$0xff] }
  0x70   :  { %1420 = vmatpush.msrb.mxu0 %v5000_v35  ;;  %v442_v35 = vld [vmem:[%s8040_s0 + $0x83] sm:$0xff] }
  0x77   :  { %4974 = vmatmul.msk.f32.gmra.mxu0 %vm124_vm0, %v94_v36  ;;  %5103 = vmatmul.msk.f32.gmra.mxu3 %vm124_vm0, %v51_v37 }
  0x7f   :  { %4975 = vmatmul.msk.f32.gmra.mxu0 %vm124_vm0, %v95_v38  ;;  %5104 = vmatmul.msk.f32.gmra.mxu3 %vm124_vm0, %v52_v39  ;;  %v434_v38 = vld [vmem:[%s8040_s0 + $0x43] sm:$0xff] }
  0x80   :  { %v734_v39 = vld [vmem:[%s8040_s0 + $0x3c] sm:$0xff]  ;;  %5014 = vmatmul.msk.f32.gmra.mxu1 %vm124_vm0, %v434_v38 }
  0x81   :  { %5056 = vmatmul.msk.f32.gmra.mxu2 %vm124_vm0, %v734_v39  ;;  %v112_v39 = vld [vmem:[%s8040_s0 + $0x101] sm:$0xff] }
  0x84   :  { %v262_v44 = vpop.f32.mrf.mxu0 }
  0x87   :  { %4976 = vmatmul.msk.f32.gmra.mxu0 %vm124_vm0, %v96_v45  ;;  %5105 = vmatmul.msk.f32.gmra.mxu3 %vm124_vm0, %v53_v46  ;;  %v435_v45 = vld [vmem:[%s8040_s0 + $0x4b] sm:$0xff] }
  0x88   :  { %v735_v46 = vld [vmem:[%s8040_s0 + $0x44] sm:$0xff]  ;;  %5015 = vmatmul.msk.f32.gmra.mxu1 %vm124_vm0, %v435_v45 }
  0x89   :  { %5057 = vmatmul.msk.f32.gmra.mxu2 %vm124_vm0, %v735_v46  ;;  %v743_v45 = vld [vmem:[%s8040_s0 + $0x84] sm:$0xff] }
  0x8a   :  { %v1165_v49 = vpop.f32.mrf.mxu3 }
  0x8b   :  { %v5865_v51 = vadd.f32 %v1165_v49, %v262_v44  ;;  %v62_v49 = vld [vmem:[%s8040_s0 + $0xc8] sm:$0xff] }
  0x8c   :  { %v265_v54 = vpop.f32.mrf.mxu0 }
  0x8f   :  { %4977 = vmatmul.msk.f32.gmra.mxu0 %vm124_vm0, %v97_v55  ;;  %5106 = vmatmul.msk.f32.gmra.mxu3 %vm124_vm0, %v54_v56  ;;  %v106_v56 = vld [vmem:[%s8040_s0 + $0xd1] sm:$0xff] }
  0x90   :  { %5016 = vmatmul.msk.f32.gmra.mxu1 %vm124_vm0, %v436_v53 }
  0x92   :  { %v1168_v57 = vpop.f32.mrf.mxu3 }
  0x93   :  { %v5883_v58 = vadd.f32 %v1168_v57, %v265_v54  ;;  %v736_v54 = vld [vmem:[%s8040_s0 + $0x4c] sm:$0xff] }
  0x94   :  { %v268_v61 = vpop.f32.mrf.mxu0  ;;  %v63_v57 = vld [vmem:[%s8040_s0 + $0xd0] sm:$0xff]  ;;  %5058 = vmatmul.msk.f32.gmra.mxu2 %vm124_vm0, %v736_v54 }
  0x95   :  { %v444_v54 = vld [vmem:[%s8040_s0 + $0x93] sm:$0xff] }
  0x97   :  { %4978 = vmatmul.msk.f32.gmra.mxu0 %vm124_vm0, %v98_v62  ;;  %5107 = vmatmul.msk.f32.gmra.mxu3 %vm124_vm0, %v55_v63  ;;  %v737_v62 = vld [vmem:[%s8040_s0 + $0x54] sm:$0xff] }
  0x9a   :  { %v1171_v0 = vpop.f32.mrf.mxu3 }
  0x9b   :  { %v5901_v1 = vadd.f32 %v1171_v0, %v268_v61  ;;  %v437_v61 = vld [vmem:[%s8040_s0 + $0x5b] sm:$0xff] }
  0x9c   :  { %v271_v4 = vpop.f32.mrf.mxu0  ;;  %v107_v0 = vld [vmem:[%s8040_s0 + $0xd9] sm:$0xff]  ;;  %5017 = vmatmul.msk.f32.gmra.mxu1 %vm124_vm0, %v437_v61  ;;  %5059 = vmatmul.msk.f32.gmra.mxu2 %vm124_vm0, %v737_v62  ;;  %v5243_v62 = vld [vmem:[%s8043_s3 + $0x148] sm:$0xff] }
  0x9d   :  { %v5209_v61 = vld [vmem:[%s8043_s3 + $0xd8] sm:$0xff]  ;;  %2736 = vmatpush.msrb.mxu3 %v5243_v62  ;;  %v450_v62 = vld [vmem:[%s8040_s0 + $0xc3] sm:$0xff] }
  0x9e   :  { %2503 = vmatpush.msrb.mxu2 %v5209_v61  ;;  %v5208_v61 = vld [vmem:[%s8043_s3 + $0xd0] sm:$0xff] }
  0x9f   :  { %4979 = vmatmul.msk.f32.gmra.mxu0 %vm124_vm0, %v99_v5  ;;  %5108 = vmatmul.msk.f32.gmra.mxu3 %vm124_vm0, %v56_v6  ;;  %v438_v5 = vld [vmem:[%s8040_s0 + $0x63] sm:$0xff] }
  0xa0   :  { %v738_v6 = vld [vmem:[%s8040_s0 + $0x5c] sm:$0xff]  ;;  %2504 = vmatpush.msrb.mxu2 %v5208_v61 }
  0xa2   :  { %v1174_v7 = vpop.f32.mrf.mxu3 }
  0xa3   :  { %v5919_v8 = vadd.f32 %v1174_v7, %v271_v4 }
  0xa4   :  { %v274_v11 = vpop.f32.mrf.mxu0  ;;  %5018 = vmatmul.msk.f32.gmra.mxu1 %vm124_vm0, %v438_v5  ;;  %5060 = vmatmul.msk.f32.gmra.mxu2 %vm124_vm0, %v738_v6  ;;  %v445_v5 = vld [vmem:[%s8040_s0 + $0x9b] sm:$0xff] }
  0xa5   :  { %v745_v6 = vld [vmem:[%s8040_s0 + $0x94] sm:$0xff] }
  0xa7   :  { %4980 = vmatmul.msk.f32.gmra.mxu0 %vm124_vm0, %v100_v12  ;;  %5109 = vmatmul.msk.f32.gmra.mxu3 %vm124_vm0, %v57_v13  ;;  %v439_v13 = vld [vmem:[%s8040_s0 + $0x6b] sm:$0xff] }
  0xaa   :  { %v1177_v14 = vpop.f32.mrf.mxu3 }
  0xab   :  { %v5937_v15 = vadd.f32 %v1177_v14, %v274_v11  ;;  %v739_v14 = vld [vmem:[%s8040_s0 + $0x64] sm:$0xff] }
  0xac   :  { %v277_v18 = vpop.f32.mrf.mxu0  ;;  %5019 = vmatmul.msk.f32.gmra.mxu1 %vm124_vm0, %v439_v13  ;;  %5061 = vmatmul.msk.f32.gmra.mxu2 %vm124_vm0, %v739_v14 }
  0xaf   :  { %4981 = vmatmul.msk.f32.gmra.mxu0 %vm124_vm0, %v101_v19  ;;  %5110 = vmatmul.msk.f32.gmra.mxu3 %vm124_vm0, %v58_v20  ;;  %v440_v20 = vld [vmem:[%s8040_s0 + $0x73] sm:$0xff] }
  0xb2   :  { %v1180_v21 = vpop.f32.mrf.mxu3 }
  0xb3   :  { %v5955_v22 = vadd.f32 %v1180_v21, %v277_v18  ;;  %v66_v18 = vld [vmem:[%s8040_s0 + $0xe8] sm:$0xff] }
  0xb4   :  { %v280_v25 = vpop.f32.mrf.mxu0  ;;  %v740_v21 = vld [vmem:[%s8040_s0 + $0x6c] sm:$0xff]  ;;  %5020 = vmatmul.msk.f32.gmra.mxu1 %vm124_vm0, %v440_v20 }
  0xb5   :  { %5062 = vmatmul.msk.f32.gmra.mxu2 %vm124_vm0, %v740_v21  ;;  %v116_v21 = vld [vmem:[%s8040_s0 + $0x121] sm:$0xff] }
  0xb7   :  { %4982 = vmatmul.msk.f32.gmra.mxu0 %vm124_vm0, %v102_v26  ;;  %5111 = vmatmul.msk.f32.gmra.mxu3 %vm124_vm0, %v59_v27  ;;  %v441_v27 = vld [vmem:[%s8040_s0 + $0x7b] sm:$0xff] }
  0xba   :  { %v1183_v28 = vpop.f32.mrf.mxu3 }
  0xbb   :  { %v5973_v29 = vadd.f32 %v1183_v28, %v280_v25  ;;  %v67_v25 = vld [vmem:[%s8040_s0 + $0xf0] sm:$0xff] }
  0xbc   :  { %v283_v32 = vpop.f32.mrf.mxu0  ;;  %v741_v28 = vld [vmem:[%s8040_s0 + $0x74] sm:$0xff]  ;;  %5021 = vmatmul.msk.f32.gmra.mxu1 %vm124_vm0, %v441_v27 }
  0xbd   :  { %5063 = vmatmul.msk.f32.gmra.mxu2 %vm124_vm0, %v741_v28  ;;  %v447_v28 = vld [vmem:[%s8040_s0 + $0xab] sm:$0xff] }
  0xbf   :  { %4983 = vmatmul.msk.f32.gmra.mxu0 %vm124_vm0, %v103_v33  ;;  %5112 = vmatmul.msk.f32.gmra.mxu3 %vm124_vm0, %v60_v34  ;;  %v6146_v34 = vpop.f32.mrf.mxu1 }
  0xc2   :  { %v1186_v36 = vpop.f32.mrf.mxu3 }
  0xc3   :  { %v5994_v37 = vadd.f32 %v1186_v36, %v283_v32  ;;  %v68_v32 = vld [vmem:[%s8040_s0 + $0xf8] sm:$0xff] }
  0xc4   :  { %v286_v40 = vpop.f32.mrf.mxu0  ;;  %v742_v36 = vld [vmem:[%s8040_s0 + $0x7c] sm:$0xff]  ;;  %5022 = vmatmul.msk.f32.gmra.mxu1 %vm124_vm0, %v442_v35  ;;  %v117_v35 = vld [vmem:[%s8040_s0 + $0x129] sm:$0xff] }
  0xc5   :  { %5064 = vmatmul.msk.f32.gmra.mxu2 %vm124_vm0, %v742_v36 }
  0xc7   :  { %4984 = vmatmul.msk.f32.gmra.mxu0 %vm124_vm0, %v104_v41  ;;  %5113 = vmatmul.msk.f32.gmra.mxu3 %vm124_vm0, %v61_v42  ;;  %v6168_v42 = vpop.f32.mrf.mxu1 }
  0xca   :  { %v1189_v43 = vpop.f32.mrf.mxu3 }
  0xcb   :  { %v6012_v44 = vadd.f32 %v1189_v43, %v286_v40  ;;  %v69_v40 = vld [vmem:[%s8040_s0 + $0x100] sm:$0xff]  ;;  %v443_v43 = vld [vmem:[%s8040_s0 + $0x8b] sm:$0xff] }
  0xcc   :  { %v289_v47 = vpop.f32.mrf.mxu0  ;;  %5023 = vmatmul.msk.f32.gmra.mxu1 %vm124_vm0, %v443_v43  ;;  %v748_v43 = vld [vmem:[%s8040_s0 + $0xac] sm:$0xff] }
  0xcd   :  { %5065 = vmatmul.msk.f32.gmra.mxu2 %vm124_vm0, %v743_v45 }
  0xcf   :  { %4985 = vmatmul.msk.f32.gmra.mxu0 %vm124_vm0, %v105_v48  ;;  %5114 = vmatmul.msk.f32.gmra.mxu3 %vm124_vm0, %v62_v49  ;;  %v70_v48 = vld [vmem:[%s8040_s0 + $0x108] sm:$0xff]  ;;  %v6186_v49 = vpop.f32.mrf.mxu2  ;;  %v6188_v53 = vpop.f32.mrf.mxu1 }
  0xd2   :  { %v1192_v50 = vpop.f32.mrf.mxu3 }
  0xd3   :  { %v6030_v52 = vadd.f32 %v1192_v50, %v289_v47  ;;  %v113_v47 = vld [vmem:[%s8040_s0 + $0x109] sm:$0xff] }
  0xd4   :  { %v292_v55 = vpop.f32.mrf.mxu0  ;;  %5024 = vmatmul.msk.f32.gmra.mxu1 %vm124_vm0, %v444_v54  ;;  %v749_v54 = vld [vmem:[%s8040_s0 + $0xb4] sm:$0xff] }
  0xd7   :  { %4986 = vmatmul.msk.f32.gmra.mxu0 %vm124_vm0, %v106_v56  ;;  %5115 = vmatmul.msk.f32.gmra.mxu3 %vm124_vm0, %v63_v57  ;;  %v114_v57 = vld [vmem:[%s8040_s0 + $0x111] sm:$0xff] }
  0xda   :  { %v1195_v59 = vpop.f32.mrf.mxu3 }
  0xdb   :  { %v6048_v60 = vadd.f32 %v1195_v59, %v292_v55  ;;  %v744_v55 = vld [vmem:[%s8040_s0 + $0x8c] sm:$0xff] }
  0xdc   :  { %v295_v63 = vpop.f32.mrf.mxu0  ;;  %v71_v59 = vld [vmem:[%s8040_s0 + $0x110] sm:$0xff]  ;;  %5066 = vmatmul.msk.f32.gmra.mxu2 %vm124_vm0, %v744_v55  ;;  %5025 = vmatmul.msk.f32.gmra.mxu1 %vm124_vm0, %v445_v5  ;;  %v382_v5 = vld [vmem:[%s8040_s0 + $0x2] sm:$0xff] }
  0xdf   :  { %4987 = vmatmul.msk.f32.gmra.mxu0 %vm124_vm0, %v107_v0  ;;  %5116 = vmatmul.msk.f32.gmra.mxu3 %vm124_vm0, %v64_v2  ;;  %v6214_v2 = vpop.f32.mrf.mxu1 }
  0xe2   :  { %v1198_v3 = vpop.f32.mrf.mxu3 }
  0xe3   :  { %v6066_v4 = vadd.f32 %v1198_v3, %v295_v63  ;;  %v6212_v63 = vpop.f32.mrf.mxu2  ;;  %v5175_v3 = vld [vmem:[%s8043_s3 + $0x68] sm:$0xff] }
  0xe4   :  { %v298_v7 = vpop.f32.mrf.mxu0  ;;  %2270 = vmatpush.msrb.mxu1 %v5175_v3  ;;  %5067 = vmatmul.msk.f32.gmra.mxu2 %vm124_vm0, %v745_v6  ;;  %v5242_v6 = vld [vmem:[%s8043_s3 + $0x140] sm:$0xff] }
  0xe5   :  { %2737 = vmatpush.msrb.mxu3 %v5242_v6  ;;  %v454_v6 = vld [vmem:[%s8040_s0 + $0xe3] sm:$0xff] }
  0xe7   :  { %4988 = vmatmul.msk.f32.gmra.mxu0 %vm124_vm0, %v108_v9  ;;  %5117 = vmatmul.msk.f32.gmra.mxu3 %vm124_vm0, %v65_v10  ;;  %v115_v9 = vld [vmem:[%s8040_s0 + $0x119] sm:$0xff]  ;;  %v6237_v14 = vpop.f32.mrf.mxu1 }
  0xe8   :  { %v72_v10 = vld [vmem:[%s8040_s0 + $0x118] sm:$0xff] }
  0xea   :  { %v1201_v11 = vpop.f32.mrf.mxu3 }
  0xeb   :  { %v6084_v12 = vadd.f32 %v1201_v11, %v298_v7  ;;  %v6235_v11 = vpop.f32.mrf.mxu2 }
  0xec   :  { %v6092_v16 = vpop.f32.mrf.mxu0 }
  0xef   :  { %4989 = vmatmul.msk.f32.gmra.mxu0 %vm124_vm0, %v109_v17  ;;  %5118 = vmatmul.msk.f32.gmra.mxu3 %vm124_vm0, %v66_v18  ;;  %v446_v17 = vld [vmem:[%s8040_s0 + $0xa3] sm:$0xff]  ;;  %v6259_v27 = vpop.f32.mrf.mxu1 }
  0xf0   :  { %v746_v18 = vld [vmem:[%s8040_s0 + $0x9c] sm:$0xff]  ;;  %5026 = vmatmul.msk.f32.gmra.mxu1 %vm124_vm0, %v446_v17  ;;  %v751_v17 = vld [vmem:[%s8040_s0 + $0xc4] sm:$0xff] }
  0xf1   :  { %5068 = vmatmul.msk.f32.gmra.mxu2 %vm124_vm0, %v746_v18 }
  0xf2   :  { %v6104_v19 = vpop.f32.mrf.mxu3 }
  0xf4   :  { %v6112_v23 = vpop.f32.mrf.mxu0 }
  0xf7   :  { %4990 = vmatmul.msk.f32.gmra.mxu0 %vm124_vm0, %v110_v24  ;;  %5119 = vmatmul.msk.f32.gmra.mxu3 %vm124_vm0, %v67_v25  ;;  %v73_v24 = vld [vmem:[%s8040_s0 + $0x120] sm:$0xff]  ;;  %v6257_v25 = vpop.f32.mrf.mxu2 }
  0xf8   :  { %5027 = vmatmul.msk.f32.gmra.mxu1 %vm124_vm0, %v447_v28 }
  0xfa   :  { %v6124_v26 = vpop.f32.mrf.mxu3 }
  0xfc   :  { %v6132_v30 = vpop.f32.mrf.mxu0 }
  0xff   :  { %4991 = vmatmul.msk.f32.gmra.mxu0 %vm124_vm0, %v111_v31  ;;  %5120 = vmatmul.msk.f32.gmra.mxu3 %vm124_vm0, %v68_v32  ;;  %v747_v31 = vld [vmem:[%s8040_s0 + $0xa4] sm:$0xff]  ;;  %v6275_v36 = vpop.f32.mrf.mxu2 }
 0x100   :  { %5069 = vmatmul.msk.f32.gmra.mxu2 %vm124_vm0, %v747_v31  ;;  %v452_v31 = vld [vmem:[%s8040_s0 + $0xd3] sm:$0xff] }
 0x102   :  { %v6144_v33 = vpop.f32.mrf.mxu3 }
 0x104   :  { %v6154_v38 = vpop.f32.mrf.mxu0 }
 0x107   :  { %4992 = vmatmul.msk.f32.gmra.mxu0 %vm124_vm0, %v112_v39  ;;  %5121 = vmatmul.msk.f32.gmra.mxu3 %vm124_vm0, %v69_v40  ;;  %v6277_v39 = vpop.f32.mrf.mxu1  ;;  %v448_v40 = vld [vmem:[%s8040_s0 + $0xb3] sm:$0xff] }
 0x108   :  { %5028 = vmatmul.msk.f32.gmra.mxu1 %vm124_vm0, %v448_v40  ;;  %5070 = vmatmul.msk.f32.gmra.mxu2 %vm124_vm0, %v748_v43  ;;  %v384_v43 = vld [vmem:[%s8040_s0 + $0x12] sm:$0xff] }
 0x10a   :  { %v6166_v41 = vpop.f32.mrf.mxu3 }
 0x10c   :  { %v313_v46 = vpop.f32.mrf.mxu0 }
 0x10d   :  { %v118_v46 = vld [vmem:[%s8040_s0 + $0x131] sm:$0xff] }
 0x10f   :  { %4993 = vmatmul.msk.f32.gmra.mxu0 %vm124_vm0, %v113_v47  ;;  %5122 = vmatmul.msk.f32.gmra.mxu3 %vm124_vm0, %v70_v48  ;;  %v6293_v47 = vpop.f32.mrf.mxu2  ;;  %v6295_v48 = vpop.f32.mrf.mxu1 }
 0x110   :  { %5071 = vmatmul.msk.f32.gmra.mxu2 %vm124_vm0, %v749_v54  ;;  %v453_v54 = vld [vmem:[%s8040_s0 + $0xdb] sm:$0xff] }
 0x112   :  { %v1216_v50 = vpop.f32.mrf.mxu3 }
 0x113   :  { %v449_v50 = vld [vmem:[%s8040_s0 + $0xbb] sm:$0xff] }
 0x114   :  { %v316_v56 = vpop.f32.mrf.mxu0  ;;  %5029 = vmatmul.msk.f32.gmra.mxu1 %vm124_vm0, %v449_v50 }
 0x115   :  { %v119_v56 = vld [vmem:[%s8040_s0 + $0x139] sm:$0xff] }
 0x117   :  { %4994 = vmatmul.msk.f32.gmra.mxu0 %vm124_vm0, %v114_v57  ;;  %5123 = vmatmul.msk.f32.gmra.mxu3 %vm124_vm0, %v71_v59  ;;  %v6311_v57 = vpop.f32.mrf.mxu2  ;;  %v6313_v59 = vpop.f32.mrf.mxu1 }
 0x11a   :  { %v1219_v0 = vpop.f32.mrf.mxu3 }
 0x11b   :  { %v750_v0 = vld [vmem:[%s8040_s0 + $0xbc] sm:$0xff] }
 0x11c   :  { %v319_v7 = vpop.f32.mrf.mxu0  ;;  %5030 = vmatmul.msk.f32.gmra.mxu1 %vm124_vm0, %v450_v62  ;;  %5072 = vmatmul.msk.f32.gmra.mxu2 %vm124_vm0, %v750_v0  ;;  %v385_v62 = vld [vmem:[%s8040_s0 + $0x1a] sm:$0xff] }
 0x11d   :  { %v5174_v7 = vld [vmem:[%s8043_s3 + $0x60] sm:$0xff] }
 0x11e   :  { %2271 = vmatpush.msrb.mxu1 %v5174_v7  ;;  %v754_v7 = vld [vmem:[%s8040_s0 + $0xdc] sm:$0xff] }
 0x11f   :  { %4995 = vmatmul.msk.f32.gmra.mxu0 %vm124_vm0, %v115_v9  ;;  %5124 = vmatmul.msk.f32.gmra.mxu3 %vm124_vm0, %v72_v10  ;;  %v6338_v9 = vpop.f32.mrf.mxu2  ;;  %v6340_v10 = vpop.f32.mrf.mxu1 }
 0x122   :  { %v1222_v13 = vpop.f32.mrf.mxu3 }
 0x123   :  { %v451_v13 = vld [vmem:[%s8040_s0 + $0xcb] sm:$0xff] }
 0x124   :  { %v6245_v20 = vpop.f32.mrf.mxu0  ;;  %5031 = vmatmul.msk.f32.gmra.mxu1 %vm124_vm0, %v451_v13  ;;  %5073 = vmatmul.msk.f32.gmra.mxu2 %vm124_vm0, %v751_v17  ;;  %v386_v17 = vld [vmem:[%s8040_s0 + $0x22] sm:$0xff] }
 0x125   :  { %8050 = vst [vmem:[#allocation7_spill] sm:$0xff] %v6245_v20 }
 0x127   :  { %4996 = vmatmul.msk.f32.gmra.mxu0 %vm124_vm0, %v116_v21  ;;  %5125 = vmatmul.msk.f32.gmra.mxu3 %vm124_vm0, %v73_v24  ;;  %v383_v21 = vld [vmem:[%s8040_s0 + $0xa] sm:$0xff]  ;;  %v6356_v24 = vpop.f32.mrf.mxu2  ;;  %v6358_v28 = vpop.f32.mrf.mxu1 }
 0x12c   :  { %v6267_v32 = vpop.f32.mrf.mxu0  ;;  %5032 = vmatmul.msk.f32.gmra.mxu1 %vm124_vm0, %v452_v31 }
 0x12d   :  { %8051 = vst [vmem:[#allocation8_spill] sm:$0xff] %v6267_v32 }
 0x12f   :  { %4997 = vmatmul.msk.f32.gmra.mxu0 %vm124_vm0, %v117_v35  ;;  %v752_v35 = vld [vmem:[%s8040_s0 + $0xcc] sm:$0xff]  ;;  %v6376_v50 = vpop.f32.mrf.mxu1 }
 0x130   :  { %5074 = vmatmul.msk.f32.gmra.mxu2 %vm124_vm0, %v752_v35  ;;  %v455_v35 = vld [vmem:[%s8040_s0 + $0xeb] sm:$0xff] }
 0x134   :  { %v6285_v45 = vpop.f32.mrf.mxu0  ;;  %5033 = vmatmul.msk.f32.gmra.mxu1 %vm124_vm0, %v453_v54 }
 0x135   :  { %8052 = vst [vmem:[#allocation9_spill] sm:$0xff] %v6285_v45  ;;  %v460_v45 = vld [vmem:[%s8040_s0 + $0x113] sm:$0xff] }
 0x137   :  { %4998 = vmatmul.msk.f32.gmra.mxu0 %vm124_vm0, %v118_v46  ;;  %v6374_v46 = vpop.f32.mrf.mxu2 }
 0x13c   :  { %v6303_v55 = vpop.f32.mrf.mxu0  ;;  %5034 = vmatmul.msk.f32.gmra.mxu1 %vm124_vm0, %v454_v6 }
 0x13d   :  { %8053 = vst [vmem:[#allocation10_spill] sm:$0xff] %v6303_v55 }
 0x13f   :  { %4999 = vmatmul.msk.f32.gmra.mxu0 %vm124_vm0, %v119_v56  ;;  %v753_v56 = vld [vmem:[%s8040_s0 + $0xd4] sm:$0xff]  ;;  %v6392_v0 = vpop.f32.mrf.mxu2 }
 0x140   :  { %5075 = vmatmul.msk.f32.gmra.mxu2 %vm124_vm0, %v753_v56  ;;  %v387_v56 = vld [vmem:[%s8040_s0 + $0x2a] sm:$0xff] }
 0x144   :  { %v6324_v3 = vpop.f32.mrf.mxu0  ;;  %5035 = vmatmul.msk.f32.gmra.mxu1 %vm124_vm0, %v455_v35  ;;  %v456_v35 = vld [vmem:[%s8040_s0 + $0xf3] sm:$0xff] }
 0x145   :  { %8054 = vst [vmem:[#allocation11_spill] sm:$0xff] %v6324_v3  ;;  %v459_v3 = vld [vmem:[%s8040_s0 + $0x10b] sm:$0xff] }
 0x147   :  { %5129 = vmatmul.msk.f32.vlgmr.msrb.gmra.mxu0 %vm124_vm0, %v382_v5  ;;  %v6394_v5 = vpop.f32.mrf.mxu1 }
 0x148   :  { %5076 = vmatmul.msk.f32.gmra.mxu2 %vm124_vm0, %v754_v7 }
 0x14c   :  { %v6348_v18 = vpop.f32.mrf.mxu0  ;;  %5036 = vmatmul.msk.f32.gmra.mxu1 %vm124_vm0, %v456_v35 }
 0x14d   :  { %8055 = vst [vmem:[#allocation12_spill] sm:$0xff] %v6348_v18 }
 0x14f   :  { %5130 = vmatmul.msk.f32.gmra.mxu0 %vm124_vm0, %v383_v21  ;;  %v6410_v21 = vpop.f32.mrf.mxu2  ;;  %v6412_v31 = vpop.f32.mrf.mxu1 }
 0x154   :  { %v6366_v40 = vpop.f32.mrf.mxu0 }
 0x155   :  { %8056 = vst [vmem:[#allocation13_spill] sm:$0xff] %v6366_v40  ;;  %v458_v40 = vld [vmem:[%s8040_s0 + $0x103] sm:$0xff] }
 0x157   :  { %5131 = vmatmul.msk.f32.gmra.mxu0 %vm124_vm0, %v384_v43  ;;  %v755_v43 = vld [vmem:[%s8040_s0 + $0xe4] sm:$0xff]  ;;  %v6431_v6 = vpop.f32.mrf.mxu2  ;;  %v6433_v7 = vpop.f32.mrf.mxu1 }
 0x158   :  { %5077 = vmatmul.msk.f32.gmra.mxu2 %vm124_vm0, %v755_v43  ;;  %v756_v43 = vld [vmem:[%s8040_s0 + $0xec] sm:$0xff] }
 0x15c   :  { %v6384_v61 = vpop.f32.mrf.mxu0 }
 0x15d   :  { %8057 = vst [vmem:[#allocation14_spill] sm:$0xff] %v6384_v61 }
 0x15f   :  { %5132 = vmatmul.msk.f32.gmra.mxu0 %vm124_vm0, %v385_v62  ;;  %v5207_v62 = vld [vmem:[%s8043_s3 + $0xc8] sm:$0xff]  ;;  %v6457_v61 = vpop.f32.mrf.mxu1 }
 0x160   :  { %2505 = vmatpush.msrb.mxu2 %v5207_v62  ;;  %v388_v62 = vld [vmem:[%s8040_s0 + $0x32] sm:$0xff] }
 0x161   :  { %5078 = vmatmul.msk.f32.gmra.mxu2 %vm124_vm0, %v756_v43  ;;  %v389_v43 = vld [vmem:[%s8040_s0 + $0x3a] sm:$0xff] }
 0x164   :  { %v6402_v13 = vpop.f32.mrf.mxu0 }
 0x165   :  { %8058 = vst [vmem:[#allocation15_spill] sm:$0xff] %v6402_v13  ;;  %v6455_v13 = vpop.f32.mrf.mxu2 }
 0x167   :  { %5133 = vmatmul.msk.f32.gmra.mxu0 %vm124_vm0, %v386_v17  ;;  %v5241_v17 = vld [vmem:[%s8043_s3 + $0x138] sm:$0xff] }
 0x168   :  { %2738 = vmatpush.msrb.mxu3 %v5241_v17  ;;  %v757_v17 = vld [vmem:[%s8040_s0 + $0xf4] sm:$0xff] }
 0x169   :  { %5079 = vmatmul.msk.f32.gmra.mxu2 %vm124_vm0, %v757_v17 }
 0x16c   :  { %v6420_v54 = vpop.f32.mrf.mxu0 }
 0x16d   :  { %8059 = vst [vmem:[#allocation16_spill] sm:$0xff] %v6420_v54  ;;  %v5173_v54 = vld [vmem:[%s8043_s3 + $0x58] sm:$0xff] }
 0x16e   :  { %2272 = vmatpush.msrb.mxu1 %v5173_v54  ;;  %v6473_v54 = vpop.f32.mrf.mxu2 }
 0x16f   :  { %5134 = vmatmul.msk.f32.gmra.mxu0 %vm124_vm0, %v387_v56 }
 0x174   :  { %v6444_v56 = vpop.f32.mrf.mxu0 }
 0x175   :  { %8060 = vst [vmem:[#allocation17_spill] sm:$0xff] %v6444_v56  ;;  %v457_v56 = vld [vmem:[%s8040_s0 + $0xfb] sm:$0xff] }
 0x176   :  { %5037 = vmatmul.msk.f32.gmra.mxu1 %vm124_vm0, %v457_v56  ;;  %v390_v56 = vld [vmem:[%s8040_s0 + $0x42] sm:$0xff]  ;;  %v6491_v17 = vpop.f32.mrf.mxu2 }
 0x177   :  { %5135 = vmatmul.msk.f32.gmra.mxu0 %vm124_vm0, %v388_v62  ;;  %v6475_v62 = vpop.f32.mrf.mxu1 }
 0x17c   :  { %v6465_v35 = vpop.f32.mrf.mxu0 }
 0x17d   :  { %8061 = vst [vmem:[#allocation18_spill] sm:$0xff] %v6465_v35  ;;  %v758_v35 = vld [vmem:[%s8040_s0 + $0xfc] sm:$0xff] }
 0x17e   :  { %5038 = vmatmul.msk.f32.gmra.mxu1 %vm124_vm0, %v458_v40  ;;  %5080 = vmatmul.msk.f32.gmra.mxu2 %vm124_vm0, %v758_v35  ;;  %v391_v40 = vld [vmem:[%s8040_s0 + $0x4a] sm:$0xff]  ;;  %v6506_v35 = vpop.f32.mrf.mxu3 }
 0x17f   :  { %5136 = vmatmul.msk.f32.gmra.mxu0 %vm124_vm0, %v389_v43  ;;  %v658_v43 = vpop.f32.mrf.mxu1  ;;  %8064 = vst [vmem:[#allocation21_spill] sm:$0xff] %v6506_v35  ;;  %v461_v35 = vld [vmem:[%s8040_s0 + $0x11b] sm:$0xff] }
 0x184   :  { %v6483_v18 = vpop.f32.mrf.mxu0 }
 0x185   :  { %8062 = vst [vmem:[#allocation19_spill] sm:$0xff] %v6483_v18  ;;  %v759_v18 = vld [vmem:[%s8040_s0 + $0x104] sm:$0xff] }
 0x186   :  { %5039 = vmatmul.msk.f32.gmra.mxu1 %vm124_vm0, %v459_v3  ;;  %5081 = vmatmul.msk.f32.gmra.mxu2 %vm124_vm0, %v759_v18  ;;  %v392_v3 = vld [vmem:[%s8040_s0 + $0x52] sm:$0xff] }
 0x187   :  { %5137 = vmatmul.msk.f32.gmra.mxu0 %vm124_vm0, %v390_v56  ;;  %v6509_v56 = vpop.f32.mrf.mxu2  ;;  %v661_v43 = vpop.f32.mrf.mxu1 }
 0x188   :  { %8065 = vst [vmem:[#allocation22_spill] sm:$0xff] %v6509_v56 }
 0x18c   :  { %v6499_v55 = vpop.f32.mrf.mxu0 }
 0x18d   :  { %8063 = vst [vmem:[#allocation20_spill] sm:$0xff] %v6499_v55  ;;  %v760_v55 = vld [vmem:[%s8040_s0 + $0x10c] sm:$0xff] }
 0x18e   :  { %5040 = vmatmul.msk.f32.gmra.mxu1 %vm124_vm0, %v460_v45  ;;  %5082 = vmatmul.msk.f32.gmra.mxu2 %vm124_vm0, %v760_v55  ;;  %v393_v45 = vld [vmem:[%s8040_s0 + $0x5a] sm:$0xff] }
 0x18f   :  { %5138 = vmatmul.msk.f32.gmra.mxu0 %vm124_vm0, %v391_v40  ;;  %v959_v18 = vpop.f32.mrf.mxu2  ;;  %v6525_v40 = vpop.f32.mrf.mxu3  ;;  %v5206_v55 = vld [vmem:[%s8043_s3 + $0xc0] sm:$0xff] }
 0x190   :  { %8067 = vst [vmem:[#allocation24_spill] sm:$0xff] %v6525_v40  ;;  %v664_v43 = vpop.f32.mrf.mxu1  ;;  %2506 = vmatpush.msrb.mxu2 %v5206_v55  ;;  %v463_v40 = vld [vmem:[%s8040_s0 + $0x12b] sm:$0xff] }
 0x194   :  { %v6517_v32 = vpop.f32.mrf.mxu0 }
 0x195   :  { %8066 = vst [vmem:[#allocation23_spill] sm:$0xff] %v6517_v32  ;;  %v761_v32 = vld [vmem:[%s8040_s0 + $0x114] sm:$0xff] }
 0x196   :  { %5041 = vmatmul.msk.f32.gmra.mxu1 %vm124_vm0, %v461_v35  ;;  %5083 = vmatmul.msk.f32.gmra.mxu2 %vm124_vm0, %v761_v32  ;;  %v462_v35 = vld [vmem:[%s8040_s0 + $0x123] sm:$0xff] }
 0x197   :  { %5139 = vmatmul.msk.f32.gmra.mxu0 %vm124_vm0, %v392_v3  ;;  %v5240_v3 = vld [vmem:[%s8043_s3 + $0x130] sm:$0xff]  ;;  %v962_v18 = vpop.f32.mrf.mxu2  ;;  %v762_v32 = vld [vmem:[%s8040_s0 + $0x11c] sm:$0xff] }
 0x198   :  { %2739 = vmatpush.msrb.mxu3 %v5240_v3  ;;  %v6547_v43 = vpop.f32.mrf.mxu1  ;;  %v394_v18 = vld [vmem:[%s8040_s0 + $0x62] sm:$0xff] }
 0x199   :  { %8069 = vst [vmem:[#allocation26_spill] sm:$0xff] %v6547_v43 }
 0x19c   :  { %v6533_v20 = vpop.f32.mrf.mxu0 }
 0x19d   :  { %8068 = vst [vmem:[#allocation25_spill] sm:$0xff] %v6533_v20 }
 0x19e   :  { %5042 = vmatmul.msk.f32.gmra.mxu1 %vm124_vm0, %v462_v35  ;;  %5084 = vmatmul.msk.f32.gmra.mxu2 %vm124_vm0, %v762_v32  ;;  %v395_v35 = vld [vmem:[%s8040_s0 + $0x6a] sm:$0xff] }
 0x19f   :  { %5140 = vmatmul.msk.f32.gmra.mxu0 %vm124_vm0, %v393_v45  ;;  %v6555_v45 = vpop.f32.mrf.mxu3  ;;  %v965_v55 = vpop.f32.mrf.mxu2 }
 0x1a0   :  { %8070 = vst [vmem:[#allocation27_spill] sm:$0xff] %v6555_v45  ;;  %v6565_v3 = vpop.f32.mrf.mxu1  ;;  %v764_v55 = vld [vmem:[%s8040_s0 + $0x12c] sm:$0xff] }
 0x1a1   :  { %8072 = vst [vmem:[#allocation29_spill] sm:$0xff] %v6565_v3 }
 0x1a4   :  { %v6557_v20 = vpop.f32.mrf.mxu0 }
 0x1a5   :  { %8071 = vst [vmem:[#allocation28_spill] sm:$0xff] %v6557_v20  ;;  %v763_v20 = vld [vmem:[%s8040_s0 + $0x124] sm:$0xff] }
 0x1a6   :  { %5043 = vmatmul.msk.f32.gmra.mxu1 %vm124_vm0, %v463_v40  ;;  %5085 = vmatmul.msk.f32.gmra.mxu2 %vm124_vm0, %v763_v20  ;;  %v74_v40 = vld [vmem:[%s8040_s0 + $0x128] sm:$0xff]  ;;  %v396_v20 = vld [vmem:[%s8040_s0 + $0x72] sm:$0xff] }
 0x1a7   :  { %5141 = vmatmul.msk.f32.gmra.mxu0 %vm124_vm0, %v394_v18  ;;  %v6576_v43 = vpop.f32.mrf.mxu3  ;;  %v6581_v32 = vpop.f32.mrf.mxu2  ;;  %5126 = vmatmul.msk.f32.gmra.mxu3 %vm124_vm0, %v74_v40  ;;  %v465_v40 = vld [vmem:[%s8040_s0 + $0x13b] sm:$0xff] }
 0x1a8   :  { %8073 = vst [vmem:[#allocation30_spill] sm:$0xff] %v6576_v43  ;;  %v6583_v18 = vpop.f32.mrf.mxu1 }
 0x1a9   :  { %8074 = vst [vmem:[#allocation31_spill] sm:$0xff] %v6581_v32  ;;  %v765_v32 = vld [vmem:[%s8040_s0 + $0x134] sm:$0xff] }
 0x1aa   :  { %8075 = vst [vmem:[#allocation32_spill] sm:$0xff] %v6583_v18 }
 0x1ac   :  { %v373_v45 = vpop.f32.mrf.mxu0 }
 0x1ad   :  { %v464_v45 = vld [vmem:[%s8040_s0 + $0x133] sm:$0xff] }
 0x1ae   :  { %5044 = vmatmul.msk.f32.gmra.mxu1 %vm124_vm0, %v464_v45  ;;  %5086 = vmatmul.msk.f32.gmra.mxu2 %vm124_vm0, %v764_v55  ;;  %v75_v45 = vld [vmem:[%s8040_s0 + $0x130] sm:$0xff] }
 0x1af   :  { %5142 = vmatmul.msk.f32.gmra.mxu0 %vm124_vm0, %v395_v35  ;;  %v5172_v35 = vld [vmem:[%s8043_s3 + $0x50] sm:$0xff]  ;;  %v6603_v18 = vpop.f32.mrf.mxu3  ;;  %5127 = vmatmul.msk.f32.gmra.mxu3 %vm124_vm0, %v75_v45 }
 0x1b0   :  { %2273 = vmatpush.msrb.mxu1 %v5172_v35  ;;  %8076 = vst [vmem:[#allocation33_spill] sm:$0xff] %v6603_v18  ;;  %v6608_v3 = vpop.f32.mrf.mxu1  ;;  %v5171_v35 = vld [vmem:[%s8043_s3 + $0x48] sm:$0xff] }
 0x1b1   :  { %8078 = vst [vmem:[#allocation35_spill] sm:$0xff] %v6608_v3 }
 0x1b2   :  { %2274 = vmatpush.msrb.mxu1 %v5171_v35 }
 0x1b4   :  { %v376_v43 = vpop.f32.mrf.mxu0 }
 0x1b5   :  { %v6606_v43 = vpop.f32.mrf.mxu2 }
 0x1b6   :  { %8077 = vst [vmem:[#allocation34_spill] sm:$0xff] %v6606_v43  ;;  %5045 = vmatmul.msk.f32.gmra.mxu1 %vm124_vm0, %v465_v40  ;;  %5087 = vmatmul.msk.f32.gmra.mxu2 %vm124_vm0, %v765_v32  ;;  %v5169_v32 = vld [vmem:[%s8043_s3 + $0x38] sm:$0xff]  ;;  %v6663_v43 = vld [vmem:[%s8042_s2] ss:$0 sm:$0xff] }
 0x1b7   :  { %5143 = vmatmul.msk.f32.gmra.mxu0 %vm124_vm0, %v396_v20  ;;  %v397_v20 = vld [vmem:[%s8040_s0 + $0x7a] sm:$0xff]  ;;  %v6634_v3 = vpop.f32.mrf.mxu3 }
 0x1b8   :  { %8080 = vst [vmem:[#allocation37_spill] sm:$0xff] %v6634_v3  ;;  %v6636_v45 = vpop.f32.mrf.mxu1  ;;  %v766_v40 = vld [vmem:[%s8040_s0 + $0x13c] sm:$0xff] }
 0x1b9   :  { %8081 = vst [vmem:[#allocation38_spill] sm:$0xff] %v6636_v45  ;;  %v5239_v45 = vld [vmem:[%s8043_s3 + $0x128] sm:$0xff] }
 0x1ba   :  { %2740 = vmatpush.msrb.mxu3 %v5239_v45  ;;  %v5237_v45 = vld [vmem:[%s8043_s3 + $0x118] sm:$0xff] }
 0x1bc   :  { %v379_v55 = vpop.f32.mrf.mxu0 }
 0x1bd   :  { %v6629_v18 = vpop.f32.mrf.mxu2  ;;  %v5170_v55 = vld [vmem:[%s8043_s3 + $0x40] sm:$0xff] }
 0x1be   :  { %8079 = vst [vmem:[#allocation36_spill] sm:$0xff] %v6629_v18  ;;  %2275 = vmatpush.msrb.mxu1 %v5170_v55  ;;  %v398_v55 = vld [vmem:[%s8040_s0 + $0x82] sm:$0xff]  ;;  %5088 = vmatmul.msk.f32.gmra.mxu2 %vm124_vm0, %v766_v40  ;;  %v5204_v40 = vld [vmem:[%s8043_s3 + $0xb0] sm:$0xff] }
 0x1bf   :  { %5144 = vmatmul.msk.f32.gmra.mxu0 %vm124_vm0, %v397_v20  ;;  %v76_v20 = vld [vmem:[%s8040_s0 + $0x138] sm:$0xff] }
 0x1c0   :  { %2276 = vmatpush.msrb.mxu1 %v5169_v32  ;;  %5128 = vmatmul.msk.f32.gmra.mxu3 %vm124_vm0, %v76_v20  ;;  %v5205_v32 = vld [vmem:[%s8043_s3 + $0xb8] sm:$0xff]  ;;  %v5238_v20 = vld [vmem:[%s8043_s3 + $0x120] sm:$0xff] }
 0x1c1   :  { %2507 = vmatpush.msrb.mxu2 %v5205_v32  ;;  %2741 = vmatpush.msrb.mxu3 %v5238_v20  ;;  %v6683_v32 = vpop.f32.mrf.mxu3 }
 0x1c2   :  { %8084 = vst [vmem:[#allocation41_spill] sm:$0xff] %v6683_v32 }
 0x1c3   :  { %2508 = vmatpush.msrb.mxu2 %v5204_v40  ;;  %2742 = vmatpush.msrb.mxu3 %v5237_v45 }
 0x1c4   :  { %v1422_v35 = vpop.f32.mrf.mxu0 }
 0x1c5   :  { %v1423_v3 = vadd.f32 %v1422_v35, %v6146_v34  ;;  %v6666_v34 = vpop.f32.mrf.mxu2  ;;  %v6675_v35 = vpop.f32.mrf.mxu1 }
 0x1c6   :  { %8082 = vst [vmem:[#allocation39_spill] sm:$0xff] %v6666_v34 }
 0x1c7   :  { %v1542_v18 = vadd.f32 %v1423_v3, %v5865_v51  ;;  %5145 = vmatmul.msk.f32.gmra.mxu0 %vm124_vm0, %v398_v55  ;;  %v1706_v3 = vlaneseq  ;;  %8083 = vst [vmem:[#allocation40_spill] sm:$0xff] %v6675_v35  ;;  %v5203_v55 = vld [vmem:[%s8043_s3 + $0xa8] sm:$0xff] }
 0x1c8   :  { %2509 = vmatpush.msrb.mxu2 %v5203_v55 }
 0x1c9   :  { %v1582_v51 = vadd.f32 %v1542_v18, %v6186_v49  ;;  %v399_v49 = vld [vmem:[%s8040_s0 + $0x8a] sm:$0xff]  ;;  %v6689_v18 = vshrl.u32 %v1706_v3, 7 }
 0x1cb   :  { %v1626_v34 = vadd.f32 %v6663_v43, %v1582_v51  ;;  %vm1747_vm1 = vcmp.ge.s32.totalorder %v6689_v18, 5  ;;  %vm3299_vm8 = vcmp.ge.s32.totalorder %v6689_v18, 1 }
 0x1cc   :  { %v1425_v56 = vpop.f32.mrf.mxu0 }
 0x1cd   :  { %5496 = vtanh.f32 %v1626_v34  ;;  %v1426_v40 = vadd.f32 %v1425_v56, %v6168_v42  ;;  %v6694_v35 = vpop.f32.mrf.mxu2  ;;  %v6698_v55 = vpop.f32.mrf.mxu1 }
 0x1ce   :  { %v6704_v42 = vpop.f32.mrf.mxu3 }
 0x1cf   :  { %v1543_v20 = vadd.f32 %v1426_v40, %v5883_v58  ;;  %5146 = vmatmul.msk.f32.gmra.mxu0 %vm124_vm0, %v399_v49  ;;  %v400_v58 = vld [vmem:[%s8040_s0 + $0x92] sm:$0xff]  ;;  %8085 = vst [vmem:[#allocation42_spill] sm:$0xff] %v6704_v42 }
 0x1d1   :  { %v1583_v51 = vadd.f32 %v1543_v20, %v6212_v63 }
 0x1d3   :  { %v5497_v32 = vpop.eup %5496  ;;  %v1627_v34 = vadd.f32 %v6663_v43, %v1583_v51 }
 0x1d4   :  { %v2027_v3 = vsel %vm1747_vm1, %v5497_v32, 0.0  ;;  %v1428_v45 = vpop.f32.mrf.mxu0 }
 0x1d5   :  { %2067 = vst.msk [vmem:[#allocation2] sm:$0xff] %vm33_vm2, %v2027_v3  ;;  %5498 = vtanh.f32 %v1627_v34  ;;  %v1429_v56 = vadd.f32 %v1428_v45, %v6188_v53  ;;  %v6710_v49 = vpop.f32.mrf.mxu2  ;;  %v6713_v40 = vpop.f32.mrf.mxu1  ;;  %v401_v53 = vld [vmem:[%s8040_s0 + $0x9a] sm:$0xff] }
 0x1d6   :  { %v6721_v34 = vpop.f32.mrf.mxu3 }
 0x1d7   :  { %v1544_v63 = vadd.f32 %v1429_v56, %v5901_v1  ;;  %5147 = vmatmul.msk.f32.gmra.mxu0 %vm124_vm0, %v400_v58 }
 0x1d9   :  { %v1584_v32 = vadd.f32 %v1544_v63, %v6235_v11 }
 0x1db   :  { %v5499_v20 = vpop.eup %5498  ;;  %v1628_v51 = vadd.f32 %v6663_v43, %v1584_v32 }
 0x1dc   :  { %2068 = vst.msk [vmem:[#allocation2 + $0x8] sm:$0xff] %vm33_vm2, %v5499_v20  ;;  %v1431_v42 = vpop.f32.mrf.mxu0 }
 0x1dd   :  { %5500 = vtanh.f32 %v1628_v51  ;;  %v1432_v1 = vadd.f32 %v1431_v42, %v6214_v2  ;;  %v6725_v11 = vpop.f32.mrf.mxu2  ;;  %v6728_v58 = vpop.f32.mrf.mxu1 }
 0x1de   :  { %v6741_v51 = vpop.f32.mrf.mxu3 }
 0x1df   :  { %v1545_v3 = vadd.f32 %v1432_v1, %v5919_v8  ;;  %5148 = vmatmul.msk.f32.gmra.mxu0 %vm124_vm0, %v401_v53  ;;  %v402_v8 = vld [vmem:[%s8040_s0 + $0xa2] sm:$0xff] }
 0x1e1   :  { %v1585_v45 = vadd.f32 %v1545_v3, %v6257_v25 }
 0x1e3   :  { %v5501_v56 = vpop.eup %5500  ;;  %v1629_v63 = vadd.f32 %v6663_v43, %v1585_v45  ;;  %v2154_v32 = vld [vmem:[#allocation2 + $0x1] ss:$2 sm:$0xff] }
 0x1e4   :  { %2069 = vst.msk [vmem:[#allocation2 + $0x10] sm:$0xff] %vm33_vm2, %v5501_v56  ;;  %v1434_v20 = vpop.f32.mrf.mxu0  ;;  %5176 = vmatmul.msk.f32.vlgmr.msrb.gmra.mxu1 %vm33_vm2, %v2154_v32 }
 0x1e5   :  { %5502 = vtanh.f32 %v1629_v63  ;;  %v1435_v2 = vadd.f32 %v1434_v20, %v6237_v14  ;;  %v6739_v42 = vpop.f32.mrf.mxu2  ;;  %v6744_v1 = vpop.f32.mrf.mxu1 }
 0x1e7   :  { %v1546_v25 = vadd.f32 %v1435_v2, %v5937_v15  ;;  %5149 = vmatmul.msk.f32.gmra.mxu0 %vm124_vm0, %v402_v8  ;;  %v403_v15 = vld [vmem:[%s8040_s0 + $0xaa] sm:$0xff] }
 0x1e9   :  { %v1586_v53 = vadd.f32 %v1546_v25, %v6275_v36 }
 0x1eb   :  { %v5503_v3 = vpop.eup %5502  ;;  %v1630_v45 = vadd.f32 %v6663_v43, %v1586_v53  ;;  %v2387_v56 = vld [vmem:[#allocation2 + $0x3] ss:$2 sm:$0xff]  ;;  %v6761_v53 = vpop.f32.mrf.mxu3 }
 0x1ec   :  { %v2620_v32 = vld [vmem:[#allocation2 + $0x5] ss:$2 sm:$0xff]  ;;  %2070 = vst.msk [vmem:[#allocation2 + $0x18] sm:$0xff] %vm33_vm2, %v5503_v3  ;;  %v1437_v14 = vpop.f32.mrf.mxu0  ;;  %5210 = vmatmul.msk.f32.vlgmr.msrb.gmra.mxu2 %vm33_vm2, %v2387_v56 }
 0x1ed   :  { %5244 = vmatmul.msk.f32.vlgmr.msrb.gmra.mxu3 %vm33_vm2, %v2620_v32  ;;  %5504 = vtanh.f32 %v1630_v45  ;;  %v1438_v36 = vadd.f32 %v1437_v14, %v6259_v27  ;;  %v6756_v20 = vpop.f32.mrf.mxu2  ;;  %v6759_v2 = vpop.f32.mrf.mxu1 }
 0x1ef   :  { %v1547_v63 = vadd.f32 %v1438_v36, %v5955_v22  ;;  %5150 = vmatmul.msk.f32.gmra.mxu0 %vm124_vm0, %v403_v15  ;;  %v404_v22 = vld [vmem:[%s8040_s0 + $0xb2] sm:$0xff] }
 0x1f1   :  { %v1587_v8 = vadd.f32 %v1547_v63, %v6293_v47 }
 0x1f3   :  { %v5505_v25 = vpop.eup %5504  ;;  %v1631_v3 = vadd.f32 %v6663_v43, %v1587_v8  ;;  %v2156_v56 = vld [vmem:[#allocation2 + $0x11] ss:$2 sm:$0xff] }
 0x1f4   :  { %2071 = vst.msk [vmem:[#allocation2 + $0x20] sm:$0xff] %vm33_vm2, %v5505_v25  ;;  %v1440_v45 = vpop.f32.mrf.mxu0  ;;  %5177 = vmatmul.msk.f32.gmra.mxu1 %vm33_vm2, %v2156_v56 }
 0x1f5   :  { %5506 = vtanh.f32 %v1631_v3  ;;  %v1441_v27 = vadd.f32 %v1440_v45, %v6277_v39  ;;  %v6772_v32 = vpop.f32.mrf.mxu2  ;;  %v6775_v15 = vpop.f32.mrf.mxu1 }
 0x1f6   :  { %v6784_v39 = vpop.f32.mrf.mxu3 }
 0x1f7   :  { %v1548_v47 = vadd.f32 %v1441_v27, %v5973_v29  ;;  %5151 = vmatmul.msk.f32.gmra.mxu0 %vm124_vm0, %v404_v22  ;;  %v405_v29 = vld [vmem:[%s8040_s0 + $0xba] sm:$0xff] }
 0x1f9   :  { %v1588_v14 = vadd.f32 %v1548_v47, %v6311_v57 }
 0x1fb   :  { %v5507_v36 = vpop.eup %5506  ;;  %v1632_v63 = vadd.f32 %v6663_v43, %v1588_v14  ;;  %v2389_v8 = vld [vmem:[#allocation2 + $0x13] ss:$2 sm:$0xff] }
 0x1fc   :  { %v2622_v25 = vld [vmem:[#allocation2 + $0x15] ss:$2 sm:$0xff]  ;;  %2072 = vst.msk [vmem:[#allocation2 + $0x28] sm:$0xff] %vm33_vm2, %v5507_v36  ;;  %v1443_v3 = vpop.f32.mrf.mxu0  ;;  %5211 = vmatmul.msk.f32.gmra.mxu2 %vm33_vm2, %v2389_v8 }
 0x1fd   :  { %5245 = vmatmul.msk.f32.gmra.mxu3 %vm33_vm2, %v2622_v25  ;;  %5508 = vtanh.f32 %v1632_v63  ;;  %v1444_v57 = vadd.f32 %v1443_v3, %v6295_v48  ;;  %v6789_v45 = vpop.f32.mrf.mxu2  ;;  %v6792_v27 = vpop.f32.mrf.mxu1 }
 0x1fe   :  { %v6801_v63 = vpop.f32.mrf.mxu3 }
 0x1ff   :  { %v1549_v56 = vadd.f32 %v1444_v57, %v5994_v37  ;;  %5152 = vmatmul.msk.f32.gmra.mxu0 %vm124_vm0, %v405_v29  ;;  %v406_v37 = vld [vmem:[%s8040_s0 + $0xc2] sm:$0xff] }
 0x201   :  { %v1589_v22 = vadd.f32 %v1549_v56, %v6338_v9 }
 0x203   :  { %v5509_v47 = vpop.eup %5508  ;;  %v1633_v14 = vadd.f32 %v6663_v43, %v1589_v22  ;;  %v2158_v36 = vld [vmem:[#allocation2 + $0x21] ss:$2 sm:$0xff] }
 0x204   :  { %2073 = vst.msk [vmem:[#allocation2 + $0x30] sm:$0xff] %vm33_vm2, %v5509_v47  ;;  %v1446_v8 = vpop.f32.mrf.mxu0  ;;  %5178 = vmatmul.msk.f32.gmra.mxu1 %vm33_vm2, %v2158_v36 }
 0x205   :  { %5510 = vtanh.f32 %v1633_v14  ;;  %v1447_v48 = vadd.f32 %v1446_v8, %v6313_v59  ;;  %v6805_v25 = vpop.f32.mrf.mxu2  ;;  %v6808_v29 = vpop.f32.mrf.mxu1 }
 0x206   :  { %v6822_v8 = vpop.f32.mrf.mxu3 }
 0x207   :  { %v1550_v9 = vadd.f32 %v1447_v48, %v6012_v44  ;;  %5153 = vmatmul.msk.f32.gmra.mxu0 %vm124_vm0, %v406_v37  ;;  %v407_v44 = vld [vmem:[%s8040_s0 + $0xca] sm:$0xff] }
 0x209   :  { %v1590_v3 = vadd.f32 %v1550_v9, %v6356_v24 }
 0x20b   :  { %v5511_v57 = vpop.eup %5510  ;;  %v1634_v56 = vadd.f32 %v6663_v43, %v1590_v3  ;;  %v2391_v22 = vld [vmem:[#allocation2 + $0x23] ss:$2 sm:$0xff] }
 0x20c   :  { %v2624_v47 = vld [vmem:[#allocation2 + $0x25] ss:$2 sm:$0xff]  ;;  %2074 = vst.msk [vmem:[#allocation2 + $0x38] sm:$0xff] %vm33_vm2, %v5511_v57  ;;  %v1449_v59 = vpop.f32.mrf.mxu0  ;;  %5212 = vmatmul.msk.f32.gmra.mxu2 %vm33_vm2, %v2391_v22 }
 0x20d   :  { %5246 = vmatmul.msk.f32.gmra.mxu3 %vm33_vm2, %v2624_v47  ;;  %5512 = vtanh.f32 %v1634_v56  ;;  %v1450_v24 = vadd.f32 %v1449_v59, %v6340_v10  ;;  %v6820_v36 = vpop.f32.mrf.mxu2  ;;  %v6825_v48 = vpop.f32.mrf.mxu1 }
 0x20f   :  { %v1551_v14 = vadd.f32 %v1450_v24, %v6030_v52  ;;  %5154 = vmatmul.msk.f32.gmra.mxu0 %vm124_vm0, %v407_v44  ;;  %v408_v52 = vld [vmem:[%s8040_s0 + $0xd2] sm:$0xff]  ;;  %v6841_v24 = vpop.f32.mrf.mxu3 }
 0x211   :  { %v1591_v37 = vadd.f32 %v1551_v14, %v6374_v46 }
 0x213   :  { %v5513_v9 = vpop.eup %5512  ;;  %v1635_v3 = vadd.f32 %v6663_v43, %v1591_v37  ;;  %v2160_v57 = vld [vmem:[#allocation2 + $0x31] ss:$2 sm:$0xff] }
 0x214   :  { %2075 = vst.msk [vmem:[#allocation2 + $0x40] sm:$0xff] %vm33_vm2, %v5513_v9  ;;  %v1452_v56 = vpop.f32.mrf.mxu0  ;;  %5179 = vmatmul.msk.f32.gmra.mxu1 %vm33_vm2, %v2160_v57 }
 0x215   :  { %5514 = vtanh.f32 %v1635_v3  ;;  %v1453_v10 = vadd.f32 %v1452_v56, %v6358_v28  ;;  %v6836_v22 = vpop.f32.mrf.mxu2  ;;  %v6839_v59 = vpop.f32.mrf.mxu1 }
 0x217   :  { %v1552_v46 = vadd.f32 %v1453_v10, %v6048_v60  ;;  %5155 = vmatmul.msk.f32.gmra.mxu0 %vm124_vm0, %v408_v52  ;;  %v409_v60 = vld [vmem:[%s8040_s0 + $0xda] sm:$0xff] }
 0x219   :  { %v1592_v47 = vadd.f32 %v1552_v46, %v6392_v0 }
 0x21b   :  { %v5515_v44 = vpop.eup %5514  ;;  %v1636_v14 = vadd.f32 %v6663_v43, %v1592_v47  ;;  %v2393_v37 = vld [vmem:[#allocation2 + $0x33] ss:$2 sm:$0xff] }
 0x21c   :  { %v2626_v9 = vld [vmem:[#allocation2 + $0x35] ss:$2 sm:$0xff]  ;;  %2076 = vst.msk [vmem:[#allocation2 + $0x48] sm:$0xff] %vm33_vm2, %v5515_v44  ;;  %v1455_v28 = vpop.f32.mrf.mxu0  ;;  %5213 = vmatmul.msk.f32.gmra.mxu2 %vm33_vm2, %v2393_v37 }
 0x21d   :  { %5247 = vmatmul.msk.f32.gmra.mxu3 %vm33_vm2, %v2626_v9  ;;  %5516 = vtanh.f32 %v1636_v14  ;;  %v1456_v0 = vadd.f32 %v1455_v28, %v6376_v50  ;;  %v6853_v57 = vpop.f32.mrf.mxu2  ;;  %v6856_v52 = vpop.f32.mrf.mxu1 }
 0x21e   :  { %v6864_v50 = vpop.f32.mrf.mxu3 }
 0x21f   :  { %v1553_v3 = vadd.f32 %v1456_v0, %v6066_v4  ;;  %5156 = vmatmul.msk.f32.gmra.mxu0 %vm124_vm0, %v409_v60  ;;  %v410_v4 = vld [vmem:[%s8040_s0 + $0xe2] sm:$0xff] }
 0x221   :  { %v1593_v56 = vadd.f32 %v1553_v3, %v6410_v21 }
 0x223   :  { %v5517_v10 = vpop.eup %5516  ;;  %v1637_v46 = vadd.f32 %v6663_v43, %v1593_v56  ;;  %v2162_v47 = vld [vmem:[#allocation2 + $0x41] ss:$2 sm:$0xff] }
 0x224   :  { %2077 = vst.msk [vmem:[#allocation2 + $0x50] sm:$0xff] %vm33_vm2, %v5517_v10  ;;  %v1458_v44 = vpop.f32.mrf.mxu0  ;;  %5180 = vmatmul.msk.f32.gmra.mxu1 %vm33_vm2, %v2162_v47 }
 0x225   :  { %5518 = vtanh.f32 %v1637_v46  ;;  %v1459_v21 = vadd.f32 %v1458_v44, %v6394_v5  ;;  %v6869_v37 = vpop.f32.mrf.mxu2  ;;  %v718_v28 = vpop.f32.mrf.mxu1  ;;  %v1205_v5 = vadd.f32 %v6104_v19, %v6092_v16  ;;  %v412_v19 = vld [vmem:[%s8040_s0 + $0xf2] sm:$0xff] }
 0x226   :  { %v6882_v46 = vpop.f32.mrf.mxu3 }
 0x227   :  { %v1554_v14 = vadd.f32 %v1459_v21, %v6084_v12  ;;  %5157 = vmatmul.msk.f32.gmra.mxu0 %vm124_vm0, %v410_v4  ;;  %v411_v12 = vld [vmem:[%s8040_s0 + $0xea] sm:$0xff] }
 0x229   :  { %v1594_v9 = vadd.f32 %v1554_v14, %v6431_v6 }
 0x22b   :  { %v5519_v60 = vpop.eup %5518  ;;  %v1638_v0 = vadd.f32 %v6663_v43, %v1594_v9  ;;  %v2395_v3 = vld [vmem:[#allocation2 + $0x43] ss:$2 sm:$0xff] }
 0x22c   :  { %v2628_v56 = vld [vmem:[#allocation2 + $0x45] ss:$2 sm:$0xff]  ;;  %2078 = vst.msk [vmem:[#allocation2 + $0x58] sm:$0xff] %vm33_vm2, %v5519_v60  ;;  %v1461_v10 = vpop.f32.mrf.mxu0  ;;  %5214 = vmatmul.msk.f32.gmra.mxu2 %vm33_vm2, %v2395_v3  ;;  %v5631_v60 = vmov 0.0  }
 0x22d   :  { %5248 = vmatmul.msk.f32.gmra.mxu3 %vm33_vm2, %v2628_v56  ;;  %5520 = vtanh.f32 %v1638_v0  ;;  %v1462_v6 = vadd.f32 %v1461_v10, %v6412_v31  ;;  %v6885_v44 = vpop.f32.mrf.mxu2  ;;  %v721_v21 = vpop.f32.mrf.mxu1  ;;  %v1208_v31 = vadd.f32 %v6124_v26, %v6112_v23  ;;  %2084 = vst.msk [vmem:[#allocation2 + $0x88] sm:$0xff] %vm33_vm2, %v5631_v60 }
 0x22e   :  { %34 = vst.msk [vmem:[#allocation2 + $0x140] sm:$0xff] %vm33_vm2, %v5631_v60  ;;  %v1276_v3 = vpop.f32.mrf.mxu3 }
 0x22f   :  { %v1555_v47 = vadd.f32 %v1462_v6, %v1205_v5  ;;  %5158 = vmatmul.msk.f32.gmra.mxu0 %vm124_vm0, %v411_v12  ;;  %2085 = vst.msk [vmem:[#allocation2 + $0x90] sm:$0xff] %vm33_vm2, %v5631_v60  ;;  %v8086_v3 = vld [vmem:[#allocation22_spill] sm:$0xff] }
 0x230   :  { %2086 = vst.msk [vmem:[#allocation2 + $0x98] sm:$0xff] %vm33_vm2, %v5631_v60 }
 0x231   :  { %v1595_v4 = vadd.f32 %v1555_v47, %v6455_v13  ;;  %2104 = vst.msk [vmem:[#allocation2 + $0x128] sm:$0xff] %vm33_vm2, %v5631_v60  ;;  %v1211_v47 = vadd.f32 %v6144_v33, %v6132_v30  ;;  %v414_v33 = vld [vmem:[%s8040_s0 + $0x102] sm:$0xff] }
 0x232   :  { %2105 = vst.msk [vmem:[#allocation2 + $0x130] sm:$0xff] %vm33_vm2, %v5631_v60 }
 0x233   :  { %v5521_v14 = vpop.eup %5520  ;;  %v1639_v9 = vadd.f32 %v6663_v43, %v1595_v4  ;;  %v2164_v28 = vld [vmem:[#allocation2 + $0x51] ss:$2 sm:$0xff]  ;;  %2106 = vst.msk [vmem:[#allocation2 + $0x138] sm:$0xff] %vm33_vm2, %v5631_v60 }
 0x234   :  { %2079 = vst.msk [vmem:[#allocation2 + $0x60] sm:$0xff] %vm33_vm2, %v5521_v14  ;;  %v1464_v16 = vpop.f32.mrf.mxu0  ;;  %5181 = vmatmul.msk.f32.gmra.mxu1 %vm33_vm2, %v2164_v28 }
 0x235   :  { %5522 = vtanh.f32 %v1639_v9  ;;  %v1465_v13 = vadd.f32 %v1464_v16, %v6433_v7  ;;  %v1019_v56 = vpop.f32.mrf.mxu2  ;;  %v724_v23 = vpop.f32.mrf.mxu1  ;;  %3468 = vst.msk [vmem:[#allocation3 + $0x48] sm:$0xff] %vm35_vm3, %v5631_v60 }
 0x236   :  { %3478 = vst.msk [vmem:[#allocation3 + $0x98] sm:$0xff] %vm35_vm3, %v5631_v60  ;;  %v1279_v14 = vpop.f32.mrf.mxu3 }
 0x237   :  { %v1556_v0 = vadd.f32 %v1465_v13, %v1208_v31  ;;  %5159 = vmatmul.msk.f32.gmra.mxu0 %vm124_vm0, %v412_v19 }
 0x239   :  { %v1596_v10 = vadd.f32 %v1556_v0, %v6473_v54  ;;  %v413_v54 = vld [vmem:[%s8040_s0 + $0xfa] sm:$0xff] }
 0x23b   :  { %v5523_v26 = vpop.eup %5522  ;;  %v1640_v7 = vadd.f32 %v6663_v43, %v1596_v10  ;;  %v2397_v12 = vld [vmem:[#allocation2 + $0x53] ss:$2 sm:$0xff] }
 0x23c   :  { %v2630_v5 = vld [vmem:[#allocation2 + $0x55] ss:$2 sm:$0xff]  ;;  %2080 = vst.msk [vmem:[#allocation2 + $0x68] sm:$0xff] %vm33_vm2, %v5523_v26  ;;  %v1467_v6 = vpop.f32.mrf.mxu0  ;;  %5215 = vmatmul.msk.f32.gmra.mxu2 %vm33_vm2, %v2397_v12 }
 0x23d   :  { %5249 = vmatmul.msk.f32.gmra.mxu3 %vm33_vm2, %v2630_v5  ;;  %5524 = vtanh.f32 %v1640_v7  ;;  %v1468_v4 = vadd.f32 %v1467_v6, %v6457_v61  ;;  %v1022_v9 = vpop.f32.mrf.mxu2  ;;  %v1214_v61 = vadd.f32 %v6166_v41, %v6154_v38  ;;  %v415_v38 = vld [vmem:[%s8040_s0 + $0x10a] sm:$0xff]  ;;  %v1723_v41 = vadd.s32 128, %v6689_v18 }
 0x23f   :  { %v1557_v21 = vadd.f32 %v1468_v4, %v1211_v47  ;;  %5160 = vmatmul.msk.f32.gmra.mxu0 %vm124_vm0, %v413_v54  ;;  %vm1803_vm4 = vcmp.lt.s32.totalorder %v1723_v41, 133  ;;  %v416_v47 = vld [vmem:[%s8040_s0 + $0x112] sm:$0xff]  ;;  %v417_v4 = vld [vmem:[%s8040_s0 + $0x11a] sm:$0xff] }
 0x240   :  { %v8091_v41 = vld [vmem:[#allocation8_spill] sm:$0xff] }
 0x241   :  { %v1597_v28 = vadd.f32 %v1557_v21, %v6491_v17 }
 0x243   :  { %v5525_v16 = vpop.eup %5524  ;;  %v1641_v19 = vadd.f32 %v6663_v43, %v1597_v28  ;;  %v2166_v31 = vld [vmem:[#allocation2 + $0x61] ss:$2 sm:$0xff]  ;;  %v1282_v60 = vpop.f32.mrf.mxu3 }
 0x244   :  { %2081 = vst.msk [vmem:[#allocation2 + $0x70] sm:$0xff] %vm33_vm2, %v5525_v16  ;;  %v1470_v30 = vpop.f32.mrf.mxu0  ;;  %5182 = vmatmul.msk.f32.gmra.mxu1 %vm33_vm2, %v2166_v31 }
 0x245   :  { %5526 = vtanh.f32 %v1641_v19  ;;  %v1471_v13 = vadd.f32 %v1470_v30, %v6475_v62  ;;  %v1025_v0 = vpop.f32.mrf.mxu2  ;;  %v418_v19 = vld [vmem:[%s8040_s0 + $0x122] sm:$0xff] }
 0x246   :  { %v5202_v30 = vld [vmem:[%s8043_s3 + $0xa0] sm:$0xff]  ;;  %v8089_v0 = vld [vmem:[#allocation26_spill] sm:$0xff] }
 0x247   :  { %v1558_v17 = vadd.f32 %v1471_v13, %v1214_v61  ;;  %5161 = vmatmul.msk.f32.gmra.mxu0 %vm124_vm0, %v414_v33  ;;  %v5236_v33 = vld [vmem:[%s8043_s3 + $0x110] sm:$0xff]  ;;  %3010 = vmatpush.msra.mxu2 %v5202_v30 }
 0x248   :  { %v2152_v61 = vld [vmem:[%s8043_s3 + $0x30] sm:$0xff]  ;;  %3147 = vmatpush.msra.mxu3 %v5236_v33 }
 0x249   :  { %v1598_v56 = vadd.f32 %v1558_v17, %v8086_v3  ;;  %v8087_v13 = vld [vmem:[#allocation7_spill] sm:$0xff]  ;;  %v8088_v17 = vld [vmem:[#allocation21_spill] sm:$0xff]  ;;  %2873 = vmatpush.msra.mxu1 %v2152_v61  ;;  %v8097_v61 = vld [vmem:[#allocation32_spill] sm:$0xff] }
 0x24a   :  { %v1226_v60 = vadd.f32 %v8088_v17, %v8087_v13  ;;  %v8096_v30 = vld [vmem:[#allocation27_spill] sm:$0xff] }
 0x24b   :  { %v5527_v10 = vpop.eup %5526  ;;  %v1642_v23 = vadd.f32 %v6663_v43, %v1598_v56  ;;  %v2399_v26 = vld [vmem:[#allocation2 + $0x63] ss:$2 sm:$0xff] }
 0x24c   :  { %v2632_v7 = vld [vmem:[#allocation2 + $0x65] ss:$2 sm:$0xff]  ;;  %2082 = vst.msk [vmem:[#allocation2 + $0x78] sm:$0xff] %vm33_vm2, %v5527_v10  ;;  %v1473_v12 = vpop.f32.mrf.mxu0  ;;  %5216 = vmatmul.msk.f32.gmra.mxu2 %vm33_vm2, %v2399_v26 }
 0x24d   :  { %5250 = vmatmul.msk.f32.gmra.mxu3 %vm33_vm2, %v2632_v7  ;;  %5528 = vtanh.f32 %v1642_v23  ;;  %v2172_v10 = vld [vmem:[#allocation2 + $0x91] ss:$2 sm:$0xff] }
 0x24e   :  { %v8090_v26 = vld [vmem:[#allocation31_spill] sm:$0xff] }
 0x24f   :  { %5162 = vmatmul.msk.f32.gmra.mxu0 %vm124_vm0, %v415_v38 }
 0x253   :  { %v5529_v62 = vpop.eup %5528  ;;  %v2168_v5 = vld [vmem:[#allocation2 + $0x71] ss:$2 sm:$0xff] }
 0x254   :  { %v2043_v6 = vsel %vm1803_vm4, %v5529_v62, 0.0  ;;  %v1476_v54 = vpop.f32.mrf.mxu0  ;;  %5183 = vmatmul.msk.f32.gmra.mxu1 %vm33_vm2, %v2168_v5  ;;  %v8092_v62 = vld [vmem:[#allocation24_spill] sm:$0xff]  ;;  %vm3904_vm4 = vcmask 1041409  }
 0x255   :  { %2083 = vst.msk [vmem:[#allocation2 + $0x80] sm:$0xff] %vm33_vm2, %v2043_v6  ;;  %v1229_v5 = vadd.f32 %v8092_v62, %v8091_v41  ;;  %v1727_v6 = vadd.s32 160, %v6689_v18  ;;  %v8093_v54 = vld [vmem:[#allocation29_spill] sm:$0xff]  ;;  %v8101_v62 = vld [vmem:[#allocation35_spill] sm:$0xff] }
 0x257   :  { %5163 = vmatmul.msk.f32.gmra.mxu0 %vm124_vm0, %v416_v47  ;;  %vm1887_vm5 = vcmp.ge.s32.totalorder %v1727_v6, 165  ;;  %v5235_v6 = vld [vmem:[%s8043_s3 + $0x108] sm:$0xff] }
 0x258   :  { %3148 = vmatpush.msra.mxu3 %v5235_v6 }
 0x25c   :  { %v1479_v21 = vpop.f32.mrf.mxu0  ;;  %v2170_v14 = vld [vmem:[#allocation2 + $0x81] ss:$2 sm:$0xff] }
 0x25d   :  { %v2401_v9 = vld [vmem:[#allocation2 + $0x73] ss:$2 sm:$0xff]  ;;  %5184 = vmatmul.msk.f32.gmra.mxu1 %vm33_vm2, %v2170_v14  ;;  %v2403_v16 = vld [vmem:[#allocation2 + $0x83] ss:$2 sm:$0xff] }
 0x25e   :  { %v2634_v28 = vld [vmem:[#allocation2 + $0x75] ss:$2 sm:$0xff]  ;;  %5217 = vmatmul.msk.f32.gmra.mxu2 %vm33_vm2, %v2401_v9  ;;  %v2636_v56 = vld [vmem:[#allocation2 + $0x85] ss:$2 sm:$0xff] }
 0x25f   :  { %5251 = vmatmul.msk.f32.gmra.mxu3 %vm33_vm2, %v2634_v28  ;;  %5164 = vmatmul.msk.f32.gmra.mxu0 %vm124_vm0, %v417_v4  ;;  %v8094_v21 = vld [vmem:[#allocation34_spill] sm:$0xff] }
 0x264   :  { %v1482_v31 = vpop.f32.mrf.mxu0 }
 0x265   :  { %v1483_v3 = vadd.f32 %v1482_v31, %v8089_v0  ;;  %5185 = vmatmul.msk.f32.gmra.mxu1 %vm33_vm2, %v2172_v10  ;;  %v8095_v31 = vld [vmem:[#allocation9_spill] sm:$0xff] }
 0x266   :  { %5218 = vmatmul.msk.f32.gmra.mxu2 %vm33_vm2, %v2403_v16  ;;  %v1232_v33 = vadd.f32 %v8096_v30, %v8095_v31  ;;  %v8103_v31 = vld [vmem:[#allocation11_spill] sm:$0xff]  ;;  %v8104_v30 = vld [vmem:[#allocation33_spill] sm:$0xff] }
 0x267   :  { %5252 = vmatmul.msk.f32.gmra.mxu3 %vm33_vm2, %v2636_v56  ;;  %v1562_v23 = vadd.f32 %v1483_v3, %v1226_v60  ;;  %5165 = vmatmul.msk.f32.gmra.mxu0 %vm124_vm0, %v418_v19  ;;  %v8098_v60 = vld [vmem:[#allocation36_spill] sm:$0xff] }
 0x269   :  { %v1602_v7 = vadd.f32 %v1562_v23, %v8090_v26 }
 0x26b   :  { %v1646_v12 = vadd.f32 %v6663_v43, %v1602_v7  ;;  %v5201_v7 = vld [vmem:[%s8043_s3 + $0x98] sm:$0xff] }
 0x26c   :  { %v1485_v38 = vpop.f32.mrf.mxu0  ;;  %3011 = vmatpush.msra.mxu2 %v5201_v7  ;;  %v8106_v7 = vld [vmem:[#allocation12_spill] sm:$0xff] }
 0x26d   :  { %5530 = vtanh.f32 %v1646_v12  ;;  %v1486_v47 = vadd.f32 %v1485_v38, %v8093_v54  ;;  %v8099_v12 = vld [vmem:[#allocation10_spill] sm:$0xff] }
 0x26e   :  { %v8100_v38 = vld [vmem:[#allocation30_spill] sm:$0xff] }
 0x26f   :  { %v1563_v4 = vadd.f32 %v1486_v47, %v1229_v5  ;;  %v1235_v41 = vadd.f32 %v8100_v38, %v8099_v12  ;;  %v2151_v54 = vld [vmem:[%s8043_s3 + $0x28] sm:$0xff] }
 0x270   :  { %2874 = vmatpush.msra.mxu1 %v2151_v54  ;;  %v8107_v12 = vld [vmem:[#allocation37_spill] sm:$0xff] }
 0x271   :  { %v1603_v14 = vadd.f32 %v1563_v4, %v8094_v21  ;;  %v8102_v4 = vld [vmem:[#allocation39_spill] sm:$0xff]  ;;  %v1241_v38 = vadd.f32 %v8107_v12, %v8106_v7 }
 0x273   :  { %v5531_v9 = vpop.eup %5530  ;;  %v1647_v28 = vadd.f32 %v6663_v43, %v1603_v14 }
 0x274   :  { %v2047_v16 = vsel %vm1887_vm5, %v5531_v9, 0.0  ;;  %v1488_v19 = vpop.f32.mrf.mxu0 }
 0x275   :  { %2087 = vst.msk [vmem:[#allocation2 + $0xa0] sm:$0xff] %vm33_vm2, %v2047_v16  ;;  %5532 = vtanh.f32 %v1647_v28  ;;  %v1489_v13 = vadd.f32 %v1488_v19, %v8097_v61  ;;  %v5327_v19 = vld [vmem:[%s8045_s5 + $0x38] sm:$0xf]  ;;  %v8105_v61 = vld [vmem:[#allocation38_spill] sm:$0xff] }
 0x276   :  { %5328 = vmatpush.msk.msra.mxu0 %vm3557_vm6, %v5327_v19 }
 0x277   :  { %v1564_v17 = vadd.f32 %v1489_v13, %v1232_v33  ;;  %v1238_v33 = vadd.f32 %v8104_v30, %v8103_v31 }
 0x279   :  { %v1604_v0 = vadd.f32 %v1564_v17, %v8098_v60 }
 0x27b   :  { %v5533_v3 = vpop.eup %5532  ;;  %v1648_v56 = vadd.f32 %v6663_v43, %v1604_v0 }
 0x27c   :  { %2088 = vst.msk [vmem:[#allocation2 + $0xa8] sm:$0xff] %vm33_vm2, %v5533_v3  ;;  %v1491_v10 = vpop.f32.mrf.mxu0  ;;  %v2405_v23 = vld [vmem:[#allocation2 + $0x93] ss:$2 sm:$0xff] }
 0x27d   :  { %v2638_v26 = vld [vmem:[#allocation2 + $0x95] ss:$2 sm:$0xff]  ;;  %5534 = vtanh.f32 %v1648_v56  ;;  %v1492_v5 = vadd.f32 %v1491_v10, %v8101_v62  ;;  %5219 = vmatmul.msk.f32.gmra.mxu2 %vm33_vm2, %v2405_v23 }
 0x27e   :  { %5253 = vmatmul.msk.f32.gmra.mxu3 %vm33_vm2, %v2638_v26  ;;  %v5200_v26 = vld [vmem:[%s8043_s3 + $0x90] sm:$0xff] }
 0x27f   :  { %v1565_v47 = vadd.f32 %v1492_v5, %v1235_v41  ;;  %3012 = vmatpush.msra.mxu2 %v5200_v26 }
 0x281   :  { %v1605_v21 = vadd.f32 %v1565_v47, %v8102_v4 }
 0x283   :  { %v5535_v14 = vpop.eup %5534  ;;  %v1649_v9 = vadd.f32 %v6663_v43, %v1605_v21  ;;  %v2174_v28 = vld [vmem:[#allocation2 + $0xa1] ss:$2 sm:$0xff] }
 0x284   :  { %2089 = vst.msk [vmem:[#allocation2 + $0xb0] sm:$0xff] %vm33_vm2, %v5535_v14  ;;  %v1494_v16 = vpop.f32.mrf.mxu0  ;;  %5186 = vmatmul.msk.f32.gmra.mxu1 %vm33_vm2, %v2174_v28  ;;  %v5234_v21 = vld [vmem:[%s8043_s3 + $0x100] sm:$0xff] }
 0x285   :  { %5536 = vtanh.f32 %v1649_v9  ;;  %v1495_v13 = vadd.f32 %v1494_v16, %v8105_v61  ;;  %v2150_v14 = vld [vmem:[%s8043_s3 + $0x20] sm:$0xff]  ;;  %3149 = vmatpush.msra.mxu3 %v5234_v21 }
 0x286   :  { %v8109_v9 = vld [vmem:[#allocation13_spill] sm:$0xff]  ;;  %2875 = vmatpush.msra.mxu1 %v2150_v14 }
 0x287   :  { %v1566_v17 = vadd.f32 %v1495_v13, %v1238_v33  ;;  %v8110_v28 = vld [vmem:[#allocation41_spill] sm:$0xff]  ;;  %v7037_v33 = vpop.f32.mrf.mxu1 }
 0x289   :  { %v1606_v60 = vadd.f32 %v1566_v17, %v6694_v35  ;;  %v8108_v35 = vld [vmem:[#allocation40_spill] sm:$0xff] }
 0x28b   :  { %v5537_v0 = vpop.eup %5536  ;;  %v1650_v3 = vadd.f32 %v6663_v43, %v1606_v60  ;;  %v2407_v56 = vld [vmem:[#allocation2 + $0xa3] ss:$2 sm:$0xff] }
 0x28c   :  { %v2640_v10 = vld [vmem:[#allocation2 + $0xa5] ss:$2 sm:$0xff]  ;;  %2090 = vst.msk [vmem:[#allocation2 + $0xb8] sm:$0xff] %vm33_vm2, %v5537_v0  ;;  %v1497_v23 = vpop.f32.mrf.mxu0  ;;  %5220 = vmatmul.msk.f32.gmra.mxu2 %vm33_vm2, %v2407_v56 }
 0x28d   :  { %5254 = vmatmul.msk.f32.gmra.mxu3 %vm33_vm2, %v2640_v10  ;;  %5538 = vtanh.f32 %v1650_v3  ;;  %v1498_v41 = vadd.f32 %v1497_v23, %v8108_v35  ;;  %v8112_v0 = vld [vmem:[#allocation42_spill] sm:$0xff] }
 0x28e   :  { %v5199_v35 = vld [vmem:[%s8043_s3 + $0x88] sm:$0xff] }
 0x28f   :  { %v1567_v62 = vadd.f32 %v1498_v41, %v1241_v38  ;;  %v7047_v26 = vpop.f32.mrf.mxu1  ;;  %v8113_v41 = vld [vmem:[#allocation15_spill] sm:$0xff]  ;;  %3013 = vmatpush.msra.mxu2 %v5199_v35 }
 0x291   :  { %v1607_v5 = vadd.f32 %v1567_v62, %v6710_v49  ;;  %v1244_v49 = vadd.f32 %v8110_v28, %v8109_v9 }
 0x293   :  { %v5539_v6 = vpop.eup %5538  ;;  %v1651_v54 = vadd.f32 %v6663_v43, %v1607_v5  ;;  %v2176_v47 = vld [vmem:[#allocation2 + $0xb1] ss:$2 sm:$0xff] }
 0x294   :  { %2091 = vst.msk [vmem:[#allocation2 + $0xc0] sm:$0xff] %vm33_vm2, %v5539_v6  ;;  %v1500_v4 = vpop.f32.mrf.mxu0  ;;  %5187 = vmatmul.msk.f32.gmra.mxu1 %vm33_vm2, %v2176_v47 }
 0x295   :  { %5540 = vtanh.f32 %v1651_v54  ;;  %v1501_v16 = vadd.f32 %v1500_v4, %v6698_v55  ;;  %v8111_v55 = vld [vmem:[#allocation14_spill] sm:$0xff] }
 0x296   :  { %v1247_v3 = vadd.f32 %v8112_v0, %v8111_v55 }
 0x297   :  { %v1568_v19 = vadd.f32 %v1501_v16, %v1244_v49  ;;  %v7059_v54 = vpop.f32.mrf.mxu1 }
 0x299   :  { %v1608_v31 = vadd.f32 %v1568_v19, %v6725_v11 }
 0x29b   :  { %v5541_v30 = vpop.eup %5540  ;;  %v1652_v61 = vadd.f32 %v6663_v43, %v1608_v31  ;;  %v2409_v13 = vld [vmem:[#allocation2 + $0xb3] ss:$2 sm:$0xff] }
 0x29c   :  { %v2642_v17 = vld [vmem:[#allocation2 + $0xb5] ss:$2 sm:$0xff]  ;;  %2092 = vst.msk [vmem:[#allocation2 + $0xc8] sm:$0xff] %vm33_vm2, %v5541_v30  ;;  %v1503_v60 = vpop.f32.mrf.mxu0  ;;  %5221 = vmatmul.msk.f32.gmra.mxu2 %vm33_vm2, %v2409_v13 }
 0x29d   :  { %5255 = vmatmul.msk.f32.gmra.mxu3 %vm33_vm2, %v2642_v17  ;;  %5542 = vtanh.f32 %v1652_v61  ;;  %v1504_v11 = vadd.f32 %v1503_v60, %v6713_v40  ;;  %v1250_v40 = vadd.f32 %v6721_v34, %v8113_v41  ;;  %v5233_v34 = vld [vmem:[%s8043_s3 + $0xf8] sm:$0xff]  ;;  %v7083_v60 = vpop.f32.mrf.mxu2 }
 0x29e   :  { %3150 = vmatpush.msra.mxu3 %v5233_v34 }
 0x29f   :  { %v1569_v56 = vadd.f32 %v1504_v11, %v1247_v3  ;;  %v7075_v31 = vpop.f32.mrf.mxu1 }
 0x2a1   :  { %v1609_v10 = vadd.f32 %v1569_v56, %v6739_v42 }
 0x2a3   :  { %v5543_v23 = vpop.eup %5542  ;;  %v1653_v7 = vadd.f32 %v6663_v43, %v1609_v10  ;;  %v2178_v12 = vld [vmem:[#allocation2 + $0xc1] ss:$2 sm:$0xff] }
 0x2a4   :  { %2093 = vst.msk [vmem:[#allocation2 + $0xd0] sm:$0xff] %vm33_vm2, %v5543_v23  ;;  %v1506_v38 = vpop.f32.mrf.mxu0  ;;  %5188 = vmatmul.msk.f32.gmra.mxu1 %vm33_vm2, %v2178_v12 }
 0x2a5   :  { %5544 = vtanh.f32 %v1653_v7  ;;  %v1507_v42 = vadd.f32 %v1506_v38, %v6728_v58  ;;  %v2149_v58 = vld [vmem:[%s8043_s3 + $0x18] sm:$0xff]  ;;  %v8116_v7 = vld [vmem:[#allocation18_spill] sm:$0xff]  ;;  %v7103_v35 = vpop.f32.mrf.mxu2 }
 0x2a6   :  { %2876 = vmatpush.msra.mxu1 %v2149_v58  ;;  %v1259_v12 = vadd.f32 %v6784_v39, %v8116_v7 }
 0x2a7   :  { %v1570_v62 = vadd.f32 %v1507_v42, %v1250_v40  ;;  %v7088_v11 = vpop.f32.mrf.mxu1 }
 0x2a9   :  { %v1610_v5 = vadd.f32 %v1570_v62, %v6756_v20  ;;  %v8114_v20 = vld [vmem:[#allocation16_spill] sm:$0xff] }
 0x2aa   :  { %v1253_v9 = vadd.f32 %v6741_v51, %v8114_v20  ;;  %v8115_v51 = vld [vmem:[#allocation17_spill] sm:$0xff] }
 0x2ab   :  { %v5545_v6 = vpop.eup %5544  ;;  %v1654_v47 = vadd.f32 %v6663_v43, %v1610_v5  ;;  %v2411_v4 = vld [vmem:[#allocation2 + $0xc3] ss:$2 sm:$0xff]  ;;  %v1256_v17 = vadd.f32 %v6761_v53, %v8115_v51 }
 0x2ac   :  { %v2644_v21 = vld [vmem:[#allocation2 + $0xc5] ss:$2 sm:$0xff]  ;;  %2094 = vst.msk [vmem:[#allocation2 + $0xd8] sm:$0xff] %vm33_vm2, %v5545_v6  ;;  %v1509_v14 = vpop.f32.mrf.mxu0  ;;  %5222 = vmatmul.msk.f32.gmra.mxu2 %vm33_vm2, %v2411_v4 }
 0x2ad   :  { %5256 = vmatmul.msk.f32.gmra.mxu3 %vm33_vm2, %v2644_v21  ;;  %5546 = vtanh.f32 %v1654_v47  ;;  %v1510_v28 = vadd.f32 %v1509_v14, %v6744_v1  ;;  %v8117_v4 = vld [vmem:[#allocation19_spill] sm:$0xff]  ;;  %v7119_v14 = vpop.f32.mrf.mxu2 }
 0x2ae   :  { %v1262_v21 = vadd.f32 %v6801_v63, %v8117_v4 }
 0x2af   :  { %v1571_v49 = vadd.f32 %v1510_v28, %v1253_v9 }
 0x2b1   :  { %v1611_v16 = vadd.f32 %v1571_v49, %v6772_v32  ;;  %v7085_v32 = vpop.f32.mrf.mxu3  ;;  %v7108_v5 = vpop.f32.mrf.mxu1 }
 0x2b3   :  { %v5547_v19 = vpop.eup %5546  ;;  %v1655_v30 = vadd.f32 %v6663_v43, %v1611_v16  ;;  %v2180_v61 = vld [vmem:[#allocation2 + $0xd1] ss:$2 sm:$0xff] }
 0x2b4   :  { %2095 = vst.msk [vmem:[#allocation2 + $0xe0] sm:$0xff] %vm33_vm2, %v5547_v19  ;;  %v1512_v13 = vpop.f32.mrf.mxu0  ;;  %5189 = vmatmul.msk.f32.gmra.mxu1 %vm33_vm2, %v2180_v61 }
 0x2b5   :  { %5548 = vtanh.f32 %v1655_v30  ;;  %v1513_v1 = vadd.f32 %v1512_v13, %v6759_v2  ;;  %v5198_v2 = vld [vmem:[%s8043_s3 + $0x80] sm:$0xff]  ;;  %v7133_v61 = vpop.f32.mrf.mxu2 }
 0x2b6   :  { %3014 = vmatpush.msra.mxu2 %v5198_v2 }
 0x2b7   :  { %v1572_v55 = vadd.f32 %v1513_v1, %v1256_v17  ;;  %v5604_v1 = vld [vmem:[%s8042_s2] ss:$0 sm:$0xff] }
 0x2b9   :  { %v1612_v0 = vadd.f32 %v1572_v55, %v6789_v45  ;;  %v5232_v45 = vld [vmem:[%s8043_s3 + $0xf0] sm:$0xff]  ;;  %v7105_v41 = vpop.f32.mrf.mxu3 }
 0x2ba   :  { %3151 = vmatpush.msra.mxu3 %v5232_v45 }
 0x2bb   :  { %v5549_v3 = vpop.eup %5548  ;;  %v1656_v56 = vadd.f32 %v6663_v43, %v1612_v0  ;;  %v2413_v10 = vld [vmem:[#allocation2 + $0xd3] ss:$2 sm:$0xff] }
 0x2bc   :  { %v2646_v23 = vld [vmem:[#allocation2 + $0xd5] ss:$2 sm:$0xff]  ;;  %2096 = vst.msk [vmem:[#allocation2 + $0xe8] sm:$0xff] %vm33_vm2, %v5549_v3  ;;  %v1515_v53 = vpop.f32.mrf.mxu0  ;;  %5223 = vmatmul.msk.f32.gmra.mxu2 %vm33_vm2, %v2413_v10 }
 0x2bd   :  { %5257 = vmatmul.msk.f32.gmra.mxu3 %vm33_vm2, %v2646_v23  ;;  %5550 = vtanh.f32 %v1656_v56  ;;  %v1516_v38 = vadd.f32 %v1515_v53, %v6775_v15  ;;  %v2148_v15 = vld [vmem:[%s8043_s3 + $0x10] sm:$0xff]  ;;  %v5197_v10 = vld [vmem:[%s8043_s3 + $0x78] sm:$0xff]  ;;  %v5231_v23 = vld [vmem:[%s8043_s3 + $0xe8] sm:$0xff]  ;;  %v7157_v2 = vpop.f32.mrf.mxu2 }
 0x2be   :  { %2877 = vmatpush.msra.mxu1 %v2148_v15  ;;  %v5326_v53 = vld [vmem:[%s8045_s5 + $0x30] sm:$0xff]  ;;  %3015 = vmatpush.msra.mxu2 %v5197_v10 }
 0x2bf   :  { %v1573_v40 = vadd.f32 %v1516_v38, %v1259_v12  ;;  %3152 = vmatpush.msra.mxu3 %v5231_v23  ;;  %3574 = vmatpush.msra.mxu0 %v5326_v53 }
 0x2c1   :  { %v1613_v42 = vadd.f32 %v1573_v40, %v6805_v25  ;;  %v7121_v34 = vpop.f32.mrf.mxu3  ;;  %v7124_v28 = vpop.f32.mrf.mxu1 }
 0x2c3   :  { %v5551_v62 = vpop.eup %5550  ;;  %v1657_v6 = vadd.f32 %v6663_v43, %v1613_v42  ;;  %v2182_v47 = vld [vmem:[#allocation2 + $0xe1] ss:$2 sm:$0xff] }
 0x2c4   :  { %2097 = vst.msk [vmem:[#allocation2 + $0xf0] sm:$0xff] %vm33_vm2, %v5551_v62  ;;  %v1518_v39 = vpop.f32.mrf.mxu0  ;;  %5190 = vmatmul.msk.f32.gmra.mxu1 %vm33_vm2, %v2182_v47 }
 0x2c5   :  { %5552 = vtanh.f32 %v1657_v6  ;;  %v1519_v25 = vadd.f32 %v1518_v39, %v6792_v27  ;;  %v8118_v27 = vld [vmem:[#allocation20_spill] sm:$0xff]  ;;  %v8120_v6 = vld [vmem:[#allocation25_spill] sm:$0xff] }
 0x2c6   :  { %v1265_v30 = vadd.f32 %v6822_v8, %v8118_v27  ;;  %v1271_v47 = vadd.f32 %v6864_v50, %v8120_v6  ;;  %v5230_v50 = vld [vmem:[%s8043_s3 + $0xe0] sm:$0xff] }
 0x2c7   :  { %v1574_v58 = vadd.f32 %v1519_v25, %v1262_v21  ;;  %v5196_v21 = vld [vmem:[%s8043_s3 + $0x70] sm:$0xff]  ;;  %3153 = vmatpush.msra.mxu3 %v5230_v50  ;;  %v2107_v6 = vld [vmem:[#allocation2] ss:$2 sm:$0xff] }
 0x2c8   :  { %3016 = vmatpush.msra.mxu2 %v5196_v21  ;;  %v2572_v21 = vld [vmem:[#allocation2 + $0x4] ss:$2 sm:$0xff] }
 0x2c9   :  { %v1614_v20 = vadd.f32 %v1574_v58, %v6820_v36  ;;  %v7135_v13 = vpop.f32.mrf.mxu3  ;;  %v2111_v50 = vld [vmem:[#allocation2 + $0x20] ss:$2 sm:$0xff] }
 0x2cb   :  { %v5553_v9 = vpop.eup %5552  ;;  %v1658_v49 = vadd.f32 %v6663_v43, %v1614_v20  ;;  %v2415_v16 = vld [vmem:[#allocation2 + $0xe3] ss:$2 sm:$0xff] }
 0x2cc   :  { %v2648_v19 = vld [vmem:[#allocation2 + $0xe5] ss:$2 sm:$0xff]  ;;  %2098 = vst.msk [vmem:[#allocation2 + $0xf8] sm:$0xff] %vm33_vm2, %v5553_v9  ;;  %v1521_v63 = vpop.f32.mrf.mxu0  ;;  %5224 = vmatmul.msk.f32.gmra.mxu2 %vm33_vm2, %v2415_v16  ;;  %v8121_v16 = vld [vmem:[#allocation28_spill] sm:$0xff] }
 0x2cd   :  { %5258 = vmatmul.msk.f32.gmra.mxu3 %vm33_vm2, %v2648_v19  ;;  %5554 = vtanh.f32 %v1658_v49  ;;  %v1522_v36 = vadd.f32 %v1521_v63, %v6808_v29  ;;  %v8119_v29 = vld [vmem:[#allocation23_spill] sm:$0xff]  ;;  %v1274_v19 = vadd.f32 %v6882_v46, %v8121_v16 }
 0x2ce   :  { %v1268_v56 = vadd.f32 %v6841_v24, %v8119_v29  ;;  %v2576_v16 = vld [vmem:[#allocation2 + $0x24] ss:$2 sm:$0xff] }
 0x2cf   :  { %v1575_v43 = vadd.f32 %v1522_v36, %v1265_v30  ;;  %v2146_v36 = vld [vmem:[%s8043_s3] sm:$0xff] }
 0x2d1   :  { %v1615_v51 = vadd.f32 %v1575_v43, %v6836_v22  ;;  %v7141_v0 = vpop.f32.mrf.mxu1  ;;  %v7159_v45 = vpop.f32.mrf.mxu3 }
 0x2d3   :  { %v5555_v17 = vpop.eup %5554  ;;  %v1659_v55 = vadd.f32 %v5604_v1, %v1615_v51  ;;  %v2184_v3 = vld [vmem:[#allocation2 + $0xf1] ss:$2 sm:$0xff] }
 0x2d4   :  { %2099 = vst.msk [vmem:[#allocation2 + $0x100] sm:$0xff] %vm33_vm2, %v5555_v17  ;;  %v1524_v8 = vpop.f32.mrf.mxu0  ;;  %5191 = vmatmul.msk.f32.gmra.mxu1 %vm33_vm2, %v2184_v3 }
 0x2d5   :  { %5556 = vtanh.f32 %v1659_v55  ;;  %v1525_v22 = vadd.f32 %v1524_v8, %v6825_v48  ;;  %v2147_v48 = vld [vmem:[%s8043_s3 + $0x8] sm:$0xff] }
 0x2d6   :  { %2878 = vmatpush.msra.mxu1 %v2147_v48 }
 0x2d7   :  { %v1576_v24 = vadd.f32 %v1525_v22, %v1268_v56 }
 0x2d8   :  { %2879 = vmatpush.msra.mxu1 %v2146_v36  ;;  %v2117_v36 = vld [vmem:[#allocation2 + $0x50] ss:$2 sm:$0xff] }
 0x2d9   :  { %v1616_v7 = vadd.f32 %v1576_v24, %v6853_v57  ;;  %v7173_v57 = vpop.f32.mrf.mxu2  ;;  %v7175_v4 = vpop.f32.mrf.mxu3 }
 0x2da   :  { %v7170_v39 = vpop.f32.mrf.mxu1 }
 0x2db   :  { %v5557_v12 = vpop.eup %5556  ;;  %v1660_v38 = vadd.f32 %v5604_v1, %v1616_v7  ;;  %v2417_v40 = vld [vmem:[#allocation2 + $0xf3] ss:$2 sm:$0xff] }
 0x2dc   :  { %v2650_v42 = vld [vmem:[#allocation2 + $0xf5] ss:$2 sm:$0xff]  ;;  %2100 = vst.msk [vmem:[#allocation2 + $0x108] sm:$0xff] %vm33_vm2, %v5557_v12  ;;  %v1527_v62 = vpop.f32.mrf.mxu0  ;;  %5225 = vmatmul.msk.f32.gmra.mxu2 %vm33_vm2, %v2417_v40 }
 0x2dd   :  { %5259 = vmatmul.msk.f32.gmra.mxu3 %vm33_vm2, %v2650_v42  ;;  %5558 = vtanh.f32 %v1660_v38  ;;  %v1528_v15 = vadd.f32 %v1527_v62, %v6839_v59  ;;  %v2192_v12 = vld [vmem:[#allocation2 + $0x131] ss:$2 sm:$0xff] }
 0x2de   :  { %v2425_v42 = vld [vmem:[#allocation2 + $0x133] ss:$2 sm:$0xff] }
 0x2df   :  { %v1577_v25 = vadd.f32 %v1528_v15, %v1271_v47  ;;  %v2658_v62 = vld [vmem:[#allocation2 + $0x135] ss:$2 sm:$0xff]  ;;  %v2109_v47 = vld [vmem:[#allocation2 + $0x10] ss:$2 sm:$0xff] }
 0x2e0   :  { %v2339_v15 = vld [vmem:[#allocation2 + $0x2] ss:$2 sm:$0xff] }
 0x2e1   :  { %v1617_v58 = vadd.f32 %v1577_v25, %v6869_v37  ;;  %v7189_v27 = vpop.f32.mrf.mxu2  ;;  %v7191_v30 = vpop.f32.mrf.mxu3  ;;  %v5325_v25 = vld [vmem:[%s8045_s5 + $0x28] sm:$0xff] }
 0x2e2   :  { %v2305_v37 = vpop.f32.mrf.mxu1  ;;  %3575 = vmatpush.msra.mxu0 %v5325_v25 }
 0x2e3   :  { %v5559_v20 = vpop.eup %5558  ;;  %v1661_v9 = vadd.f32 %v5604_v1, %v1617_v58  ;;  %v2186_v59 = vld [vmem:[#allocation2 + $0x101] ss:$2 sm:$0xff]  ;;  %v3501_v58 = vld [vmem:[%s8045_s5 + $0x18] sm:$0xf] }
 0x2e4   :  { %2101 = vst.msk [vmem:[#allocation2 + $0x110] sm:$0xff] %vm33_vm2, %v5559_v20  ;;  %v1530_v49 = vpop.f32.mrf.mxu0  ;;  %5192 = vmatmul.msk.f32.gmra.mxu1 %vm33_vm2, %v2186_v59  ;;  %v2341_v20 = vld [vmem:[#allocation2 + $0x12] ss:$2 sm:$0xff] }
 0x2e5   :  { %5560 = vtanh.f32 %v1661_v9  ;;  %v1531_v63 = vadd.f32 %v1530_v49, %v6856_v52  ;;  %v1743_v52 = vadd.s32 288, %v6689_v18  ;;  %5339 = vmatpush.msk.msrb.mxu1 %vm3557_vm6, %v3501_v58  ;;  %v2574_v9 = vld [vmem:[#allocation2 + $0x14] ss:$2 sm:$0xff]  ;;  %vm3906_vm6 = vcmask 113664  }
 0x2e6   :  { %v2113_v59 = vld [vmem:[#allocation2 + $0x30] ss:$2 sm:$0xff] }
 0x2e7   :  { %v1578_v43 = vadd.f32 %v1531_v63, %v1274_v19  ;;  %vm1943_vm7 = vcmp.lt.s32.totalorder %v1743_v52, 293  ;;  %v2343_v49 = vld [vmem:[#allocation2 + $0x22] ss:$2 sm:$0xff]  ;;  %v2345_v63 = vld [vmem:[#allocation2 + $0x32] ss:$2 sm:$0xff] }
 0x2e8   :  { %v2115_v19 = vld [vmem:[#allocation2 + $0x40] ss:$2 sm:$0xff] }
 0x2e9   :  { %v1618_v51 = vadd.f32 %v1578_v43, %v6885_v44  ;;  %v7201_v8 = vpop.f32.mrf.mxu2  ;;  %v7203_v29 = vpop.f32.mrf.mxu3  ;;  %v2578_v37 = vld [vmem:[#allocation2 + $0x34] ss:$2 sm:$0xff] }
 0x2ea   :  { %v2347_v43 = vld [vmem:[#allocation2 + $0x42] ss:$2 sm:$0xff] }
 0x2eb   :  { %v5561_v17 = vpop.eup %5560  ;;  %v1662_v55 = vadd.f32 %v5604_v1, %v1618_v51  ;;  %v2419_v3 = vld [vmem:[#allocation2 + $0x103] ss:$2 sm:$0xff]  ;;  %v2580_v51 = vld [vmem:[#allocation2 + $0x44] ss:$2 sm:$0xff] }
 0x2ec   :  { %v2652_v46 = vld [vmem:[#allocation2 + $0x105] ss:$2 sm:$0xff]  ;;  %2102 = vst.msk [vmem:[#allocation2 + $0x118] sm:$0xff] %vm33_vm2, %v5561_v17  ;;  %5226 = vmatmul.msk.f32.gmra.mxu2 %vm33_vm2, %v2419_v3  ;;  %v2349_v3 = vld [vmem:[#allocation2 + $0x52] ss:$2 sm:$0xff] }
 0x2ed   :  { %5260 = vmatmul.msk.f32.gmra.mxu3 %vm33_vm2, %v2652_v46  ;;  %5562 = vtanh.f32 %v1662_v55  ;;  %v2119_v55 = vld [vmem:[#allocation2 + $0x60] ss:$2 sm:$0xff] }
 0x2ee   :  { %v2582_v46 = vld [vmem:[#allocation2 + $0x54] ss:$2 sm:$0xff] }
 0x2f1   :  { %v7207_v1 = vpop.f32.mrf.mxu2  ;;  %v7209_v10 = vpop.f32.mrf.mxu3 }
 0x2f3   :  { %v5563_v56 = vpop.eup %5562  ;;  %v2188_v44 = vld [vmem:[#allocation2 + $0x111] ss:$2 sm:$0xff] }
 0x2f4   :  { %v2063_v22 = vsel %vm1943_vm7, %v5563_v56, 0.0  ;;  %5193 = vmatmul.msk.f32.gmra.mxu1 %vm33_vm2, %v2188_v44  ;;  %v3500_v56 = vld [vmem:[%s8045_s5 + $0x10] sm:$0xff] }
 0x2f5   :  { %2103 = vst.msk [vmem:[#allocation2 + $0x120] sm:$0xff] %vm33_vm2, %v2063_v22  ;;  %3654 = vmatpush.msrb.mxu1 %v3500_v56  ;;  %v2121_v44 = vld [vmem:[#allocation2 + $0x70] ss:$2 sm:$0xff] }
 0x2f6   :  { %v2351_v22 = vld [vmem:[#allocation2 + $0x62] ss:$2 sm:$0xff]  ;;  %v2361_v56 = vld [vmem:[#allocation2 + $0xb2] ss:$2 sm:$0xff] }
 0x2fc   :  { %v2190_v23 = vld [vmem:[#allocation2 + $0x121] ss:$2 sm:$0xff] }
 0x2fd   :  { %v2421_v53 = vld [vmem:[#allocation2 + $0x113] ss:$2 sm:$0xff]  ;;  %5194 = vmatmul.msk.f32.gmra.mxu1 %vm33_vm2, %v2190_v23  ;;  %v2423_v38 = vld [vmem:[#allocation2 + $0x123] ss:$2 sm:$0xff]  ;;  %v2584_v23 = vld [vmem:[#allocation2 + $0x64] ss:$2 sm:$0xff] }
 0x2fe   :  { %v2654_v48 = vld [vmem:[#allocation2 + $0x115] ss:$2 sm:$0xff]  ;;  %5227 = vmatmul.msk.f32.gmra.mxu2 %vm33_vm2, %v2421_v53  ;;  %v2656_v40 = vld [vmem:[#allocation2 + $0x125] ss:$2 sm:$0xff] }
 0x2ff   :  { %5261 = vmatmul.msk.f32.gmra.mxu3 %vm33_vm2, %v2654_v48 }
 0x300   :  { %v2538_v24 = vpop.f32.mrf.mxu2 }
 0x301   :  { %v2771_v7 = vpop.f32.mrf.mxu3  ;;  %v7242_v17 = vpop.f32.mrf.mxu1 }
 0x302   :  { %v2123_v7 = vld [vmem:[#allocation2 + $0x80] ss:$2 sm:$0xff] }
 0x305   :  { %5195 = vmatmul.msk.f32.gmra.mxu1 %vm33_vm2, %v2192_v12  ;;  %v2353_v12 = vld [vmem:[#allocation2 + $0x72] ss:$2 sm:$0xff] }
 0x306   :  { %5228 = vmatmul.msk.f32.gmra.mxu2 %vm33_vm2, %v2423_v38  ;;  %v2586_v38 = vld [vmem:[#allocation2 + $0x74] ss:$2 sm:$0xff] }
 0x307   :  { %5262 = vmatmul.msk.f32.gmra.mxu3 %vm33_vm2, %v2656_v40 }
 0x30d   :  { %5264 = vmatmul.msk.f32.vlgmr.msra.gmra.mxu1 %vm33_vm2, %v2107_v6  ;;  %v2125_v6 = vld [vmem:[#allocation2 + $0x90] ss:$2 sm:$0xff] }
 0x30e   :  { %5229 = vmatmul.msk.f32.gmra.mxu2 %vm33_vm2, %v2425_v42 }
 0x30f   :  { %5263 = vmatmul.msk.f32.gmra.mxu3 %vm33_vm2, %v2658_v62  ;;  %v7255_v53 = vpop.f32.mrf.mxu2 }
 0x310   :  { %v7257_v48 = vpop.f32.mrf.mxu3 }
 0x311   :  { %v7247_v52 = vpop.f32.mrf.mxu1 }
 0x315   :  { %5265 = vmatmul.msk.f32.gmra.mxu1 %vm33_vm2, %v2109_v47  ;;  %v2355_v47 = vld [vmem:[#allocation2 + $0x82] ss:$2 sm:$0xff] }
 0x316   :  { %5284 = vmatmul.msk.f32.vlgmr.msra.gmra.mxu2 %vm33_vm2, %v2339_v15  ;;  %v2588_v15 = vld [vmem:[#allocation2 + $0x84] ss:$2 sm:$0xff] }
 0x317   :  { %5304 = vmatmul.msk.f32.vlgmr.msra.gmra.mxu3 %vm33_vm2, %v2572_v21 }
 0x31d   :  { %5266 = vmatmul.msk.f32.gmra.mxu1 %vm33_vm2, %v2111_v50  ;;  %v2127_v50 = vld [vmem:[#allocation2 + $0xa0] ss:$2 sm:$0xff] }
 0x31e   :  { %5285 = vmatmul.msk.f32.gmra.mxu2 %vm33_vm2, %v2341_v20  ;;  %v2357_v20 = vld [vmem:[#allocation2 + $0x92] ss:$2 sm:$0xff] }
 0x31f   :  { %5305 = vmatmul.msk.f32.gmra.mxu3 %vm33_vm2, %v2574_v9  ;;  %v7264_v40 = vpop.f32.mrf.mxu2  ;;  %v2590_v9 = vld [vmem:[#allocation2 + $0x94] ss:$2 sm:$0xff] }
 0x320   :  { %v7266_v42 = vpop.f32.mrf.mxu3 }
 0x321   :  { %v7259_v24 = vpop.f32.mrf.mxu1 }
 0x325   :  { %5267 = vmatmul.msk.f32.gmra.mxu1 %vm33_vm2, %v2113_v59 }
 0x326   :  { %5286 = vmatmul.msk.f32.gmra.mxu2 %vm33_vm2, %v2343_v49 }
 0x327   :  { %5306 = vmatmul.msk.f32.gmra.mxu3 %vm33_vm2, %v2576_v16 }
 0x32d   :  { %5268 = vmatmul.msk.f32.gmra.mxu1 %vm33_vm2, %v2115_v19  ;;  %v2129_v19 = vld [vmem:[#allocation2 + $0xb0] ss:$2 sm:$0xff] }
 0x32e   :  { %5287 = vmatmul.msk.f32.gmra.mxu2 %vm33_vm2, %v2345_v63  ;;  %v2359_v63 = vld [vmem:[#allocation2 + $0xa2] ss:$2 sm:$0xff] }
 0x32f   :  { %5307 = vmatmul.msk.f32.gmra.mxu3 %vm33_vm2, %v2578_v37  ;;  %v7273_v21 = vpop.f32.mrf.mxu2  ;;  %v2592_v37 = vld [vmem:[#allocation2 + $0xa4] ss:$2 sm:$0xff] }
 0x330   :  { %v7275_v25 = vpop.f32.mrf.mxu3 }
 0x331   :  { %v7268_v62 = vpop.f32.mrf.mxu1 }
 0x335   :  { %5269 = vmatmul.msk.f32.gmra.mxu1 %vm33_vm2, %v2117_v36 }
 0x336   :  { %5288 = vmatmul.msk.f32.gmra.mxu2 %vm33_vm2, %v2347_v43 }
 0x337   :  { %5308 = vmatmul.msk.f32.gmra.mxu3 %vm33_vm2, %v2580_v51 }
 0x33d   :  { %5270 = vmatmul.msk.f32.gmra.mxu1 %vm33_vm2, %v2119_v55  ;;  %v5324_v55 = vld [vmem:[%s8045_s5 + $0x20] sm:$0xff] }
 0x33e   :  { %5289 = vmatmul.msk.f32.gmra.mxu2 %vm33_vm2, %v2349_v3  ;;  %v3499_v3 = vld [vmem:[%s8045_s5 + $0x8] sm:$0xff]  ;;  %3576 = vmatpush.msra.mxu0 %v5324_v55 }
 0x33f   :  { %5309 = vmatmul.msk.f32.gmra.mxu3 %vm33_vm2, %v2582_v46  ;;  %v7282_v59 = vpop.f32.mrf.mxu2  ;;  %v2131_v46 = vld [vmem:[#allocation2 + $0xc0] ss:$2 sm:$0xff]  ;;  %3655 = vmatpush.msrb.mxu1 %v3499_v3 }
 0x340   :  { %v7284_v49 = vpop.f32.mrf.mxu3 }
 0x341   :  { %v7277_v58 = vpop.f32.mrf.mxu1 }
 0x345   :  { %5271 = vmatmul.msk.f32.gmra.mxu1 %vm33_vm2, %v2121_v44  ;;  %v2594_v44 = vld [vmem:[#allocation2 + $0xb4] ss:$2 sm:$0xff] }
 0x346   :  { %5290 = vmatmul.msk.f32.gmra.mxu2 %vm33_vm2, %v2351_v22 }
 0x347   :  { %5310 = vmatmul.msk.f32.gmra.mxu3 %vm33_vm2, %v2584_v23 }
 0x34d   :  { %5272 = vmatmul.msk.f32.gmra.mxu1 %vm33_vm2, %v2123_v7 }
 0x34e   :  { %5291 = vmatmul.msk.f32.gmra.mxu2 %vm33_vm2, %v2353_v12  ;;  %v2133_v12 = vld [vmem:[#allocation2 + $0xd0] ss:$2 sm:$0xff] }
 0x34f   :  { %5311 = vmatmul.msk.f32.gmra.mxu3 %vm33_vm2, %v2586_v38  ;;  %v7291_v36 = vpop.f32.mrf.mxu2  ;;  %v2363_v38 = vld [vmem:[#allocation2 + $0xc2] ss:$2 sm:$0xff] }
 0x350   :  { %v7293_v43 = vpop.f32.mrf.mxu3 }
 0x351   :  { %v7286_v16 = vpop.f32.mrf.mxu1 }
 0x355   :  { %5273 = vmatmul.msk.f32.gmra.mxu1 %vm33_vm2, %v2125_v6  ;;  %v2596_v6 = vld [vmem:[#allocation2 + $0xc4] ss:$2 sm:$0xff] }
 0x356   :  { %5292 = vmatmul.msk.f32.gmra.mxu2 %vm33_vm2, %v2355_v47 }
 0x357   :  { %5312 = vmatmul.msk.f32.gmra.mxu3 %vm33_vm2, %v2588_v15 }
 0x35d   :  { %5274 = vmatmul.msk.f32.gmra.mxu1 %vm33_vm2, %v2127_v50 }
 0x35e   :  { %5293 = vmatmul.msk.f32.gmra.mxu2 %vm33_vm2, %v2357_v20  ;;  %v2135_v20 = vld [vmem:[#allocation2 + $0xe0] ss:$2 sm:$0xff] }
 0x35f   :  { %5313 = vmatmul.msk.f32.gmra.mxu3 %vm33_vm2, %v2590_v9  ;;  %v7306_v22 = vpop.f32.mrf.mxu2  ;;  %v2365_v9 = vld [vmem:[#allocation2 + $0xd2] ss:$2 sm:$0xff] }
 0x360   :  { %v7308_v23 = vpop.f32.mrf.mxu3 }
 0x361   :  { %v7295_v51 = vpop.f32.mrf.mxu1 }
 0x365   :  { %5275 = vmatmul.msk.f32.gmra.mxu1 %vm33_vm2, %v2129_v19  ;;  %v2598_v19 = vld [vmem:[#allocation2 + $0xd4] ss:$2 sm:$0xff] }
 0x366   :  { %5294 = vmatmul.msk.f32.gmra.mxu2 %vm33_vm2, %v2359_v63  ;;  %v419_v63 = vld [vmem:[%s8040_s0 + $0x12a] sm:$0xff] }
 0x367   :  { %5314 = vmatmul.msk.f32.gmra.mxu3 %vm33_vm2, %v2592_v37  ;;  %5166 = vmatmul.msk.f32.gmra.mxu0 %vm124_vm0, %v419_v63  ;;  %v2602_v63 = vld [vmem:[#allocation2 + $0xf4] ss:$2 sm:$0xff] }
 0x36d   :  { %5276 = vmatmul.msk.f32.gmra.mxu1 %vm33_vm2, %v2131_v46  ;;  %v2137_v46 = vld [vmem:[#allocation2 + $0xf0] ss:$2 sm:$0xff] }
 0x36e   :  { %5295 = vmatmul.msk.f32.gmra.mxu2 %vm33_vm2, %v2361_v56  ;;  %v2367_v56 = vld [vmem:[#allocation2 + $0xe2] ss:$2 sm:$0xff] }
 0x36f   :  { %5315 = vmatmul.msk.f32.gmra.mxu3 %vm33_vm2, %v2594_v44  ;;  %v7315_v47 = vpop.f32.mrf.mxu2  ;;  %v2600_v44 = vld [vmem:[#allocation2 + $0xe4] ss:$2 sm:$0xff] }
 0x370   :  { %v7317_v15 = vpop.f32.mrf.mxu3 }
 0x371   :  { %v7310_v7 = vpop.f32.mrf.mxu1 }
 0x372   :  { %8122 = vst [vmem:[#allocation22_spill] sm:$0xff] %v7310_v7 }
 0x375   :  { %5277 = vmatmul.msk.f32.gmra.mxu1 %vm33_vm2, %v2133_v12  ;;  %v420_v12 = vld [vmem:[%s8040_s0 + $0x132] sm:$0xff] }
 0x376   :  { %5296 = vmatmul.msk.f32.gmra.mxu2 %vm33_vm2, %v2363_v38  ;;  %5167 = vmatmul.msk.f32.gmra.mxu0 %vm124_vm0, %v420_v12  ;;  %v2141_v12 = vld [vmem:[#allocation2 + $0x110] ss:$2 sm:$0xff] }
 0x377   :  { %5316 = vmatmul.msk.f32.gmra.mxu3 %vm33_vm2, %v2596_v6 }
 0x37a   :  { %v7319_v50 = vpop.f32.mrf.mxu1 }
 0x37b   :  { %8123 = vst [vmem:[#allocation7_spill] sm:$0xff] %v7319_v50 }
 0x37d   :  { %5278 = vmatmul.msk.f32.gmra.mxu1 %vm33_vm2, %v2135_v20 }
 0x37e   :  { %5297 = vmatmul.msk.f32.gmra.mxu2 %vm33_vm2, %v2365_v9  ;;  %v2139_v9 = vld [vmem:[#allocation2 + $0x100] ss:$2 sm:$0xff] }
 0x37f   :  { %5317 = vmatmul.msk.f32.gmra.mxu3 %vm33_vm2, %v2598_v19  ;;  %v2369_v19 = vld [vmem:[#allocation2 + $0xf2] ss:$2 sm:$0xff] }
 0x381   :  { %v7328_v37 = vpop.f32.mrf.mxu2 }
 0x382   :  { %8124 = vst [vmem:[#allocation21_spill] sm:$0xff] %v7328_v37  ;;  %v7330_v55 = vpop.f32.mrf.mxu3  ;;  %v2335_v3 = vpop.f32.mrf.mxu1  ;;  %v2373_v37 = vld [vmem:[#allocation2 + $0x112] ss:$2 sm:$0xff] }
 0x383   :  { %8125 = vst [vmem:[#allocation26_spill] sm:$0xff] %v7330_v55  ;;  %v421_v3 = vld [vmem:[%s8040_s0 + $0x13a] sm:$0xff] }
 0x384   :  { %5168 = vmatmul.msk.f32.gmra.mxu0 %vm124_vm0, %v421_v3 }
 0x385   :  { %5279 = vmatmul.msk.f32.gmra.mxu1 %vm33_vm2, %v2137_v46 }
 0x386   :  { %5298 = vmatmul.msk.f32.gmra.mxu2 %vm33_vm2, %v2367_v56 }
 0x387   :  { %5318 = vmatmul.msk.f32.gmra.mxu3 %vm33_vm2, %v2600_v44 }
 0x389   :  { %v7339_v38 = vpop.f32.mrf.mxu2 }
 0x38a   :  { %8126 = vst [vmem:[#allocation31_spill] sm:$0xff] %v7339_v38  ;;  %v7341_v6 = vpop.f32.mrf.mxu3  ;;  %v2881_v20 = vpop.f32.mrf.mxu1 }
 0x38b   :  { %8127 = vst [vmem:[#allocation8_spill] sm:$0xff] %v7341_v6  ;;  %v2371_v6 = vld [vmem:[#allocation2 + $0x102] ss:$2 sm:$0xff]  ;;  %v2882_v3 = vadd.f32 %v2881_v20, %v7037_v33 }
 0x38c   :  { %v2606_v33 = vld [vmem:[#allocation2 + $0x114] ss:$2 sm:$0xff] }
 0x38d   :  { %5280 = vmatmul.msk.f32.gmra.mxu1 %vm33_vm2, %v2139_v9  ;;  %v3498_v9 = vld [vmem:[%s8045_s5] sm:$0xff]  ;;  %s4948_s5 = sshll.u32 %s8049_s9, 4  ;;  %s4949_s5 = int_to_ptr.hbm [resolvable:$true] %s4948_s5 }
 0x38e   :  { %5299 = vmatmul.msk.f32.gmra.mxu2 %vm33_vm2, %v2369_v19  ;;  %v2604_v19 = vld [vmem:[#allocation2 + $0x104] ss:$2 sm:$0xff]  ;;  %3656 = vmatpush.msrb.mxu1 %v3498_v9 }
 0x38f   :  { %5319 = vmatmul.msk.f32.gmra.mxu3 %vm33_vm2, %v2602_v63 }
 0x391   :  { %v2568_v46 = vpop.f32.mrf.mxu2 }
 0x392   :  { %v2801_v56 = vpop.f32.mrf.mxu3  ;;  %v2884_v44 = vpop.f32.mrf.mxu1 }
 0x393   :  { %v2885_v20 = vadd.f32 %v2884_v44, %v7047_v26 }
 0x395   :  { %5281 = vmatmul.msk.f32.gmra.mxu1 %vm33_vm2, %v2141_v12  ;;  %v7362_v12 = vld [vmem:[%s8044_s4] ss:$0 sm:$0xff] }
 0x396   :  { %5300 = vmatmul.msk.f32.gmra.mxu2 %vm33_vm2, %v2371_v6  ;;  %v2143_v6 = vld [vmem:[#allocation2 + $0x120] ss:$2 sm:$0xff] }
 0x397   :  { %5320 = vmatmul.msk.f32.gmra.mxu3 %vm33_vm2, %v2604_v19 }
 0x399   :  { %v3018_v63 = vpop.f32.mrf.mxu2 }
 0x39a   :  { %v3019_v46 = vadd.f32 %v3018_v63, %v7083_v60  ;;  %v3155_v56 = vpop.f32.mrf.mxu3  ;;  %v2887_v38 = vpop.f32.mrf.mxu1 }
 0x39b   :  { %v3156_v55 = vadd.f32 %v3155_v56, %v7085_v32  ;;  %v2375_v56 = vld [vmem:[#allocation2 + $0x122] ss:$2 sm:$0xff]  ;;  %v2888_v44 = vadd.f32 %v2887_v38, %v7059_v54 }
 0x39c   :  { %v3215_v50 = vadd.f32 %v3019_v46, %v2882_v3 }
 0x39d   :  { %5282 = vmatmul.msk.f32.gmra.mxu1 %vm33_vm2, %v2143_v6 }
 0x39e   :  { %v3235_v7 = vadd.f32 %v3215_v50, %v3156_v55  ;;  %5301 = vmatmul.msk.f32.gmra.mxu2 %vm33_vm2, %v2373_v37  ;;  %v2145_v50 = vld [vmem:[#allocation2 + $0x130] ss:$2 sm:$0xff] }
 0x39f   :  { %5321 = vmatmul.msk.f32.gmra.mxu3 %vm33_vm2, %v2606_v33 }
 0x3a0   :  { %v3259_v60 = vadd.f32 %v7362_v12, %v3235_v7  ;;  %v2608_v7 = vld [vmem:[#allocation2 + $0x124] ss:$2 sm:$0xff] }
 0x3a1   :  { %v3021_v32 = vpop.f32.mrf.mxu2 }
 0x3a2   :  { %v3279_v9 = vmax.f32 %v3259_v60, 0.0  ;;  %v3022_v19 = vadd.f32 %v3021_v32, %v7103_v35  ;;  %v3158_v63 = vpop.f32.mrf.mxu3  ;;  %v2890_v3 = vpop.f32.mrf.mxu1 }
 0x3a3   :  { %v3159_v37 = vadd.f32 %v3158_v63, %v7105_v41 }
 0x3a4   :  { %v3439_v55 = vsel %vm3299_vm8, %v3279_v9, 0.0  ;;  %v3216_v46 = vadd.f32 %v3022_v19, %v2885_v20 }
 0x3a5   :  { %3459 = vst.msk [vmem:[#allocation3] sm:$0xff] %vm35_vm3, %v3439_v55  ;;  %5283 = vmatmul.msk.f32.gmra.mxu1 %vm33_vm2, %v2145_v50  ;;  %v2891_v55 = vadd.f32 %v2890_v3, %v7075_v31 }
 0x3a6   :  { %v3236_v6 = vadd.f32 %v3216_v46, %v3159_v37  ;;  %5302 = vmatmul.msk.f32.gmra.mxu2 %vm33_vm2, %v2375_v56 }
 0x3a7   :  { %5322 = vmatmul.msk.f32.gmra.mxu3 %vm33_vm2, %v2608_v7 }
 0x3a8   :  { %v3260_v26 = vadd.f32 %v7362_v12, %v3236_v6 }
 0x3a9   :  { %v3024_v35 = vpop.f32.mrf.mxu2 }
 0x3aa   :  { %v3280_v33 = vmax.f32 %v3260_v26, 0.0  ;;  %v3025_v60 = vadd.f32 %v3024_v35, %v7119_v14  ;;  %v3161_v41 = vpop.f32.mrf.mxu3  ;;  %v2893_v32 = vpop.f32.mrf.mxu1 }
 0x3ab   :  { %v3162_v9 = vadd.f32 %v3161_v41, %v7121_v34  ;;  %v2894_v3 = vadd.f32 %v2893_v32, %v7088_v11 }
 0x3ac   :  { %3460 = vst.msk [vmem:[#allocation3 + $0x8] sm:$0xff] %vm35_vm3, %v3280_v33  ;;  %v3217_v20 = vadd.f32 %v3025_v60, %v2888_v44 }
 0x3ae   :  { %v3237_v19 = vadd.f32 %v3217_v20, %v3162_v9 }
 0x3b0   :  { %v3261_v63 = vadd.f32 %v7362_v12, %v3237_v19 }
 0x3b1   :  { %v3027_v50 = vpop.f32.mrf.mxu2 }
 0x3b2   :  { %v3281_v46 = vmax.f32 %v3261_v63, 0.0  ;;  %v3028_v37 = vadd.f32 %v3027_v50, %v7133_v61  ;;  %v3164_v54 = vpop.f32.mrf.mxu3  ;;  %v2896_v38 = vpop.f32.mrf.mxu1 }
 0x3b3   :  { %v3503_v56 = vld [vmem:[#allocation3 + $0x1] ss:$2 sm:$0xff]  ;;  %v3479_v14 = vld [vmem:[#allocation3] ss:$2 sm:$0xff]  ;;  %v3165_v7 = vadd.f32 %v3164_v54, %v7135_v13  ;;  %v2897_v19 = vadd.f32 %v2896_v38, %v7108_v5 }
 0x3b4   :  { %3461 = vst.msk [vmem:[#allocation3 + $0x10] sm:$0xff] %vm35_vm3, %v3281_v46  ;;  %v3218_v6 = vadd.f32 %v3028_v37, %v2891_v55  ;;  %5329 = vmatmul.msk.f32.vlgmr.msra.gmra.mxu0 %vm35_vm3, %v3503_v56  ;;  %5340 = vmatmul.msk.f32.vlgmr.msrb.gmra.mxu1 %vm35_vm3, %v3479_v14 }
 0x3b6   :  { %v3238_v34 = vadd.f32 %v3218_v6, %v3165_v7 }
 0x3b8   :  { %v3262_v26 = vadd.f32 %v7362_v12, %v3238_v34 }
 0x3b9   :  { %v3030_v31 = vpop.f32.mrf.mxu2 }
 0x3ba   :  { %v3282_v61 = vmax.f32 %v3262_v26, 0.0  ;;  %v3031_v35 = vadd.f32 %v3030_v31, %v7157_v2  ;;  %v3167_v44 = vpop.f32.mrf.mxu3  ;;  %v2899_v33 = vpop.f32.mrf.mxu1 }
 0x3bb   :  { %v3168_v13 = vadd.f32 %v3167_v44, %v7159_v45  ;;  %v2900_v38 = vadd.f32 %v2899_v33, %v7124_v28 }
 0x3bc   :  { %3462 = vst.msk [vmem:[#allocation3 + $0x18] sm:$0xff] %vm35_vm3, %v3282_v61  ;;  %v3219_v60 = vadd.f32 %v3031_v35, %v2894_v3 }
 0x3be   :  { %v3239_v41 = vadd.f32 %v3219_v60, %v3168_v13 }
 0x3c0   :  { %v3263_v20 = vadd.f32 %v7362_v12, %v3239_v41 }
 0x3c1   :  { %v3033_v9 = vpop.f32.mrf.mxu2 }
 0x3c2   :  { %v3283_v63 = vmax.f32 %v3263_v20, 0.0  ;;  %v3034_v50 = vadd.f32 %v3033_v9, %v7173_v57  ;;  %v3170_v11 = vpop.f32.mrf.mxu3  ;;  %v2902_v32 = vpop.f32.mrf.mxu1 }
 0x3c3   :  { %v3505_v55 = vld [vmem:[#allocation3 + $0x11] ss:$2 sm:$0xff]  ;;  %v3481_v2 = vld [vmem:[#allocation3 + $0x10] ss:$2 sm:$0xff]  ;;  %v3171_v37 = vadd.f32 %v3170_v11, %v7175_v4  ;;  %v2903_v3 = vadd.f32 %v2902_v32, %v7141_v0  ;;  %v1715_v11 = vadd.s32 64, %v6689_v18 }
 0x3c4   :  { %3463 = vst.msk [vmem:[#allocation3 + $0x20] sm:$0xff] %vm35_vm3, %v3283_v63  ;;  %v3220_v46 = vadd.f32 %v3034_v50, %v2897_v19  ;;  %5330 = vmatmul.msk.f32.gmra.mxu0 %vm35_vm3, %v3505_v55  ;;  %5341 = vmatmul.msk.f32.gmra.mxu1 %vm35_vm3, %v3481_v2 }
 0x3c5   :  { %vm3327_vm9 = vcmp.lt.s32.totalorder %v1715_v11, 66 }
 0x3c6   :  { %v3240_v45 = vadd.f32 %v3220_v46, %v3171_v37 }
 0x3c8   :  { %v3264_v54 = vadd.f32 %v7362_v12, %v3240_v45 }
 0x3c9   :  { %v3036_v5 = vpop.f32.mrf.mxu2 }
 0x3ca   :  { %v3284_v57 = vmax.f32 %v3264_v54, 0.0  ;;  %v3037_v56 = vadd.f32 %v3036_v5, %v7189_v27  ;;  %v3173_v14 = vpop.f32.mrf.mxu3  ;;  %v2905_v6 = vpop.f32.mrf.mxu1 }
 0x3cb   :  { %v3174_v4 = vadd.f32 %v3173_v14, %v7191_v30  ;;  %v2906_v20 = vadd.f32 %v2905_v6, %v7170_v39 }
 0x3cc   :  { %3464 = vst.msk [vmem:[#allocation3 + $0x28] sm:$0xff] %vm35_vm3, %v3284_v57  ;;  %v3221_v7 = vadd.f32 %v3037_v56, %v2900_v38 }
 0x3ce   :  { %v3241_v34 = vadd.f32 %v3221_v7, %v3174_v4 }
 0x3d0   :  { %v3265_v26 = vadd.f32 %v7362_v12, %v3241_v34  ;;  %v5361_v34 = vld [vmem:[%s8047_s7 + $0x18] sm:$0x3f] }
 0x3d1   :  { %v3039_v31 = vpop.f32.mrf.mxu2  ;;  %5362 = vmatpush.msk.msrb.mxu2 %vm3909_vm10, %v5361_v34 }
 0x3d2   :  { %v3285_v61 = vmax.f32 %v3265_v26, 0.0  ;;  %v3040_v35 = vadd.f32 %v3039_v31, %v7201_v8  ;;  %v3176_v28 = vpop.f32.mrf.mxu3  ;;  %v2908_v44 = vpop.f32.mrf.mxu1  ;;  %v1717_v26 = vadd.s32 80, %v6689_v18 }
 0x3d3   :  { %v3507_v33 = vld [vmem:[#allocation3 + $0x21] ss:$2 sm:$0xff]  ;;  %v3483_v27 = vld [vmem:[#allocation3 + $0x20] ss:$2 sm:$0xff]  ;;  %v3177_v13 = vadd.f32 %v3176_v28, %v7203_v29 }
 0x3d4   :  { %3465 = vst.msk [vmem:[#allocation3 + $0x30] sm:$0xff] %vm35_vm3, %v3285_v61  ;;  %v3222_v60 = vadd.f32 %v3040_v35, %v2903_v3  ;;  %5331 = vmatmul.msk.f32.gmra.mxu0 %vm35_vm3, %v3507_v33  ;;  %5342 = vmatmul.msk.f32.gmra.mxu1 %vm35_vm3, %v3483_v27  ;;  %vm3369_vm11 = vcmp.ge.s32.totalorder %v1717_v26, 81 }
 0x3d6   :  { %v3242_v30 = vadd.f32 %v3222_v60, %v3177_v13 }
 0x3d8   :  { %v3266_v41 = vadd.f32 %v7362_v12, %v3242_v30 }
 0x3d9   :  { %v3042_v0 = vpop.f32.mrf.mxu2 }
 0x3da   :  { %v3286_v8 = vmax.f32 %v3266_v41, 0.0  ;;  %v3043_v9 = vadd.f32 %v3042_v0, %v7207_v1  ;;  %v3179_v19 = vpop.f32.mrf.mxu3  ;;  %v2911_v63 = vpop.f32.mrf.mxu1 }
 0x3db   :  { %v3180_v29 = vadd.f32 %v3179_v19, %v7209_v10  ;;  %v2912_v5 = vadd.f32 %v2911_v63, %v7242_v17  ;;  %v5367_v17 = vld [vmem:[%s8047_s7 + $0x38] sm:$0x3f] }
 0x3dc   :  { %3466 = vst.msk [vmem:[#allocation3 + $0x38] sm:$0xff] %vm35_vm3, %v3286_v8  ;;  %v3223_v50 = vadd.f32 %v3043_v9, %v2906_v20  ;;  %5368 = vmatpush.msk.msrb.mxu3 %vm3909_vm10, %v5367_v17 }
 0x3de   :  { %v3243_v32 = vadd.f32 %v3223_v50, %v3180_v29 }
 0x3e0   :  { %v3267_v55 = vadd.f32 %v7362_v12, %v3243_v32 }
 0x3e1   :  { %v3045_v2 = vpop.f32.mrf.mxu2 }
 0x3e2   :  { %v3287_v46 = vmax.f32 %v3267_v55, 0.0  ;;  %v3182_v37 = vpop.f32.mrf.mxu3  ;;  %v2914_v39 = vpop.f32.mrf.mxu1 }
 0x3e3   :  { %v3509_v45 = vld [vmem:[#allocation3 + $0x31] ss:$2 sm:$0xff]  ;;  %v3485_v54 = vld [vmem:[#allocation3 + $0x30] ss:$2 sm:$0xff]  ;;  %v2915_v3 = vadd.f32 %v2914_v39, %v7247_v52 }
 0x3e4   :  { %v3447_v1 = vsel %vm3327_vm9, %v3287_v46, 0.0  ;;  %5332 = vmatmul.msk.f32.gmra.mxu0 %vm35_vm3, %v3509_v45  ;;  %5343 = vmatmul.msk.f32.gmra.mxu1 %vm35_vm3, %v3485_v54  ;;  %v1533_v63 = vpop.f32.mrf.mxu0 }
 0x3e5   :  { %3467 = vst.msk [vmem:[#allocation3 + $0x40] sm:$0xff] %vm35_vm3, %v3447_v1 }
 0x3e9   :  { %v3048_v10 = vpop.f32.mrf.mxu2 }
 0x3ea   :  { %v3049_v38 = vadd.f32 %v3048_v10, %v7255_v53  ;;  %v3185_v57 = vpop.f32.mrf.mxu3  ;;  %v2917_v56 = vpop.f32.mrf.mxu1 }
 0x3eb   :  { %v3186_v6 = vadd.f32 %v3185_v57, %v7257_v48  ;;  %v2918_v0 = vadd.f32 %v2917_v56, %v7259_v24 }
 0x3ec   :  { %v3225_v14 = vadd.f32 %v3049_v38, %v2912_v5  ;;  %v3511_v7 = vld [vmem:[#allocation3 + $0x41] ss:$2 sm:$0xff]  ;;  %v3487_v4 = vld [vmem:[#allocation3 + $0x40] ss:$2 sm:$0xff] }
 0x3ed   :  { %5333 = vmatmul.msk.f32.gmra.mxu0 %vm35_vm3, %v3511_v7  ;;  %5344 = vmatmul.msk.f32.gmra.mxu1 %vm35_vm3, %v3487_v4 }
 0x3ee   :  { %v3245_v53 = vadd.f32 %v3225_v14, %v3186_v6 }
 0x3f0   :  { %v3269_v48 = vadd.f32 %v7362_v12, %v3245_v53 }
 0x3f1   :  { %v3051_v31 = vpop.f32.mrf.mxu2 }
 0x3f2   :  { %v3289_v61 = vmax.f32 %v3269_v48, 0.0  ;;  %v3052_v35 = vadd.f32 %v3051_v31, %v7264_v40  ;;  %v3188_v28 = vpop.f32.mrf.mxu3  ;;  %v2920_v44 = vpop.f32.mrf.mxu1 }
 0x3f3   :  { %v3189_v60 = vadd.f32 %v3188_v28, %v7266_v42  ;;  %v2921_v11 = vadd.f32 %v2920_v44, %v7268_v62 }
 0x3f4   :  { %v3449_v33 = vsel %vm3369_vm11, %v3289_v61, 0.0  ;;  %v3226_v27 = vadd.f32 %v3052_v35, %v2915_v3 }
 0x3f5   :  { %3469 = vst.msk [vmem:[#allocation3 + $0x50] sm:$0xff] %vm35_vm3, %v3449_v33 }
 0x3f6   :  { %v3246_v13 = vadd.f32 %v3226_v27, %v3189_v60 }
 0x3f8   :  { %v3270_v30 = vadd.f32 %v7362_v12, %v3246_v13 }
 0x3f9   :  { %v3054_v41 = vpop.f32.mrf.mxu2 }
 0x3fa   :  { %v3290_v20 = vmax.f32 %v3270_v30, 0.0  ;;  %v3055_v52 = vadd.f32 %v3054_v41, %v7273_v21  ;;  %v3191_v8 = vpop.f32.mrf.mxu3  ;;  %v2923_v9 = vpop.f32.mrf.mxu1  ;;  %v8128_v30 = vld [vmem:[#allocation22_spill] sm:$0xff] }
 0x3fb   :  { %v3192_v19 = vadd.f32 %v3191_v8, %v7275_v25  ;;  %v1536_v25 = vpop.f32.mrf.mxu0 }
 0x3fc   :  { %3470 = vst.msk [vmem:[#allocation3 + $0x58] sm:$0xff] %vm35_vm3, %v3290_v20  ;;  %v3227_v40 = vadd.f32 %v3055_v52, %v2918_v0  ;;  %v8129_v20 = vld [vmem:[#allocation21_spill] sm:$0xff] }
 0x3fe   :  { %v3247_v42 = vadd.f32 %v3227_v40, %v3192_v19  ;;  %v8130_v19 = vld [vmem:[#allocation26_spill] sm:$0xff] }
 0x400   :  { %v3271_v50 = vadd.f32 %v7362_v12, %v3247_v42 }
 0x401   :  { %v3057_v29 = vpop.f32.mrf.mxu2 }
 0x402   :  { %v3291_v32 = vmax.f32 %v3271_v50, 0.0  ;;  %v3058_v24 = vadd.f32 %v3057_v29, %v7282_v59  ;;  %v3194_v55 = vpop.f32.mrf.mxu3  ;;  %v2926_v2 = vpop.f32.mrf.mxu1  ;;  %v2924_v59 = vadd.f32 %v2923_v9, %v7277_v58  ;;  %v8131_v29 = vld [vmem:[#allocation7_spill] sm:$0xff] }
 0x403   :  { %v3513_v21 = vld [vmem:[#allocation3 + $0x51] ss:$2 sm:$0xff]  ;;  %v3489_v46 = vld [vmem:[#allocation3 + $0x50] ss:$2 sm:$0xff]  ;;  %v3195_v39 = vadd.f32 %v3194_v55, %v7284_v49  ;;  %v1539_v56 = vpop.f32.mrf.mxu0  ;;  %v2927_v4 = vadd.f32 %v2926_v2, %v7286_v16 }
 0x404   :  { %3471 = vst.msk [vmem:[#allocation3 + $0x60] sm:$0xff] %vm35_vm3, %v3291_v32  ;;  %v3228_v37 = vadd.f32 %v3058_v24, %v2921_v11  ;;  %5334 = vmatmul.msk.f32.gmra.mxu0 %vm35_vm3, %v3513_v21  ;;  %5345 = vmatmul.msk.f32.gmra.mxu1 %vm35_vm3, %v3489_v46  ;;  %v8132_v24 = vld [vmem:[#allocation31_spill] sm:$0xff]  ;;  %v8133_v46 = vld [vmem:[#allocation8_spill] sm:$0xff] }
 0x405   :  { %v5366_v56 = vld [vmem:[%s8047_s7 + $0x30] sm:$0xff] }
 0x406   :  { %v3248_v45 = vadd.f32 %v3228_v37, %v3195_v39  ;;  %v1725_v39 = vadd.s32 144, %v6689_v18  ;;  %3962 = vmatpush.msrb.mxu3 %v5366_v56 }
 0x408   :  { %v3272_v62 = vadd.f32 %v7362_v12, %v3248_v45  ;;  %vm3397_vm12 = vcmp.lt.s32.totalorder %v1725_v39, 146 }
 0x409   :  { %v3060_v54 = vpop.f32.mrf.mxu2 }
 0x40a   :  { %v3292_v1 = vmax.f32 %v3272_v62, 0.0  ;;  %v3061_v10 = vadd.f32 %v3060_v54, %v7291_v36  ;;  %v3197_v5 = vpop.f32.mrf.mxu3  ;;  %v2929_v38 = vpop.f32.mrf.mxu1 }
 0x40b   :  { %v3198_v49 = vadd.f32 %v3197_v5, %v7293_v43  ;;  %v2930_v61 = vadd.f32 %v2929_v38, %v7295_v51 }
 0x40c   :  { %3472 = vst.msk [vmem:[#allocation3 + $0x68] sm:$0xff] %vm35_vm3, %v3292_v1  ;;  %v3229_v57 = vadd.f32 %v3061_v10, %v2924_v59 }
 0x40e   :  { %v3249_v14 = vadd.f32 %v3229_v57, %v3198_v49  ;;  %v5360_v49 = vld [vmem:[%s8047_s7 + $0x10] sm:$0xff] }
 0x40f   :  { %3928 = vmatpush.msrb.mxu2 %v5360_v49 }
 0x410   :  { %v3273_v6 = vadd.f32 %v7362_v12, %v3249_v14 }
 0x411   :  { %v3063_v7 = vpop.f32.mrf.mxu2 }
 0x412   :  { %v3293_v34 = vmax.f32 %v3273_v6, 0.0  ;;  %v3064_v58 = vadd.f32 %v3063_v7, %v7306_v22  ;;  %v3200_v26 = vpop.f32.mrf.mxu3  ;;  %v2932_v17 = vpop.f32.mrf.mxu1 }
 0x413   :  { %v3515_v36 = vld [vmem:[#allocation3 + $0x61] ss:$2 sm:$0xff]  ;;  %v3491_v53 = vld [vmem:[#allocation3 + $0x60] ss:$2 sm:$0xff]  ;;  %v3201_v31 = vadd.f32 %v3200_v26, %v7308_v23  ;;  %v2933_v41 = vadd.f32 %v2932_v17, %v8128_v30  ;;  %v5376_v30 = vld [vmem:[%s8047_s7 + $0x60] sm:$0xff] }
 0x414   :  { %3473 = vst.msk [vmem:[#allocation3 + $0x70] sm:$0xff] %vm35_vm3, %v3293_v34  ;;  %v3230_v48 = vadd.f32 %v3064_v58, %v2927_v4  ;;  %5335 = vmatmul.msk.f32.gmra.mxu0 %vm35_vm3, %v3515_v36  ;;  %5346 = vmatmul.msk.f32.gmra.mxu1 %vm35_vm3, %v3491_v53  ;;  %v7502_v58 = vld [vmem:[%s8046_s6] ss:$0 sm:$0xff] }
 0x416   :  { %v3250_v43 = vadd.f32 %v3230_v48, %v3201_v31 }
 0x418   :  { %v3274_v3 = vadd.f32 %v7362_v12, %v3250_v43 }
 0x419   :  { %v3066_v16 = vpop.f32.mrf.mxu2 }
 0x41a   :  { %v3294_v22 = vmax.f32 %v3274_v3, 0.0  ;;  %v3067_v35 = vadd.f32 %v3066_v16, %v7315_v47  ;;  %v3203_v28 = vpop.f32.mrf.mxu3  ;;  %v2935_v44 = vpop.f32.mrf.mxu1 }
 0x41b   :  { %v3204_v23 = vadd.f32 %v3203_v28, %v7317_v15  ;;  %v2936_v11 = vadd.f32 %v2935_v44, %v8131_v29 }
 0x41c   :  { %3474 = vst.msk [vmem:[#allocation3 + $0x78] sm:$0xff] %vm35_vm3, %v3294_v22  ;;  %v3231_v33 = vadd.f32 %v3067_v35, %v2930_v61  ;;  %v2377_v61 = vld [vmem:[#allocation2 + $0x132] ss:$2 sm:$0xff] }
 0x41d   :  { %5303 = vmatmul.msk.f32.gmra.mxu2 %vm33_vm2, %v2377_v61  ;;  %v2610_v35 = vld [vmem:[#allocation2 + $0x134] ss:$2 sm:$0xff] }
 0x41e   :  { %v3251_v27 = vadd.f32 %v3231_v33, %v3204_v23  ;;  %5323 = vmatmul.msk.f32.gmra.mxu3 %vm33_vm2, %v2610_v35 }
 0x420   :  { %v3275_v60 = vadd.f32 %v7362_v12, %v3251_v27  ;;  %v5377_v27 = vld [vmem:[%s8047_s7 + $0x68] sm:$0x3f] }
 0x421   :  { %v3069_v13 = vpop.f32.mrf.mxu2  ;;  %5464 = vmatpush.msk.msrb.mxu0 %vm3909_vm10, %v5377_v27 }
 0x422   :  { %v3295_v0 = vmax.f32 %v3275_v60, 0.0  ;;  %v3070_v52 = vadd.f32 %v3069_v13, %v8129_v20  ;;  %v3206_v51 = vpop.f32.mrf.mxu3  ;;  %v2938_v47 = vpop.f32.mrf.mxu1 }
 0x423   :  { %v3517_v8 = vld [vmem:[#allocation3 + $0x71] ss:$2 sm:$0xff]  ;;  %v3493_v9 = vld [vmem:[#allocation3 + $0x70] ss:$2 sm:$0xff]  ;;  %v3207_v63 = vadd.f32 %v3206_v51, %v8130_v19  ;;  %4584 = vmatpush.msrb.mxu0 %v5376_v30 }
 0x424   :  { %3475 = vst.msk [vmem:[#allocation3 + $0x80] sm:$0xff] %vm35_vm3, %v3295_v0  ;;  %v3232_v40 = vadd.f32 %v3070_v52, %v2933_v41  ;;  %5336 = vmatmul.msk.f32.gmra.mxu0 %vm35_vm3, %v3517_v8  ;;  %5347 = vmatmul.msk.f32.gmra.mxu1 %vm35_vm3, %v3493_v9  ;;  %v5373_v52 = vld [vmem:[%s8047_s7 + $0x58] sm:$0x3f] }
 0x425   :  { %5374 = vmatpush.msk.msra.mxu2 %vm3909_vm10, %v5373_v52  ;;  %v5379_v47 = vld [vmem:[%s8047_s7 + $0x78] sm:$0x3f]  ;;  %v5384_v52 = vld [vmem:[%s8047_s7 + $0x90] sm:$0xff] }
 0x426   :  { %v3252_v15 = vadd.f32 %v3232_v40, %v3207_v63  ;;  %v5372_v40 = vld [vmem:[%s8047_s7 + $0x50] sm:$0xff]  ;;  %5380 = vmatpush.msk.msra.mxu3 %vm3909_vm10, %v5379_v47 }
 0x427   :  { %3996 = vmatpush.msra.mxu2 %v5372_v40  ;;  %v5378_v63 = vld [vmem:[%s8047_s7 + $0x70] sm:$0xff]  ;;  %v5425_v40 = vld [vmem:[%s8047_s7 + $0x168] sm:$0x3f] }
 0x428   :  { %v3276_v42 = vadd.f32 %v7362_v12, %v3252_v15  ;;  %4030 = vmatpush.msra.mxu3 %v5378_v63  ;;  %v5390_v47 = vld [vmem:[%s8047_s7 + $0xb0] sm:$0xff] }
 0x429   :  { %v3072_v50 = vpop.f32.mrf.mxu2 }
 0x42a   :  { %v3296_v32 = vmax.f32 %v3276_v42, 0.0  ;;  %v3073_v55 = vadd.f32 %v3072_v50, %v8132_v24  ;;  %v3209_v2 = vpop.f32.mrf.mxu3 }
 0x42b   :  { %v3210_v37 = vadd.f32 %v3209_v2, %v8133_v46  ;;  %v5383_v2 = vld [vmem:[%s8047_s7 + $0x88] sm:$0x3f] }
 0x42c   :  { %3476 = vst.msk [vmem:[#allocation3 + $0x88] sm:$0xff] %vm35_vm3, %v3296_v32  ;;  %v3233_v21 = vadd.f32 %v3073_v55, %v2936_v11  ;;  %5466 = vmatpush.msk.msra.mxu1 %vm3909_vm10, %v5383_v2  ;;  %v5401_v46 = vld [vmem:[%s8047_s7 + $0xe8] sm:$0x3f] }
 0x42d   :  { %5472 = vmatpush.msk.msra.mxu0 %vm3909_vm10, %v5401_v46 }
 0x42e   :  { %v3253_v25 = vadd.f32 %v3233_v21, %v3210_v37 }
 0x430   :  { %v3277_v45 = vadd.f32 %v7362_v12, %v3253_v25 }
 0x431   :  { %v3578_v18 = vpop.f32.mrf.mxu0  ;;  %v3658_v38 = vpop.f32.mrf.mxu1 }
 0x432   :  { %v3297_v62 = vmax.f32 %v3277_v45, 0.0  ;;  %v3659_v34 = vadd.f32 %v3658_v38, %v3578_v18 }
 0x433   :  { %v3519_v54 = vld [vmem:[#allocation3 + $0x81] ss:$2 sm:$0xff]  ;;  %v3495_v59 = vld [vmem:[#allocation3 + $0x80] ss:$2 sm:$0xff] }
 0x434   :  { %v3457_v1 = vsel %vm3397_vm12, %v3297_v62, 0.0  ;;  %5337 = vmatmul.msk.f32.gmra.mxu0 %vm35_vm3, %v3519_v54  ;;  %5348 = vmatmul.msk.f32.gmra.mxu1 %vm35_vm3, %v3495_v59  ;;  %v3692_v26 = vadd.f32 %v7502_v58, %v3659_v34  ;;  %v5382_v62 = vld [vmem:[%s8047_s7 + $0x80] sm:$0xff] }
 0x435   :  { %3477 = vst.msk [vmem:[#allocation3 + $0x90] sm:$0xff] %vm35_vm3, %v3457_v1  ;;  %v5400_v54 = vld [vmem:[%s8047_s7 + $0xe0] sm:$0xff]  ;;  %4611 = vmatpush.msra.mxu1 %v5382_v62 }
 0x436   :  { %v5350_v48 = vmul.f32 -1.442695, %v3692_v26  ;;  %4695 = vmatpush.msra.mxu0 %v5400_v54 }
 0x438   :  { %5564 = vpow2.f32 %v5350_v48 }
 0x43c   :  { %v3521_v10 = vld [vmem:[#allocation3 + $0x91] ss:$2 sm:$0xff]  ;;  %v3497_v5 = vld [vmem:[#allocation3 + $0x90] ss:$2 sm:$0xff] }
 0x43d   :  { %5338 = vmatmul.msk.f32.gmra.mxu0 %vm35_vm3, %v3521_v10  ;;  %5349 = vmatmul.msk.f32.gmra.mxu1 %vm35_vm3, %v3497_v5 }
 0x43e   :  { %v5565_v43 = vpop.eup %5564 }
 0x43f   :  { %v7507_v3 = vadd.f32 1.0, %v5565_v43 }
 0x441   :  { %v3581_v12 = vpop.f32.mrf.mxu0  ;;  %v3661_v57 = vpop.f32.mrf.mxu1  ;;  %5566 = vrcp.f32 %v7507_v3  ;;  %v3753_v21 = vand.u32 2147483648, %v7507_v3  ;;  %vm3747_vm14 = vweird.f32 %v7507_v3  ;;  %v3751_v39 = vand.u32 2147483647, %v7507_v3 }
 0x442   :  { %v3662_v31 = vadd.f32 %v3661_v57, %v3581_v12 }
 0x443   :  { %v3754_v18 = vor.u32 1.1754944e-38, %v3753_v21  ;;  %vm3752_vm0 = vcmp.eq.f32.partialorder %v3751_v39, 8.507059e+37 }
 0x444   :  { %v3693_v16 = vadd.f32 %v7502_v58, %v3662_v31 }
 0x446   :  { %v5351_v22 = vmul.f32 -1.442695, %v3693_v16 }
 0x447   :  { %v5567_v60 = vpop.eup %5566 }
 0x448   :  { %5568 = vpow2.f32 %v5351_v22  ;;  %v3743_v0 = vmul.f32 %v5567_v60, %v7507_v3  ;;  %vm3748_vm13 = vweird.f32 %v5567_v60 }
 0x449   :  { %vm3749_vm15 = vmor %vm3747_vm14, %vm3748_vm13 }
 0x44a   :  { %v3744_v8 = vsub.f32 1.0, %v3743_v0 }
 0x44c   :  { %v3745_v50 = vmul.f32 %v5567_v60, %v3744_v8 }
 0x44e   :  { %v5569_v20 = vpop.eup %5568  ;;  %v3746_v24 = vadd.f32 %v5567_v60, %v3745_v50 }
 0x44f   :  { %v7527_v9 = vadd.f32 1.0, %v5569_v20 }
 0x450   :  { %v3750_v1 = vsel %vm3749_vm15, %v5567_v60, %v3746_v24 }
 0x451   :  { %v3584_v14 = vpop.f32.mrf.mxu0  ;;  %v3664_v6 = vpop.f32.mrf.mxu1  ;;  %v7566_v49 = vsel %vm3752_vm0, %v3754_v18, %v3750_v1  ;;  %vm3762_vm7 = vweird.f32 %v7527_v9  ;;  %v3766_v30 = vand.u32 2147483647, %v7527_v9  ;;  %v5397_v18 = vld [vmem:[%s8047_s7 + $0xd8] sm:$0x3f]  ;;  %v5448_v1 = vld [vmem:[%s8047_s7 + $0x1e0] sm:$0xff] }
 0x452   :  { %v3665_v41 = vadd.f32 %v3664_v6, %v3584_v14  ;;  %v3903_v31 = vrot.slane %v7566_v49, 1  ;;  %v3939_v35 = vrot.slane %v7566_v49, 3  ;;  %v4561_v27 = vrot.slane %v7566_v49, 6 }
 0x453   :  { %v4505_v63 = vrot.slane %v7566_v49, 2  ;;  %v3973_v2 = vrot.slane %v7566_v49, 5  ;;  %v4533_v46 = vrot.slane %v7566_v49, 4  ;;  %vm7649_vm11 = vcmp.eq.f32.partialorder %v3766_v30, 8.507059e+37 }
 0x454   :  { %v3694_v51 = vadd.f32 %v7502_v58, %v3665_v41  ;;  %v3768_v41 = vand.u32 2147483648, %v7527_v9 }
 0x456   :  { %v5352_v15 = vmul.f32 -1.442695, %v3694_v51  ;;  %v5407_v51 = vld [vmem:[%s8047_s7 + $0x108] sm:$0x3f] }
 0x457   :  { %5474 = vmatpush.msk.msrb.mxu1 %vm3909_vm10, %v5407_v51 }
 0x461   :  { %v7495_v7 = vpop.f32.mrf.mxu0  ;;  %v7497_v4 = vpop.f32.mrf.mxu1 }
 0x462   :  { %v3668_v25 = vadd.f32 %v7497_v4, %v7495_v7 }
 0x464   :  { %v3695_v12 = vadd.f32 %v7502_v58, %v3668_v25 }
 0x466   :  { %v5353_v26 = vmul.f32 -1.442695, %v3695_v12 }
 0x46a   :  { %v3590_v17 = vpop.f32.mrf.mxu0  ;;  %v3670_v36 = vpop.f32.mrf.mxu1 }
 0x46b   :  { %v7505_v53 = vadd.f32 %v3670_v36, %v3590_v17 }
 0x46d   :  { %v3696_v12 = vadd.f32 %v7502_v58, %v7505_v53 }
 0x481   :  { %v3593_v28 = vpop.f32.mrf.mxu0  ;;  %v3673_v44 = vpop.f32.mrf.mxu1 }
 0x482   :  { %v3674_v33 = vadd.f32 %v3673_v44, %v3593_v28  ;;  %v5385_v28 = vld [vmem:[%s8047_s7 + $0x98] sm:$0x3f] }
 0x484   :  { %v3697_v23 = vadd.f32 %v7502_v58, %v3674_v33 }
 0x486   :  { %v5355_v13 = vmul.f32 -1.442695, %v3697_v23 }
 0x488   :  { %5570 = vpow2.f32 %v5355_v13  ;;  %v5391_v13 = vld [vmem:[%s8047_s7 + $0xb8] sm:$0x3f] }
 0x489   :  { %5572 = vrcp.f32 %v7527_v9 }
 0x48e   :  { %v5571_v19 = vpop.eup %5570 }
 0x48f   :  { %v3737_v42 = vadd.f32 1.0, %v5571_v19  ;;  %v7549_v37 = vpop.eup %5572 }
 0x490   :  { %v3758_v38 = vmul.f32 %v7549_v37, %v7527_v9  ;;  %vm3763_vm8 = vweird.f32 %v7549_v37 }
 0x491   :  { %5574 = vrcp.f32 %v3737_v42  ;;  %v3596_v29 = vpop.f32.mrf.mxu0  ;;  %v3676_v11 = vpop.f32.mrf.mxu1  ;;  %v3828_v56 = vand.u32 2147483648, %v3737_v42  ;;  %v3826_v7 = vand.u32 2147483647, %v3737_v42  ;;  %vm3822_vm2 = vweird.f32 %v3737_v42  ;;  %vm7645_vm9 = vmor %vm3762_vm7, %vm3763_vm8 }
 0x492   :  { %v3677_v32 = vadd.f32 %v3676_v11, %v3596_v29  ;;  %5576 = vpow2.f32 %v5352_v15  ;;  %v3759_v4 = vsub.f32 1.0, %v3758_v38  ;;  %v5406_v11 = vld [vmem:[%s8047_s7 + $0x100] sm:$0xff] }
 0x493   :  { %v3829_v36 = vor.u32 1.1754944e-38, %v3828_v56  ;;  %vm3827_vm5 = vcmp.eq.f32.partialorder %v3826_v7, 8.507059e+37  ;;  %4722 = vmatpush.msrb.mxu1 %v5406_v11 }
 0x494   :  { %v3698_v55 = vadd.f32 %v7502_v58, %v3677_v32  ;;  %v3760_v3 = vmul.f32 %v7549_v37, %v3759_v4  ;;  %v5424_v32 = vld [vmem:[%s8047_s7 + $0x160] sm:$0xff]  ;;  %v5403_v4 = vld [vmem:[%s8047_s7 + $0xf8] sm:$0x3f] }
 0x496   :  { %v5356_v45 = vmul.f32 -1.442695, %v3698_v55 }
 0x497   :  { %v5575_v59 = vpop.eup %5574 }
 0x498   :  { %v3818_v10 = vmul.f32 %v5575_v59, %v3737_v42  ;;  %5578 = vpow2.f32 %v5356_v45  ;;  %v5577_v5 = vpop.eup %5576  ;;  %vm3823_vm1 = vweird.f32 %v5575_v59  ;;  %v3761_v42 = vadd.f32 %v7549_v37, %v3760_v3 }
 0x499   :  { %v7568_v14 = vadd.f32 1.0, %v5577_v5  ;;  %vm3824_vm3 = vmor %vm3822_vm2, %vm3823_vm1  ;;  %v4007_v5 = vrot.slane %v7566_v49, 7  ;;  %v5354_v3 = vmul.f32 -1.442695, %v3696_v12 }
 0x49a   :  { %v3819_v57 = vsub.f32 1.0, %v3818_v10  ;;  %v3765_v38 = vsel %vm7645_vm9, %v7549_v37, %v3761_v42  ;;  %v5396_v37 = vld [vmem:[%s8047_s7 + $0xd0] sm:$0xff] }
 0x49b   :  { %5580 = vrcp.f32 %v7568_v14  ;;  %v3781_v51 = vand.u32 2147483647, %v7568_v14  ;;  %vm3777_vm1 = vweird.f32 %v7568_v14 }
 0x49c   :  { %v3820_v6 = vmul.f32 %v5575_v59, %v3819_v57 }
 0x49e   :  { %v5579_v34 = vpop.eup %5578  ;;  %v3821_v17 = vadd.f32 %v5575_v59, %v3820_v6  ;;  %v3769_v6 = vor.u32 1.1754944e-38, %v3768_v41 }
 0x49f   :  { %v7570_v48 = vadd.f32 1.0, %v5579_v34 }
 0x4a0   :  { %v3825_v43 = vsel %vm3824_vm3, %v5575_v59, %v3821_v17  ;;  %v7683_v17 = vsel %vm7649_vm11, %v3769_v6, %v3765_v38  ;;  %v5430_v59 = vld [vmem:[%s8047_s7 + $0x180] sm:$0xff]  ;;  %vm7765_vm3 = vcmp.eq.f32.partialorder %v3781_v51, 8.507059e+37 }
 0x4a1   :  { %v7575_v16 = vsel %vm3827_vm5, %v3829_v36, %v3825_v43  ;;  %5582 = vrcp.f32 %v7570_v48  ;;  %v3599_v61 = vpop.f32.mrf.mxu0  ;;  %v3679_v22 = vpop.f32.mrf.mxu1  ;;  %v3843_v7 = vand.u32 2147483648, %v7570_v48  ;;  %v3841_v53 = vand.u32 2147483647, %v7570_v48 }
 0x4a2   :  { %5584 = vpow2.f32 %v5353_v26  ;;  %v3680_v44 = vadd.f32 %v3679_v22, %v3599_v61  ;;  %v3905_v33 = vsel %vm3904_vm4, %v7575_v16, %v3903_v31  ;;  %v3940_v23 = vrot.slane %v7575_v16, 2  ;;  %v7615_v15 = vpop.eup %5580  ;;  %v5402_v31 = vld [vmem:[%s8047_s7 + $0xf0] sm:$0xff] }
 0x4a3   :  { %5363 = vmatmul.msk.f32.vlgmr.msrb.gmra.mxu2 %vm3906_vm6, %v3905_v33  ;;  %v4562_v60 = vrot.slane %v7575_v16, 5  ;;  %v4478_v19 = vrot.slane %v7575_v16, 7  ;;  %v3974_v29 = vrot.slane %v7575_v16, 4  ;;  %v4506_v24 = vrot.slane %v7575_v16, 1 }
 0x4a4   :  { %v3699_v0 = vadd.f32 %v7502_v58, %v3680_v44  ;;  %v3941_v20 = vsel %vm3904_vm4, %v3940_v23, %v3939_v35  ;;  %5386 = vmatpush.msk.msrb.mxu2 %vm3909_vm10, %v5385_v28  ;;  %v4534_v39 = vrot.slane %v7575_v16, 3  ;;  %v4008_v62 = vrot.slane %v7575_v16, 6 }
 0x4a5   :  { %5369 = vmatmul.msk.f32.vlgmr.msrb.gmra.mxu3 %vm3906_vm6, %v3941_v20  ;;  %v4563_v8 = vsel %vm3904_vm4, %v4562_v60, %v4561_v27  ;;  %v7632_v21 = vsel %vm3904_vm4, %v4478_v19, %v7566_v49  ;;  %v7639_v54 = vsel %vm3904_vm4, %v4506_v24, %v4505_v63  ;;  %v3773_v10 = vmul.f32 %v7615_v15, %v7568_v14  ;;  %v5409_v60 = vld [vmem:[%s8047_s7 + $0x118] sm:$0x3f]  ;;  %v5408_v19 = vld [vmem:[%s8047_s7 + $0x110] sm:$0xff] }
 0x4a6   :  { %v5357_v50 = vmul.f32 -1.442695, %v3699_v0  ;;  %5465 = vmatmul.msk.f32.vlgmr.msrb.gmra.mxu0 %vm3906_vm6, %v4563_v8  ;;  %5392 = vmatpush.msk.msrb.mxu3 %vm3909_vm10, %v5391_v13  ;;  %v7660_v9 = vsel %vm3904_vm4, %v4534_v39, %v4533_v46  ;;  %v3975_v56 = vsel %vm3904_vm4, %v3974_v29, %v3973_v2  ;;  %v4009_v26 = vsel %vm3904_vm4, %v4008_v62, %v4007_v5  ;;  %v5449_v29 = vld [vmem:[%s8047_s7 + $0x1e8] sm:$0x3f]  ;;  %v5414_v46 = vld [vmem:[%s8047_s7 + $0x130] sm:$0xff] }
 0x4a7   :  { %v5583_v55 = vpop.eup %5582  ;;  %4065 = vmatpush.msrb.mxu2 %v5384_v52  ;;  %5480 = vmatpush.msk.msrb.mxu0 %vm3909_vm10, %v5425_v40  ;;  %v3774_v36 = vsub.f32 1.0, %v3773_v10  ;;  %vm3837_vm13 = vweird.f32 %v7570_v48  ;;  %v3844_v61 = vor.u32 1.1754944e-38, %v3843_v7  ;;  %vm3842_vm15 = vcmp.eq.f32.partialorder %v3841_v53, 8.507059e+37  ;;  %v5415_v40 = vld [vmem:[%s8047_s7 + $0x138] sm:$0x3f] }
 0x4a8   :  { %v5585_v25 = vpop.eup %5584  ;;  %v3833_v45 = vmul.f32 %v5583_v55, %v7570_v48  ;;  %5586 = vpow2.f32 %v5357_v50  ;;  %4099 = vmatpush.msrb.mxu3 %v5390_v47  ;;  %vm3838_vm12 = vweird.f32 %v5583_v55  ;;  %v4043_v28 = vrot.slane %v7683_v17, 1  ;;  %v5431_v50 = vld [vmem:[%s8047_s7 + $0x188] sm:$0x3f] }
 0x4a9   :  { %4806 = vmatpush.msrb.mxu0 %v5424_v32  ;;  %v7668_v49 = vadd.f32 1.0, %v5585_v25  ;;  %vm3839_vm14 = vmor %vm3837_vm13, %vm3838_vm12  ;;  %v3775_v44 = vmul.f32 %v7615_v15, %v3774_v36  ;;  %v4076_v27 = vrot.slane %v7683_v17, 3  ;;  %v4672_v20 = vrot.slane %v7683_v17, 6 }
 0x4aa   :  { %v3834_v57 = vsub.f32 1.0, %v3833_v45  ;;  %vm3778_vm0 = vweird.f32 %v7615_v15  ;;  %v4644_v11 = vrot.slane %v7683_v17, 4  ;;  %v3783_v45 = vand.u32 2147483648, %v7568_v14 }
 0x4ab   :  { %5375 = vmatmul.msk.f32.vlgmr.msra.gmra.mxu2 %vm3906_vm6, %v3975_v56  ;;  %5588 = vrcp.f32 %v7668_v49  ;;  %v3776_v24 = vadd.f32 %v7615_v15, %v3775_v44  ;;  %v4110_v62 = vrot.slane %v7683_v17, 5  ;;  %vm7761_vm2 = vmor %vm3777_vm1, %vm3778_vm0  ;;  %v5421_v56 = vld [vmem:[%s8047_s7 + $0x158] sm:$0x3f]  ;;  %vm3792_vm12 = vweird.f32 %v7668_v49 }
 0x4ac   :  { %v3835_v34 = vmul.f32 %v5583_v55, %v3834_v57  ;;  %5398 = vmatpush.msk.msra.mxu2 %vm3909_vm10, %v5397_v18  ;;  %v4144_v57 = vrot.slane %v7683_v17, 7 }
 0x4ad   :  { %5381 = vmatmul.msk.f32.vlgmr.msra.gmra.mxu3 %vm3906_vm6, %v4009_v26  ;;  %v3780_v6 = vsel %vm7761_vm2, %v7615_v15, %v3776_v24  ;;  %v3784_v26 = vor.u32 1.1754944e-38, %v3783_v45  ;;  %v5427_v15 = vld [vmem:[%s8047_s7 + $0x178] sm:$0x3f]  ;;  %v3796_v45 = vand.u32 2147483647, %v7668_v49 }
 0x4ae   :  { %v5587_v43 = vpop.eup %5586  ;;  %v3836_v16 = vadd.f32 %v5583_v55, %v3835_v34  ;;  %5404 = vmatpush.msk.msra.mxu3 %vm3909_vm10, %v5403_v4  ;;  %4133 = vmatpush.msra.mxu2 %v5396_v37 }
 0x4af   :  { %v7691_v22 = vadd.f32 1.0, %v5587_v43 }
 0x4b0   :  { %v3840_v35 = vsel %vm3839_vm14, %v5583_v55, %v3836_v16  ;;  %4167 = vmatpush.msra.mxu3 %v5402_v31  ;;  %vm3797_vm14 = vcmp.eq.f32.partialorder %v3796_v45, 8.507059e+37 }
 0x4b1   :  { %v7696_v33 = vsel %vm3842_vm15, %v3844_v61, %v3840_v35  ;;  %5590 = vrcp.f32 %v7691_v22  ;;  %v3602_v48 = vpop.f32.mrf.mxu0  ;;  %v3682_v23 = vpop.f32.mrf.mxu1  ;;  %v3858_v31 = vand.u32 2147483648, %v7691_v22  ;;  %v3856_v61 = vand.u32 2147483647, %v7691_v22 }
 0x4b2   :  { %5592 = vpow2.f32 %v5354_v3  ;;  %v3683_v13 = vadd.f32 %v3682_v23, %v3602_v48  ;;  %v4044_v30 = vsel %vm3904_vm4, %v7696_v33, %v4043_v28  ;;  %v4077_v41 = vrot.slane %v7696_v33, 2  ;;  %v7732_v32 = vpop.eup %5588  ;;  %v5420_v3 = vld [vmem:[%s8047_s7 + $0x150] sm:$0xff] }
 0x4b3   :  { %5387 = vmatmul.msk.f32.vlgmr.msrb.gmra.mxu2 %vm3906_vm6, %v4044_v30  ;;  %v4589_v0 = vrot.slane %v7696_v33, 7  ;;  %v4673_v52 = vrot.slane %v7696_v33, 5  ;;  %v4111_v2 = vrot.slane %v7696_v33, 4  ;;  %v4645_v39 = vrot.slane %v7696_v33, 3  ;;  %v5426_v48 = vld [vmem:[%s8047_s7 + $0x170] sm:$0xff] }
 0x4b4   :  { %v3700_v8 = vadd.f32 %v7502_v58, %v3683_v13  ;;  %v4078_v47 = vsel %vm3904_vm4, %v4077_v41, %v4076_v27  ;;  %5410 = vmatpush.msk.msrb.mxu2 %vm3909_vm10, %v5409_v60  ;;  %v4145_v18 = vrot.slane %v7696_v33, 6  ;;  %v3788_v7 = vmul.f32 %v7732_v32, %v7668_v49 }
 0x4b5   :  { %5393 = vmatmul.msk.f32.vlgmr.msrb.gmra.mxu3 %vm3906_vm6, %v4078_v47  ;;  %v4590_v63 = vsel %vm3904_vm4, %v4589_v0, %v7683_v17  ;;  %v4674_v42 = vsel %vm3904_vm4, %v4673_v52, %v4672_v20  ;;  %v7757_v14 = vsel %vm3904_vm4, %v4645_v39, %v4644_v11  ;;  %v4112_v53 = vsel %vm3904_vm4, %v4111_v2, %v4110_v62  ;;  %v5433_v52 = vld [vmem:[%s8047_s7 + $0x198] sm:$0x3f]  ;;  %v5438_v39 = vld [vmem:[%s8047_s7 + $0x1b0] sm:$0xff] }
 0x4b6   :  { %v5358_v55 = vmul.f32 -1.442695, %v3700_v8  ;;  %5467 = vmatmul.msk.f32.vlgmr.msra.gmra.mxu1 %vm3906_vm6, %v4590_v63  ;;  %5473 = vmatmul.msk.f32.vlgmr.msra.gmra.mxu0 %vm3906_vm6, %v4674_v42  ;;  %v4146_v35 = vsel %vm3904_vm4, %v4145_v18, %v4144_v57  ;;  %v7794_v28 = vsel %vm7765_vm3, %v3784_v26, %v3780_v6  ;;  %v3789_v27 = vsub.f32 1.0, %v3788_v7 }
 0x4b7   :  { %v5591_v25 = vpop.eup %5590  ;;  %5416 = vmatpush.msk.msrb.mxu3 %vm3909_vm10, %v5415_v40  ;;  %4202 = vmatpush.msrb.mxu2 %v5408_v19  ;;  %vm3852_vm7 = vweird.f32 %v7691_v22  ;;  %v3859_v13 = vor.u32 1.1754944e-38, %v3858_v31  ;;  %vm3857_vm9 = vcmp.eq.f32.partialorder %v3856_v61, 8.507059e+37  ;;  %v4180_v0 = vrot.slane %v7794_v28, 1 }
 0x4b8   :  { %v5593_v10 = vpop.eup %5592  ;;  %v3848_v5 = vmul.f32 %v5591_v25, %v7691_v22  ;;  %5594 = vpow2.f32 %v5358_v55  ;;  %5482 = vmatpush.msk.msra.mxu1 %vm3909_vm10, %v5431_v50  ;;  %5488 = vmatpush.msk.msra.mxu0 %vm3909_vm10, %v5449_v29  ;;  %vm3853_vm5 = vweird.f32 %v5591_v25  ;;  %v4213_v22 = vrot.slane %v7794_v28, 3  ;;  %v5439_v50 = vld [vmem:[%s8047_s7 + $0x1b8] sm:$0x3f]  ;;  %v5432_v29 = vld [vmem:[%s8047_s7 + $0x190] sm:$0xff] }
 0x4b9   :  { %4236 = vmatpush.msrb.mxu3 %v5414_v46  ;;  %v7779_v36 = vadd.f32 1.0, %v5593_v10  ;;  %vm3854_vm8 = vmor %vm3852_vm7, %vm3853_vm5  ;;  %v3790_v51 = vmul.f32 %v7732_v32, %v3789_v27  ;;  %v4783_v19 = vrot.slane %v7794_v28, 6  ;;  %vm3793_vm11 = vweird.f32 %v7732_v32 }
 0x4ba   :  { %v3849_v4 = vsub.f32 1.0, %v3848_v5  ;;  %v3605_v37 = vpop.f32.mrf.mxu0  ;;  %v3685_v34 = vpop.f32.mrf.mxu1  ;;  %4833 = vmatpush.msra.mxu1 %v5430_v59  ;;  %4917 = vmatpush.msra.mxu0 %v5448_v1  ;;  %v3798_v62 = vand.u32 2147483648, %v7668_v49  ;;  %v4247_v10 = vrot.slane %v7794_v28, 5  ;;  %vm7853_vm13 = vmor %vm3792_vm12, %vm3793_vm11  ;;  %v5445_v49 = vld [vmem:[%s8047_s7 + $0x1d8] sm:$0x3f]  ;;  %v4281_v7 = vrot.slane %v7794_v28, 7 }
 0x4bb   :  { %v3686_v43 = vadd.f32 %v3685_v34, %v3605_v37  ;;  %5399 = vmatmul.msk.f32.vlgmr.msra.gmra.mxu2 %vm3906_vm6, %v4112_v53  ;;  %5596 = vrcp.f32 %v7779_v36  ;;  %v3791_v2 = vadd.f32 %v7732_v32, %v3790_v51  ;;  %v5451_v34 = vld [vmem:[%s8047_s7 + $0x1f8] sm:$0x3f]  ;;  %v3897_v51 = vld [vmem:[%s8047_s7 + $0x8] sm:$0x3f]  ;;  %vm3807_vm7 = vweird.f32 %v7779_v36 }
 0x4bc   :  { %v3850_v16 = vmul.f32 %v5591_v25, %v3849_v4  ;;  %5422 = vmatpush.msk.msra.mxu2 %vm3909_vm10, %v5421_v56  ;;  %v3799_v4 = vor.u32 1.1754944e-38, %v3798_v62 }
 0x4bd   :  { %v3701_v44 = vadd.f32 %v7502_v58, %v3686_v43  ;;  %5405 = vmatmul.msk.f32.vlgmr.msra.gmra.mxu3 %vm3906_vm6, %v4146_v35  ;;  %v3795_v57 = vsel %vm7853_vm13, %v7732_v32, %v3791_v2  ;;  %v5444_v32 = vld [vmem:[%s8047_s7 + $0x1d0] sm:$0xff] }
 0x4be   :  { %v5595_v23 = vpop.eup %5594  ;;  %v3851_v60 = vadd.f32 %v5591_v25, %v3850_v16  ;;  %5428 = vmatpush.msk.msra.mxu3 %vm3909_vm10, %v5427_v15  ;;  %4270 = vmatpush.msra.mxu2 %v5420_v3  ;;  %v7881_v43 = vsel %vm3797_vm14, %v3799_v4, %v3795_v57  ;;  %v5450_v3 = vld [vmem:[%s8047_s7 + $0x1f0] sm:$0xff]  ;;  %v5371_v57 = vld [vmem:[%s8047_s7 + $0x48] sm:$0x3f]  ;;  %v5370_v4 = vld [vmem:[%s8047_s7 + $0x40] sm:$0xff] }
 0x4bf   :  { %v7803_v30 = vadd.f32 1.0, %v5595_v23  ;;  %v5359_v41 = vmul.f32 -1.442695, %v3701_v44  ;;  %v4317_v44 = vrot.slane %v7881_v43, 1  ;;  %v4350_v27 = vrot.slane %v7881_v43, 3 }
 0x4c0   :  { %v3855_v58 = vsel %vm3854_vm8, %v5591_v25, %v3851_v60  ;;  %4304 = vmatpush.msra.mxu3 %v5426_v48  ;;  %v5455_v60 = vld [vmem:[%s8047_s7 + $0x208] sm:$0x3f] }
 0x4c1   :  { %v7807_v20 = vsel %vm3857_vm9, %v3859_v13, %v3855_v58  ;;  %5598 = vrcp.f32 %v7803_v30  ;;  %v7834_v55 = vpop.eup %5596  ;;  %v3873_v37 = vand.u32 2147483648, %v7803_v30  ;;  %v3871_v26 = vand.u32 2147483647, %v7803_v30 }
 0x4c2   :  { %5600 = vpow2.f32 %v5359_v41  ;;  %v4181_v8 = vsel %vm3904_vm4, %v7807_v20, %v4180_v0  ;;  %v4214_v47 = vrot.slane %v7807_v20, 2  ;;  %v4700_v40 = vrot.slane %v7807_v20, 7 }
 0x4c3   :  { %5411 = vmatmul.msk.f32.vlgmr.msrb.gmra.mxu2 %vm3906_vm6, %v4181_v8  ;;  %v4784_v63 = vrot.slane %v7807_v20, 5  ;;  %v4248_v46 = vrot.slane %v7807_v20, 4  ;;  %v4282_v5 = vrot.slane %v7807_v20, 6  ;;  %v3803_v38 = vmul.f32 %v7834_v55, %v7779_v36 }
 0x4c4   :  { %v4215_v42 = vsel %vm3904_vm4, %v4214_v47, %v4213_v22  ;;  %5434 = vmatpush.msk.msrb.mxu2 %vm3909_vm10, %v5433_v52  ;;  %v4701_v11 = vsel %vm3904_vm4, %v4700_v40, %v7794_v28  ;;  %vm3867_vm0 = vweird.f32 %v7803_v30  ;;  %v3874_v61 = vor.u32 1.1754944e-38, %v3873_v37 }
 0x4c5   :  { %5417 = vmatmul.msk.f32.vlgmr.msrb.gmra.mxu3 %vm3906_vm6, %v4215_v42  ;;  %v4785_v24 = vsel %vm3904_vm4, %v4784_v63, %v4783_v19  ;;  %5475 = vmatmul.msk.f32.vlgmr.msrb.gmra.mxu1 %vm3906_vm6, %v4701_v11  ;;  %v4249_v6 = vsel %vm3904_vm4, %v4248_v46, %v4247_v10  ;;  %v4283_v31 = vsel %vm3904_vm4, %v4282_v5, %v4281_v7  ;;  %v3804_v15 = vsub.f32 1.0, %v3803_v38  ;;  %v5454_v19 = vld [vmem:[%s8047_s7 + $0x200] sm:$0xff] }
 0x4c6   :  { %5481 = vmatmul.msk.f32.vlgmr.msrb.gmra.mxu0 %vm3906_vm6, %v4785_v24  ;;  %5440 = vmatpush.msk.msrb.mxu3 %vm3909_vm10, %v5439_v50  ;;  %vm3872_vm2 = vcmp.eq.f32.partialorder %v3871_v26, 8.507059e+37  ;;  %v4894_v22 = vrot.slane %v7881_v43, 6  ;;  %v3896_v50 = vld [vmem:[%s8047_s7] sm:$0xff]  ;;  %vm3808_vm3 = vweird.f32 %v7834_v55  ;;  %v3811_v46 = vand.u32 2147483647, %v7779_v36 }
 0x4c7   :  { %v5599_v25 = vpop.eup %5598  ;;  %4339 = vmatpush.msrb.mxu2 %v5432_v29  ;;  %v3805_v13 = vmul.f32 %v7834_v55, %v3804_v15  ;;  %vm7936_vm9 = vmor %vm3807_vm7, %vm3808_vm3  ;;  %v5394_v26 = vld [vmem:[%s8047_s7 + $0xc0] sm:$0xff]  ;;  %v5419_v15 = vld [vmem:[%s8047_s7 + $0x148] sm:$0x3f] }
 0x4c8   :  { %v5601_v59 = vpop.eup %5600  ;;  %v3863_v1 = vmul.f32 %v5599_v25, %v7803_v30  ;;  %4373 = vmatpush.msrb.mxu3 %v5438_v39  ;;  %vm3868_vm15 = vweird.f32 %v5599_v25  ;;  %v3813_v39 = vand.u32 2147483648, %v7779_v36  ;;  %v5365_v36 = vld [vmem:[%s8047_s7 + $0x28] sm:$0x3f]  ;;  %vm3812_vm13 = vcmp.eq.f32.partialorder %v3811_v46, 8.507059e+37 }
 0x4c9   :  { %v7859_v12 = vadd.f32 1.0, %v5601_v59  ;;  %vm3869_vm1 = vmor %vm3867_vm0, %vm3868_vm15  ;;  %v3806_v29 = vadd.f32 %v7834_v55, %v3805_v13  ;;  %v4755_v13 = vrot.slane %v7794_v28, 4 }
 0x4ca   :  { %v3864_v56 = vsub.f32 1.0, %v3863_v1  ;;  %v4418_v1 = vrot.slane %v7881_v43, 7 }
 0x4cb   :  { %5602 = vrcp.f32 %v7859_v12  ;;  %5423 = vmatmul.msk.f32.vlgmr.msra.gmra.mxu2 %vm3906_vm6, %v4249_v6  ;;  %v3888_v63 = vand.u32 2147483648, %v7859_v12  ;;  %v3886_v2 = vand.u32 2147483647, %v7859_v12  ;;  %vm3882_vm8 = vweird.f32 %v7859_v12 }
 0x4cc   :  { %v3865_v53 = vmul.f32 %v5599_v25, %v3864_v56  ;;  %5446 = vmatpush.msk.msra.mxu2 %vm3909_vm10, %v5445_v49  ;;  %v3810_v18 = vsel %vm7936_vm9, %v7834_v55, %v3806_v29  ;;  %v5364_v56 = vld [vmem:[%s8047_s7 + $0x20] sm:$0xff] }
 0x4cd   :  { %5429 = vmatmul.msk.f32.vlgmr.msra.gmra.mxu3 %vm3906_vm6, %v4283_v31  ;;  %v3889_v10 = vor.u32 1.1754944e-38, %v3888_v63  ;;  %vm3887_vm12 = vcmp.eq.f32.partialorder %v3886_v2, 8.507059e+37  ;;  %v5413_v31 = vld [vmem:[%s8047_s7 + $0x128] sm:$0x3f] }
 0x4ce   :  { %v3866_v16 = vadd.f32 %v5599_v25, %v3865_v53  ;;  %5452 = vmatpush.msk.msra.mxu3 %vm3909_vm10, %v5451_v34  ;;  %4407 = vmatpush.msra.mxu2 %v5444_v32  ;;  %v5389_v34 = vld [vmem:[%s8047_s7 + $0xa8] sm:$0x3f]  ;;  %v5388_v53 = vld [vmem:[%s8047_s7 + $0xa0] sm:$0xff] }
 0x4cf   :  { %v5395_v32 = vld [vmem:[%s8047_s7 + $0xc8] sm:$0x3f] }
 0x4d0   :  { %v3870_v35 = vsel %vm3869_vm1, %v5599_v25, %v3866_v16  ;;  %4441 = vmatpush.msra.mxu3 %v5450_v3  ;;  %v4384_v25 = vrot.slane %v7881_v43, 5  ;;  %v5418_v3 = vld [vmem:[%s8047_s7 + $0x140] sm:$0xff]  ;;  %v4617_v16 = vrot.slane %v7696_v33, 1 }
 0x4d1   :  { %v5603_v48 = vpop.eup %5602  ;;  %v7890_v23 = vsel %vm3872_vm2, %v3874_v61, %v3870_v35  ;;  %v5437_v61 = vld [vmem:[%s8047_s7 + $0x1a8] sm:$0x3f]  ;;  %v5436_v33 = vld [vmem:[%s8047_s7 + $0x1a0] sm:$0xff] }
 0x4d2   :  { %v3878_v30 = vmul.f32 %v5603_v48, %v7859_v12  ;;  %v4318_v41 = vsel %vm3904_vm4, %v7890_v23, %v4317_v44  ;;  %v4351_v58 = vrot.slane %v7890_v23, 2  ;;  %v4811_v0 = vrot.slane %v7890_v23, 7 }
 0x4d3   :  { %5435 = vmatmul.msk.f32.vlgmr.msrb.gmra.mxu2 %vm3906_vm6, %v4318_v41  ;;  %v4895_v52 = vrot.slane %v7890_v23, 5  ;;  %v4385_v24 = vrot.slane %v7890_v23, 4  ;;  %vm3883_vm5 = vweird.f32 %v5603_v48  ;;  %v4419_v45 = vrot.slane %v7890_v23, 6 }
 0x4d4   :  { %v3879_v8 = vsub.f32 1.0, %v3878_v30  ;;  %v4352_v47 = vsel %vm3904_vm4, %v4351_v58, %v4350_v27  ;;  %v4812_v40 = vsel %vm3904_vm4, %v4811_v0, %v7881_v43  ;;  %5456 = vmatpush.msk.msrb.mxu2 %vm3909_vm10, %v5455_v60  ;;  %vm3884_vm11 = vmor %vm3882_vm8, %vm3883_vm5  ;;  %v3814_v12 = vor.u32 1.1754944e-38, %v3813_v39  ;;  %v3075_v0 = vpop.f32.mrf.mxu2 }
 0x4d5   :  { %5441 = vmatmul.msk.f32.vlgmr.msrb.gmra.mxu3 %vm3906_vm6, %v4352_v47  ;;  %5483 = vmatmul.msk.f32.vlgmr.msra.gmra.mxu1 %vm3906_vm6, %v4812_v40  ;;  %v4896_v42 = vsel %vm3904_vm4, %v4895_v52, %v4894_v22  ;;  %v4386_v5 = vsel %vm3904_vm4, %v4385_v24, %v4384_v25  ;;  %v4420_v6 = vsel %vm3904_vm4, %v4419_v45, %v4418_v1  ;;  %v4728_v44 = vrot.slane %v7807_v20, 1 }
 0x4d6   :  { %v3880_v11 = vmul.f32 %v5603_v48, %v3879_v8  ;;  %5489 = vmatmul.msk.f32.vlgmr.msra.gmra.mxu0 %vm3906_vm6, %v4896_v42  ;;  %5458 = vmatpush.msk.msrb.mxu3 %vm3909_vm10, %v3897_v51  ;;  %v3815_v55 = vsel %vm3812_vm13, %v3814_v12, %v3810_v18  ;;  %v4756_v27 = vrot.slane %v7807_v20, 3  ;;  %v4839_v30 = vrot.slane %v7890_v23, 1 }
 0x4d7   :  { %4473 = vmatpush.msrb.mxu2 %v5454_v19  ;;  %v4838_v41 = vrot.slane %v7881_v43, 2  ;;  %v4867_v58 = vrot.slane %v7890_v23, 3  ;;  %v4866_v22 = vrot.slane %v7881_v43, 4 }
 0x4d8   :  { %4500 = vmatpush.msrb.mxu3 %v3896_v50  ;;  %v3881_v59 = vadd.f32 %v5603_v48, %v3880_v11 }
 0x4d9   :  { %v4840_v20 = vsel %vm3904_vm4, %v4839_v30, %v4838_v41  ;;  %v4868_v52 = vsel %vm3904_vm4, %v4867_v58, %v4866_v22 }
 0x4da   :  { %v3885_v38 = vsel %vm3884_vm11, %v5603_v48, %v3881_v59  ;;  %v4727_v48 = vrot.slane %v7794_v28, 2  ;;  %v3212_v28 = vpop.f32.mrf.mxu3 }
 0x4db   :  { %5447 = vmatmul.msk.f32.vlgmr.msra.gmra.mxu2 %vm3906_vm6, %v4386_v5  ;;  %v3890_v49 = vsel %vm3887_vm12, %v3889_v10, %v3885_v38 }
 0x4dc   :  { %v4451_v7 = vrot.slane %v3890_v49, 7  ;;  %5460 = vmatpush.msk.msra.mxu2 %vm3909_vm10, %v5365_v36  ;;  %v4729_v60 = vsel %vm3904_vm4, %v4728_v44, %v4727_v48 }
 0x4dd   :  { %5453 = vmatmul.msk.f32.vlgmr.msra.gmra.mxu3 %vm3906_vm6, %v4420_v6 }
 0x4de   :  { %v4452_v37 = vsel %vm3904_vm4, %v4451_v7, %v3815_v55  ;;  %5462 = vmatpush.msk.msra.mxu3 %vm3909_vm10, %v5371_v57  ;;  %4528 = vmatpush.msra.mxu2 %v5364_v56 }
 0x4e0   :  { %4556 = vmatpush.msra.mxu3 %v5370_v4 }
 0x4e3   :  { %5457 = vmatmul.msk.f32.vlgmr.msrb.gmra.mxu2 %vm3906_vm6, %v4452_v37 }
 0x4e4   :  { %5468 = vmatpush.msk.msrb.mxu2 %vm3909_vm10, %v5389_v34 }
 0x4e5   :  { %5459 = vmatmul.msk.f32.vlgmr.msrb.gmra.mxu3 %vm3906_vm6, %v7632_v21  ;;  %v5412_v21 = vld [vmem:[%s8047_s7 + $0x120] sm:$0xff] }
 0x4e6   :  { %5470 = vmatpush.msk.msrb.mxu3 %vm3909_vm10, %v5395_v32  ;;  %4639 = vmatpush.msrb.mxu2 %v5388_v53 }
 0x4e8   :  { %4667 = vmatpush.msrb.mxu3 %v5394_v26 }
 0x4eb   :  { %5461 = vmatmul.msk.f32.vlgmr.msra.gmra.mxu2 %vm3906_vm6, %v7639_v54  ;;  %v4616_v54 = vrot.slane %v7683_v17, 2  ;;  %v5442_v17 = vld [vmem:[%s8047_s7 + $0x1c0] sm:$0xff] }
 0x4ec   :  { %5476 = vmatpush.msk.msra.mxu2 %vm3909_vm10, %v5413_v31 }
 0x4ed   :  { %5463 = vmatmul.msk.f32.vlgmr.msra.gmra.mxu3 %vm3906_vm6, %v7660_v9  ;;  %v4618_v35 = vsel %vm3904_vm4, %v4617_v16, %v4616_v54  ;;  %v5443_v9 = vld [vmem:[%s8047_s7 + $0x1c8] sm:$0x3f] }
 0x4ee   :  { %5478 = vmatpush.msk.msra.mxu3 %vm3909_vm10, %v5419_v15  ;;  %4750 = vmatpush.msra.mxu2 %v5412_v21 }
 0x4f0   :  { %4778 = vmatpush.msra.mxu3 %v5418_v3 }
 0x4f3   :  { %5469 = vmatmul.msk.f32.vlgmr.msrb.gmra.mxu2 %vm3906_vm6, %v4618_v35 }
 0x4f4   :  { %5484 = vmatpush.msk.msrb.mxu2 %vm3909_vm10, %v5437_v61 }
 0x4f5   :  { %5471 = vmatmul.msk.f32.vlgmr.msrb.gmra.mxu3 %vm3906_vm6, %v7757_v14  ;;  %v4757_v14 = vsel %vm3904_vm4, %v4756_v27, %v4755_v13 }
 0x4f6   :  { %5486 = vmatpush.msk.msrb.mxu3 %vm3909_vm10, %v5443_v9  ;;  %4861 = vmatpush.msrb.mxu2 %v5436_v33  ;;  %vm4939_vm10 = vcmask 74752  }
 0x4f8   :  { %4889 = vmatpush.msrb.mxu3 %v5442_v17 }
 0x4fb   :  { %5477 = vmatmul.msk.f32.vlgmr.msra.gmra.mxu2 %vm3906_vm6, %v4729_v60 }
 0x4fd   :  { %5479 = vmatmul.msk.f32.vlgmr.msra.gmra.mxu3 %vm3906_vm6, %v4757_v14 }
 0x503   :  { %5485 = vmatmul.msk.f32.vlgmr.msrb.gmra.mxu2 %vm3906_vm6, %v4840_v20 }
 0x505   :  { %5487 = vmatmul.msk.f32.vlgmr.msrb.gmra.mxu3 %vm3906_vm6, %v4868_v52 }
 0x523   :  { %v4586_v10 = vpop.f32.mrf.mxu0 }
 0x526   :  { %v3930_v51 = vpop.f32.mrf.mxu2 }
 0x528   :  { %v3964_v8 = vpop.f32.mrf.mxu3 }
 0x52e   :  { %v3998_v47 = vpop.f32.mrf.mxu2 }
 0x530   :  { %v4032_v40 = vpop.f32.mrf.mxu3 }
 0x531   :  { %v4587_v5 = vadd.f32 %v4586_v10, %v4032_v40 }
 0x533   :  { %v4613_v57 = vpop.f32.mrf.mxu1  ;;  %v4697_v55 = vpop.f32.mrf.mxu0 }
 0x536   :  { %v4067_v19 = vpop.f32.mrf.mxu2 }
 0x537   :  { %v4614_v6 = vadd.f32 %v4613_v57, %v4067_v19 }
 0x538   :  { %v4101_v63 = vpop.f32.mrf.mxu3 }
 0x53e   :  { %v4135_v42 = vpop.f32.mrf.mxu2 }
 0x540   :  { %v4169_v23 = vpop.f32.mrf.mxu3 }
 0x541   :  { %v4698_v37 = vadd.f32 %v4697_v55, %v4169_v23 }
 0x542   :  { %v4724_v31 = vpop.f32.mrf.mxu1 }
 0x543   :  { %v4808_v54 = vpop.f32.mrf.mxu0 }
 0x546   :  { %v4204_v50 = vpop.f32.mrf.mxu2 }
 0x547   :  { %v4725_v21 = vadd.f32 %v4724_v31, %v4204_v50 }
 0x548   :  { %v4238_v29 = vpop.f32.mrf.mxu3 }
 0x54e   :  { %v4272_v11 = vpop.f32.mrf.mxu2 }
 0x550   :  { %v4306_v24 = vpop.f32.mrf.mxu3 }
 0x551   :  { %v4809_v17 = vadd.f32 %v4808_v54, %v4306_v24 }
 0x552   :  { %v4835_v44 = vpop.f32.mrf.mxu1 }
 0x553   :  { %v4919_v27 = vpop.f32.mrf.mxu0 }
 0x556   :  { %v4341_v43 = vpop.f32.mrf.mxu2 }
 0x557   :  { %v4836_v13 = vadd.f32 %v4835_v44, %v4341_v43 }
 0x558   :  { %v4375_v2 = vpop.f32.mrf.mxu3 }
 0x55e   :  { %v4409_v46 = vpop.f32.mrf.mxu2 }
 0x560   :  { %v4443_v39 = vpop.f32.mrf.mxu3 }
 0x561   :  { %v4920_v14 = vadd.f32 %v4919_v27, %v4443_v39 }
 0x566   :  { %v4475_v25 = vpop.f32.mrf.mxu2 }
 0x568   :  { %v4502_v45 = vpop.f32.mrf.mxu3 }
 0x569   :  { %v4503_v59 = vadd.f32 %v4502_v45, %v3930_v51  ;;  %v5495_v51 = vld [vmem:[%s8048_s8] ss:$0 sm:$0xff] }
 0x56e   :  { %v4530_v62 = vpop.f32.mrf.mxu2 }
 0x56f   :  { %v4531_v1 = vadd.f32 %v4530_v62, %v3964_v8 }
 0x570   :  { %v4558_v36 = vpop.f32.mrf.mxu3 }
 0x571   :  { %v4922_v18 = vadd.f32 %v4531_v1, %v4503_v59  ;;  %v4559_v38 = vadd.f32 %v4558_v36, %v3998_v47 }
 0x573   :  { %v4923_v12 = vadd.f32 %v4587_v5, %v4559_v38 }
 0x575   :  { %v4930_v49 = vadd.f32 %v4923_v12, %v4922_v18 }
 0x576   :  { %v4641_v56 = vpop.f32.mrf.mxu2 }
 0x577   :  { %v4642_v7 = vadd.f32 %v4641_v56, %v4101_v63 }
 0x578   :  { %v4669_v4 = vpop.f32.mrf.mxu3 }
 0x579   :  { %v4924_v34 = vadd.f32 %v4642_v7, %v4614_v6  ;;  %v4670_v32 = vadd.f32 %v4669_v4, %v4135_v42 }
 0x57b   :  { %v4925_v53 = vadd.f32 %v4698_v37, %v4670_v32 }
 0x57d   :  { %v4931_v26 = vadd.f32 %v4925_v53, %v4924_v34 }
 0x57e   :  { %v4752_v15 = vpop.f32.mrf.mxu2 }
 0x57f   :  { %v4934_v3 = vadd.f32 %v4931_v26, %v4930_v49  ;;  %v4753_v16 = vadd.f32 %v4752_v15, %v4238_v29 }
 0x580   :  { %v4780_v61 = vpop.f32.mrf.mxu3 }
 0x581   :  { %v4926_v35 = vadd.f32 %v4753_v16, %v4725_v21  ;;  %v4781_v9 = vadd.f32 %v4780_v61, %v4272_v11 }
 0x583   :  { %v4927_v30 = vadd.f32 %v4809_v17, %v4781_v9 }
 0x585   :  { %v4932_v20 = vadd.f32 %v4927_v30, %v4926_v35 }
 0x586   :  { %v4863_v33 = vpop.f32.mrf.mxu2 }
 0x587   :  { %v4864_v48 = vadd.f32 %v4863_v33, %v4375_v2 }
 0x588   :  { %v4891_v60 = vpop.f32.mrf.mxu3 }
 0x589   :  { %v4892_v41 = vadd.f32 %v4891_v60, %v4409_v46  ;;  %v4928_v58 = vadd.f32 %v4864_v48, %v4836_v13 }
 0x58b   :  { %v4929_v0 = vadd.f32 %v4920_v14, %v4892_v41 }
 0x58d   :  { %v4933_v22 = vadd.f32 %v4929_v0, %v4928_v58 }
 0x58f   :  { %v4935_v28 = vadd.f32 %v4933_v22, %v4932_v20 }
 0x591   :  { %v4936_v52 = vadd.f32 %v4935_v28, %v4934_v3 }
 0x593   :  { %v4937_v8 = vadd.f32 %v4936_v52, %v4475_v25 }
 0x595   :  { %v4938_v47 = vadd.f32 %v5495_v51, %v4937_v8 }
 0x597   :  { %4940 = vst.msk [vmem:[#allocation4] sm:$0x3] %vm4939_vm10, %v4938_v47 }
 0x598   :  { %4951 = dma.vmem_to_hbm [thread:$0]  %s4947_s17, 32, %s4949_s5, [#allocation5]  }
 0x599   :  { %5629 = dma.done.wait [#allocation5], 32  }
 0x59a   :  { %5630 = vsyncadd [#allocation5], 4294967264 }
 0x59b   :  { %4956 = vsyncpa [#allocation5], 1 }

</bundles_post_ra>
